<compile_context>
chip_gen: v5e
topology: v5e:2x2
jax: 0.10.0
libtpu: 0.0.40
codegen_flags: <defaults>
</compile_context>

<pallas_src>
import jax
import jax.numpy as jnp
from jax import lax
from jax.experimental import pallas as pl
from jax.experimental.pallas import tpu as pltpu

EPS = 1e-5


# ---------------------------------------------------------------------------
# Pallas kernels
# ---------------------------------------------------------------------------
def _conv_bias_stats_kernel(xcol_ref, w_ref, b_ref, y_ref, s_ref, ss_ref):
    """One (TM, 27*Cin) x (27*Cin, Cout) matmul + bias, plus per-tile BN sums.

    xcol_ref : (TM, K)      bf16  im2col slab tile (K = 27*Cin)
    w_ref    : (K, Cout)    bf16
    b_ref    : (1, Cout)    f32
    y_ref    : (TM, Cout)   f32   conv + bias output tile
    s_ref    : (1, 1, Cout) f32   per-tile sum of y        (for BN mean)
    ss_ref   : (1, 1, Cout) f32   per-tile sum of y*y      (for BN var)
    """
    y = jnp.dot(xcol_ref[...], w_ref[...], preferred_element_type=jnp.float32)
    y = y + b_ref[...]
    y_ref[...] = y
    s_ref[...] = jnp.sum(y, axis=0, keepdims=True).reshape(s_ref.shape)
    ss_ref[...] = jnp.sum(y * y, axis=0, keepdims=True).reshape(ss_ref.shape)


def _bn_relu_kernel(y_ref, scale_ref, shift_ref, o_ref):
    """Apply pass: out = relu(y * scale + shift).  (stage 1; out is bf16)"""
    h = y_ref[...] * scale_ref[...] + shift_ref[...]
    o_ref[...] = jnp.maximum(h, 0.0).astype(o_ref.dtype)


def _bn_residual_relu_kernel(y_ref, xres_ref, wr_ref, scale_ref, shift_ref,
                             br_ref, o_ref):
    """Stage-2 apply: relu( relu(y*scale+shift) + (x @ wr + br) ).

    y_ref    : (TM, Cout) f32   stage-2 conv + bias output tile
    xres_ref : (TM, Cin)  bf16  original input tile (flattened NDHWC)
    wr_ref   : (Cin, Cout) bf16 1x1x1 residual conv weight
    """
    h = jnp.maximum(y_ref[...] * scale_ref[...] + shift_ref[...], 0.0)
    res = jnp.dot(xres_ref[...], wr_ref[...],
                  preferred_element_type=jnp.float32) + br_ref[...]
    o_ref[...] = jnp.maximum(h + res, 0.0)


# ---------------------------------------------------------------------------
# pallas_call wrappers (tiled over M)
# ---------------------------------------------------------------------------
def _cp():
    return pltpu.CompilerParams(
        dimension_semantics=("parallel",),
        vmem_limit_bytes=32 * 1024 * 1024)


def _pick_tm(m):
    """Largest convenient tile size that divides M (keeps BN sums exact)."""
    for tm in (512, 256, 128, 1024, 2048, 64, 32, 16, 8):
        if m % tm == 0:
            return tm
    return m  # fallback: single full-size tile


def _conv_bias_stats(xcol, w_kc, bias_row, tm):
    m, k = xcol.shape
    cout = w_kc.shape[1]
    nt = m // tm
    return pl.pallas_call(
        _conv_bias_stats_kernel,
        out_shape=(
            jax.ShapeDtypeStruct((m, cout), jnp.float32),
            jax.ShapeDtypeStruct((nt, 1, cout), jnp.float32),
            jax.ShapeDtypeStruct((nt, 1, cout), jnp.float32),
        ),
        grid=(nt,),
        in_specs=[
            pl.BlockSpec((tm, k), lambda i: (i, 0)),
            pl.BlockSpec((k, cout), lambda i: (0, 0)),
            pl.BlockSpec((1, cout), lambda i: (0, 0)),
        ],
        out_specs=(
            pl.BlockSpec((tm, cout), lambda i: (i, 0)),
            pl.BlockSpec((1, 1, cout), lambda i: (i, 0, 0)),
            pl.BlockSpec((1, 1, cout), lambda i: (i, 0, 0)),
        ),
        compiler_params=_cp(),
    )(xcol, w_kc, bias_row)


def _bn_relu_apply(y, scale_row, shift_row, tm, out_dtype):
    m, cout = y.shape
    nt = m // tm
    return pl.pallas_call(
        _bn_relu_kernel,
        out_shape=jax.ShapeDtypeStruct((m, cout), out_dtype),
        grid=(nt,),
        in_specs=[
            pl.BlockSpec((tm, cout), lambda i: (i, 0)),
            pl.BlockSpec((1, cout), lambda i: (0, 0)),
            pl.BlockSpec((1, cout), lambda i: (0, 0)),
        ],
        out_specs=pl.BlockSpec((tm, cout), lambda i: (i, 0)),
        compiler_params=_cp(),
    )(y, scale_row, shift_row)


def _bn_residual_relu_apply(y, scale_row, shift_row, xres, wr, br_row, tm):
    m, cout = y.shape
    cin = xres.shape[1]
    nt = m // tm
    return pl.pallas_call(
        _bn_residual_relu_kernel,
        out_shape=jax.ShapeDtypeStruct((m, cout), jnp.float32),
        grid=(nt,),
        in_specs=[
            pl.BlockSpec((tm, cout), lambda i: (i, 0)),
            pl.BlockSpec((tm, cin), lambda i: (i, 0)),
            pl.BlockSpec((cin, cout), lambda i: (0, 0)),
            pl.BlockSpec((1, cout), lambda i: (0, 0)),
            pl.BlockSpec((1, cout), lambda i: (0, 0)),
            pl.BlockSpec((1, cout), lambda i: (0, 0)),
        ],
        out_specs=pl.BlockSpec((tm, cout), lambda i: (i, 0)),
        compiler_params=_cp(),
    )(y, xres, wr, scale_row, shift_row, br_row)


# ---------------------------------------------------------------------------
# JAX glue: layout plumbing (pad / shifted-view concat / reshapes)
# ---------------------------------------------------------------------------
def _im2col_27(x_ndhwc):
    """(N,D,H,W,C) -> (M, 27*C) im2col: 27 shifted views concat on channels."""
    n, d, h, w, c = x_ndhwc.shape
    xp = jnp.pad(x_ndhwc, ((0, 0), (1, 1), (1, 1), (1, 1), (0, 0)))
    cols = []
    for kd in range(3):
        for kh in range(3):
            for kw in range(3):
                cols.append(xp[:, kd:kd + d, kh:kh + h, kw:kw + w, :])
    return jnp.concatenate(cols, axis=-1).reshape(n * d * h * w, 27 * c)


def _conv_weight_27(wgt):
    """PyTorch Conv3d weight (Cout, Cin, 3, 3, 3) -> (27*Cin, Cout)."""
    cout, cin = wgt.shape[0], wgt.shape[1]
    return jnp.transpose(wgt, (2, 3, 4, 1, 0)).reshape(27 * cin, cout)


def _bn_scale_shift(s, ss, m, gamma, beta):
    """Combine per-tile sums into training-mode BN affine (biased variance)."""
    mean = jnp.sum(s, axis=(0, 1)) / m
    ex2 = jnp.sum(ss, axis=(0, 1)) / m
    var = jnp.maximum(ex2 - mean * mean, 0.0)
    scale = gamma * lax.rsqrt(var + EPS)
    shift = beta - mean * scale
    return scale.reshape(1, -1).astype(jnp.float32), \
        shift.reshape(1, -1).astype(jnp.float32)


def _row(v):
    return v.reshape(1, -1).astype(jnp.float32)


@jax.jit
def double_conv_forward(x_ncdhw, params):
    """Forward pass of DoubleConv.  Input/output are NCDHW like PyTorch."""
    x = jnp.transpose(x_ncdhw, (0, 2, 3, 4, 1)).astype(jnp.float32)  # NDHWC
    n, d, h, w, cin = x.shape
    cout = params["w1"].shape[0]
    m = n * d * h * w
    tm = _pick_tm(m)

    x_bf = x.astype(jnp.bfloat16)

    # ---- stage 1: Conv3d(3x3x3, pad=1) + BN + ReLU -------------------------
    xcol1 = _im2col_27(x_bf)                                   # (M, 27*Cin) bf16
    w1 = _conv_weight_27(params["w1"]).astype(jnp.bfloat16)    # (27*Cin, Cout)
    y1, s1, ss1 = _conv_bias_stats(xcol1, w1, _row(params["b1"]), tm)
    scale1, shift1 = _bn_scale_shift(s1, ss1, m,
                                     params["gamma1"], params["beta1"])
    h1 = _bn_relu_apply(y1, scale1, shift1, tm, jnp.bfloat16)  # (M, Cout) bf16

    # ---- stage 2: Conv3d(3x3x3, pad=1) + BN + ReLU + residual + ReLU -------
    xcol2 = _im2col_27(h1.reshape(n, d, h, w, cout))           # (M, 27*Cout) bf16
    w2 = _conv_weight_27(params["w2"]).astype(jnp.bfloat16)    # (27*Cout, Cout)
    y2, s2, ss2 = _conv_bias_stats(xcol2, w2, _row(params["b2"]), tm)
    scale2, shift2 = _bn_scale_shift(s2, ss2, m,
                                     params["gamma2"], params["beta2"])

    xres = x_bf.reshape(m, cin)                                # residual input
    wr = params["wr"].reshape(cout, cin).T.astype(jnp.bfloat16)
    out = _bn_residual_relu_apply(y2, scale2, shift2, xres, wr,
                                  _row(params["br"]), tm)      # (M, Cout) f32

    out = out.reshape(n, d, h, w, cout)
    return jnp.transpose(out, (0, 4, 1, 2, 3))                 # back to NCDHW


# ---------------------------------------------------------------------------
# Parameter init (deterministic, synthetic) + pure-JAX reference
# ---------------------------------------------------------------------------
def init_params(key, in_ch, out_ch):
    ks = jax.random.split(key, 10)
    f32 = jnp.float32
    return {
        "w1": 0.1 * jax.random.normal(ks[0], (out_ch, in_ch, 3, 3, 3), f32),
        "b1": 0.1 * jax.random.normal(ks[1], (out_ch,), f32),
        "gamma1": 1.0 + 0.1 * jax.random.normal(ks[2], (out_ch,), f32),
        "beta1": 0.1 * jax.random.normal(ks[3], (out_ch,), f32),
        "w2": 0.1 * jax.random.normal(ks[4], (out_ch, out_ch, 3, 3, 3), f32),
        "b2": 0.1 * jax.random.normal(ks[5], (out_ch,), f32),
        "gamma2": 1.0 + 0.1 * jax.random.normal(ks[6], (out_ch,), f32),
        "beta2": 0.1 * jax.random.normal(ks[7], (out_ch,), f32),
        "wr": 0.1 * jax.random.normal(ks[8], (out_ch, in_ch, 1, 1, 1), f32),
        "br": 0.1 * jax.random.normal(ks[9], (out_ch,), f32),
    }


def reference_forward(x_ncdhw, params, matmul_dtype=jnp.float32):
    """Pure-JAX reference.  matmul_dtype=bf16 mirrors the kernel's MXU operand
    precision (f32 accumulation); matmul_dtype=f32 is the exact PyTorch math."""
    x = jnp.transpose(x_ncdhw, (0, 2, 3, 4, 1)).astype(jnp.float32)  # NDHWC
    md = matmul_dtype

    def conv3(xin, wgt, b):
        w_dhwio = jnp.transpose(wgt, (2, 3, 4, 1, 0)).astype(md)
        dn = lax.conv_dimension_numbers(xin.shape, w_dhwio.shape,
                                        ("NDHWC", "DHWIO", "NDHWC"))
        return lax.conv_general_dilated(
            xin.astype(md), w_dhwio, (1, 1, 1), "SAME",
            dimension_numbers=dn,
            preferred_element_type=jnp.float32) + b

    def bn_relu(y, gamma, beta):
        mean = jnp.mean(y, axis=(0, 1, 2, 3), keepdims=True)
        var = jnp.mean(jnp.square(y - mean), axis=(0, 1, 2, 3), keepdims=True)
        return jnp.maximum((y - mean) * lax.rsqrt(var + EPS) * gamma + beta, 0.0)

    h1 = bn_relu(conv3(x, params["w1"], params["b1"]),
                 params["gamma1"], params["beta1"])
    h2 = bn_relu(conv3(h1, params["w2"], params["b2"]),
                 params["gamma2"], params["beta2"])
    wr = params["wr"].reshape(params["wr"].shape[0], -1)
    res = jnp.einsum("ndhwc,oc->ndhwo", x.astype(md), wr.astype(md),
                     preferred_element_type=jnp.float32) + params["br"]
    out = jnp.maximum(h2 + res, 0.0)
    return jnp.transpose(out, (0, 4, 1, 2, 3))


if __name__ == "__main__":
    key = jax.random.PRNGKey(0)
    k_x, k_p = jax.random.split(key)
    in_ch, out_ch = 4, 8
    x = jax.random.normal(k_x, (2, in_ch, 16, 16, 16), jnp.float32)  # NCDHW
    params = init_params(k_p, in_ch, out_ch)

    out = jax.block_until_ready(double_conv_forward(x, params))
    assert out.shape == (2, out_ch, 16, 16, 16), out.shape

    # Strict check against a reference that uses the same bf16 matmul operands
    # (f32 accumulation / f32 BN) as the kernel.
    ref_bf = jax.block_until_ready(reference_forward(x, params, jnp.bfloat16))
    err_bf = float(jnp.max(jnp.abs(out - ref_bf)))
    assert jnp.allclose(out, ref_bf, atol=1e-3, rtol=1e-3), err_bf

    # Looser sanity check against the full-f32 reference (bounds the bf16
    # quantization error of the MXU operands).
    ref_f32 = jax.block_until_ready(reference_forward(x, params, jnp.float32))
    err_f32 = float(jnp.max(jnp.abs(out - ref_f32)))
    assert jnp.allclose(out, ref_f32, atol=5e-2, rtol=5e-2), err_f32

    print("KERNEL_OK")
</pallas_src>

<mosaic_0001>
module attributes {stable_mosaic.version = 11 : i64} {
  func.func @_conv_bias_stats_kernel(%arg0: i32, %arg1: memref<512x108xbf16, #tpu.memory_space<vmem>>, %arg2: memref<108x8xbf16, #tpu.memory_space<vmem>>, %arg3: memref<1x8xf32, #tpu.memory_space<vmem>>, %arg4: memref<512x8xf32, #tpu.memory_space<vmem>>, %arg5: memref<1x1x8xf32, #tpu.memory_space<vmem>>, %arg6: memref<1x1x8xf32, #tpu.memory_space<vmem>>) attributes {dimension_semantics = [#tpu.dimension_semantics<parallel>], iteration_bounds = array<i64: 16>, scalar_prefetch = 0 : i64, scratch_operands = 0 : i64, tpu.core_type = #tpu.core_type<tc>, window_params = [{transform_indices = @transform_0, window_bounds = array<i64: 512, 108>}, {pipeline_mode = #tpu.pipeline_mode<synchronous>, transform_indices = @transform_1, window_bounds = array<i64: 108, 8>}, {pipeline_mode = #tpu.pipeline_mode<synchronous>, transform_indices = @transform_2, window_bounds = array<i64: 1, 8>}, {transform_indices = @transform_3, window_bounds = array<i64: 512, 8>}, {transform_indices = @transform_4, window_bounds = array<i64: 1, 1, 8>}, {transform_indices = @transform_5, window_bounds = array<i64: 1, 1, 8>}]} {
    %c0 = arith.constant 0 : index
    %c0_0 = arith.constant 0 : index
    %0 = vector.load %arg1[%c0, %c0_0] : memref<512x108xbf16, #tpu.memory_space<vmem>>, vector<512x108xbf16>
    %c0_1 = arith.constant 0 : index
    %c0_2 = arith.constant 0 : index
    %1 = vector.load %arg2[%c0_1, %c0_2] : memref<108x8xbf16, #tpu.memory_space<vmem>>, vector<108x8xbf16>
    %cst = arith.constant dense<0.000000e+00> : vector<512x8xf32>
    %2 = tpu.matmul %0, %1, %cst {dimension_numbers = #tpu.dot_dimension_numbers<[1], [0], [0], [1], [0, 0, 1, 1], [], []>} : vector<512x108xbf16>, vector<108x8xbf16>, vector<512x8xf32> -> vector<512x8xf32>
    %c0_3 = arith.constant 0 : index
    %c0_4 = arith.constant 0 : index
    %3 = vector.load %arg3[%c0_3, %c0_4] : memref<1x8xf32, #tpu.memory_space<vmem>>, vector<1x8xf32>
    %4 = vector.broadcast %3 : vector<1x8xf32> to vector<512x8xf32>
    %5 = arith.addf %2, %4 : vector<512x8xf32>
    %c0_5 = arith.constant 0 : index
    %c0_6 = arith.constant 0 : index
    %6 = vector.load %arg4[%c0_5, %c0_6] : memref<512x8xf32, #tpu.memory_space<vmem>>, vector<512x8xf32>
    tpu.vector_store %arg4[%c0_5, %c0_6], %5 {strides = array<i32>} : memref<512x8xf32, #tpu.memory_space<vmem>>, vector<512x8xf32>,
    %cst_7 = arith.constant dense<0.000000e+00> : vector<8xf32>
    %7 = vector.multi_reduction <add>, %5, %cst_7 [0] : vector<512x8xf32> to vector<8xf32>
    %8 = vector.shape_cast %7 : vector<8xf32> to vector<1x8xf32>
    %9 = vector.shape_cast %8 : vector<1x8xf32> to vector<1x1x8xf32>
    %c0_8 = arith.constant 0 : index
    %c0_9 = arith.constant 0 : index
    %c0_10 = arith.constant 0 : index
    %10 = vector.load %arg5[%c0_8, %c0_9, %c0_10] : memref<1x1x8xf32, #tpu.memory_space<vmem>>, vector<1x1x8xf32>
    tpu.vector_store %arg5[%c0_8, %c0_9, %c0_10], %9 {strides = array<i32>} : memref<1x1x8xf32, #tpu.memory_space<vmem>>, vector<1x1x8xf32>,
    %11 = arith.mulf %5, %5 : vector<512x8xf32>
    %cst_11 = arith.constant dense<0.000000e+00> : vector<8xf32>
    %12 = vector.multi_reduction <add>, %11, %cst_11 [0] : vector<512x8xf32> to vector<8xf32>
    %13 = vector.shape_cast %12 : vector<8xf32> to vector<1x8xf32>
    %14 = vector.shape_cast %13 : vector<1x8xf32> to vector<1x1x8xf32>
    %c0_12 = arith.constant 0 : index
    %c0_13 = arith.constant 0 : index
    %c0_14 = arith.constant 0 : index
    %15 = vector.load %arg6[%c0_12, %c0_13, %c0_14] : memref<1x1x8xf32, #tpu.memory_space<vmem>>, vector<1x1x8xf32>
    tpu.vector_store %arg6[%c0_12, %c0_13, %c0_14], %14 {strides = array<i32>} : memref<1x1x8xf32, #tpu.memory_space<vmem>>, vector<1x1x8xf32>,
    return
  }
  func.func @transform_0(%arg0: i32) -> (i32, i32) {
    %c0_i32 = arith.constant 0 : i32
    %c0_i32_0 = arith.constant 0 : i32
    return %arg0, %c0_i32 : i32, i32
  }
  func.func @transform_1(%arg0: i32) -> (i32, i32) {
    %c0_i32 = arith.constant 0 : i32
    %c0_i32_0 = arith.constant 0 : i32
    %c0_i32_1 = arith.constant 0 : i32
    return %c0_i32, %c0_i32_0 : i32, i32
  }
  func.func @transform_2(%arg0: i32) -> (i32, i32) {
    %c0_i32 = arith.constant 0 : i32
    %c0_i32_0 = arith.constant 0 : i32
    %c0_i32_1 = arith.constant 0 : i32
    return %c0_i32, %c0_i32_0 : i32, i32
  }
  func.func @transform_3(%arg0: i32) -> (i32, i32) {
    %c0_i32 = arith.constant 0 : i32
    %c0_i32_0 = arith.constant 0 : i32
    return %arg0, %c0_i32 : i32, i32
  }
  func.func @transform_4(%arg0: i32) -> (i32, i32, i32) {
    %c0_i32 = arith.constant 0 : i32
    %c0_i32_0 = arith.constant 0 : i32
    %c0_i32_1 = arith.constant 0 : i32
    return %arg0, %c0_i32, %c0_i32_0 : i32, i32, i32
  }
  func.func @transform_5(%arg0: i32) -> (i32, i32, i32) {
    %c0_i32 = arith.constant 0 : i32
    %c0_i32_0 = arith.constant 0 : i32
    %c0_i32_1 = arith.constant 0 : i32
    return %arg0, %c0_i32, %c0_i32_0 : i32, i32, i32
  }
}

module attributes {stable_mosaic.version = 11 : i64} {
  func.func @_bn_relu_kernel(%arg0: i32, %arg1: memref<512x8xf32, #tpu.memory_space<vmem>>, %arg2: memref<1x8xf32, #tpu.memory_space<vmem>>, %arg3: memref<1x8xf32, #tpu.memory_space<vmem>>, %arg4: memref<512x8xbf16, #tpu.memory_space<vmem>>) attributes {dimension_semantics = [#tpu.dimension_semantics<parallel>], iteration_bounds = array<i64: 16>, scalar_prefetch = 0 : i64, scratch_operands = 0 : i64, tpu.core_type = #tpu.core_type<tc>, window_params = [{transform_indices = @transform_0, window_bounds = array<i64: 512, 8>}, {pipeline_mode = #tpu.pipeline_mode<synchronous>, transform_indices = @transform_1, window_bounds = array<i64: 1, 8>}, {pipeline_mode = #tpu.pipeline_mode<synchronous>, transform_indices = @transform_2, window_bounds = array<i64: 1, 8>}, {transform_indices = @transform_3, window_bounds = array<i64: 512, 8>}]} {
    %c0 = arith.constant 0 : index
    %c0_0 = arith.constant 0 : index
    %0 = vector.load %arg1[%c0, %c0_0] : memref<512x8xf32, #tpu.memory_space<vmem>>, vector<512x8xf32>
    %c0_1 = arith.constant 0 : index
    %c0_2 = arith.constant 0 : index
    %1 = vector.load %arg2[%c0_1, %c0_2] : memref<1x8xf32, #tpu.memory_space<vmem>>, vector<1x8xf32>
    %2 = vector.broadcast %1 : vector<1x8xf32> to vector<512x8xf32>
    %3 = arith.mulf %0, %2 : vector<512x8xf32>
    %c0_3 = arith.constant 0 : index
    %c0_4 = arith.constant 0 : index
    %4 = vector.load %arg3[%c0_3, %c0_4] : memref<1x8xf32, #tpu.memory_space<vmem>>, vector<1x8xf32>
    %5 = vector.broadcast %4 : vector<1x8xf32> to vector<512x8xf32>
    %6 = arith.addf %3, %5 : vector<512x8xf32>
    %cst = arith.constant 0.000000e+00 : f32
    %7 = vector.broadcast %cst : f32 to vector<512x8xf32>
    %8 = arith.maximumf %6, %7 : vector<512x8xf32>
    %9 = arith.truncf %8 : vector<512x8xf32> to vector<512x8xbf16>
    %c0_5 = arith.constant 0 : index
    %c0_6 = arith.constant 0 : index
    %10 = vector.load %arg4[%c0_5, %c0_6] : memref<512x8xbf16, #tpu.memory_space<vmem>>, vector<512x8xbf16>
    tpu.vector_store %arg4[%c0_5, %c0_6], %9 {strides = array<i32>} : memref<512x8xbf16, #tpu.memory_space<vmem>>, vector<512x8xbf16>,
    return
  }
  func.func @transform_0(%arg0: i32) -> (i32, i32) {
    %c0_i32 = arith.constant 0 : i32
    %c0_i32_0 = arith.constant 0 : i32
    return %arg0, %c0_i32 : i32, i32
  }
  func.func @transform_1(%arg0: i32) -> (i32, i32) {
    %c0_i32 = arith.constant 0 : i32
    %c0_i32_0 = arith.constant 0 : i32
    %c0_i32_1 = arith.constant 0 : i32
    return %c0_i32, %c0_i32_0 : i32, i32
  }
  func.func @transform_2(%arg0: i32) -> (i32, i32) {
    %c0_i32 = arith.constant 0 : i32
    %c0_i32_0 = arith.constant 0 : i32
    %c0_i32_1 = arith.constant 0 : i32
    return %c0_i32, %c0_i32_0 : i32, i32
  }
  func.func @transform_3(%arg0: i32) -> (i32, i32) {
    %c0_i32 = arith.constant 0 : i32
    %c0_i32_0 = arith.constant 0 : i32
    return %arg0, %c0_i32 : i32, i32
  }
}

module attributes {stable_mosaic.version = 11 : i64} {
  func.func @_conv_bias_stats_kernel(%arg0: i32, %arg1: memref<512x216xbf16, #tpu.memory_space<vmem>>, %arg2: memref<216x8xbf16, #tpu.memory_space<vmem>>, %arg3: memref<1x8xf32, #tpu.memory_space<vmem>>, %arg4: memref<512x8xf32, #tpu.memory_space<vmem>>, %arg5: memref<1x1x8xf32, #tpu.memory_space<vmem>>, %arg6: memref<1x1x8xf32, #tpu.memory_space<vmem>>) attributes {dimension_semantics = [#tpu.dimension_semantics<parallel>], iteration_bounds = array<i64: 16>, scalar_prefetch = 0 : i64, scratch_operands = 0 : i64, tpu.core_type = #tpu.core_type<tc>, window_params = [{transform_indices = @transform_0, window_bounds = array<i64: 512, 216>}, {pipeline_mode = #tpu.pipeline_mode<synchronous>, transform_indices = @transform_1, window_bounds = array<i64: 216, 8>}, {pipeline_mode = #tpu.pipeline_mode<synchronous>, transform_indices = @transform_2, window_bounds = array<i64: 1, 8>}, {transform_indices = @transform_3, window_bounds = array<i64: 512, 8>}, {transform_indices = @transform_4, window_bounds = array<i64: 1, 1, 8>}, {transform_indices = @transform_5, window_bounds = array<i64: 1, 1, 8>}]} {
    %c0 = arith.constant 0 : index
    %c0_0 = arith.constant 0 : index
    %0 = vector.load %arg1[%c0, %c0_0] : memref<512x216xbf16, #tpu.memory_space<vmem>>, vector<512x216xbf16>
    %c0_1 = arith.constant 0 : index
    %c0_2 = arith.constant 0 : index
    %1 = vector.load %arg2[%c0_1, %c0_2] : memref<216x8xbf16, #tpu.memory_space<vmem>>, vector<216x8xbf16>
    %cst = arith.constant dense<0.000000e+00> : vector<512x8xf32>
    %2 = tpu.matmul %0, %1, %cst {dimension_numbers = #tpu.dot_dimension_numbers<[1], [0], [0], [1], [0, 0, 1, 1], [], []>} : vector<512x216xbf16>, vector<216x8xbf16>, vector<512x8xf32> -> vector<512x8xf32>
    %c0_3 = arith.constant 0 : index
    %c0_4 = arith.constant 0 : index
    %3 = vector.load %arg3[%c0_3, %c0_4] : memref<1x8xf32, #tpu.memory_space<vmem>>, vector<1x8xf32>
    %4 = vector.broadcast %3 : vector<1x8xf32> to vector<512x8xf32>
    %5 = arith.addf %2, %4 : vector<512x8xf32>
    %c0_5 = arith.constant 0 : index
    %c0_6 = arith.constant 0 : index
    %6 = vector.load %arg4[%c0_5, %c0_6] : memref<512x8xf32, #tpu.memory_space<vmem>>, vector<512x8xf32>
    tpu.vector_store %arg4[%c0_5, %c0_6], %5 {strides = array<i32>} : memref<512x8xf32, #tpu.memory_space<vmem>>, vector<512x8xf32>,
    %cst_7 = arith.constant dense<0.000000e+00> : vector<8xf32>
    %7 = vector.multi_reduction <add>, %5, %cst_7 [0] : vector<512x8xf32> to vector<8xf32>
    %8 = vector.shape_cast %7 : vector<8xf32> to vector<1x8xf32>
    %9 = vector.shape_cast %8 : vector<1x8xf32> to vector<1x1x8xf32>
    %c0_8 = arith.constant 0 : index
    %c0_9 = arith.constant 0 : index
    %c0_10 = arith.constant 0 : index
    %10 = vector.load %arg5[%c0_8, %c0_9, %c0_10] : memref<1x1x8xf32, #tpu.memory_space<vmem>>, vector<1x1x8xf32>
    tpu.vector_store %arg5[%c0_8, %c0_9, %c0_10], %9 {strides = array<i32>} : memref<1x1x8xf32, #tpu.memory_space<vmem>>, vector<1x1x8xf32>,
    %11 = arith.mulf %5, %5 : vector<512x8xf32>
    %cst_11 = arith.constant dense<0.000000e+00> : vector<8xf32>
    %12 = vector.multi_reduction <add>, %11, %cst_11 [0] : vector<512x8xf32> to vector<8xf32>
    %13 = vector.shape_cast %12 : vector<8xf32> to vector<1x8xf32>
    %14 = vector.shape_cast %13 : vector<1x8xf32> to vector<1x1x8xf32>
    %c0_12 = arith.constant 0 : index
    %c0_13 = arith.constant 0 : index
    %c0_14 = arith.constant 0 : index
    %15 = vector.load %arg6[%c0_12, %c0_13, %c0_14] : memref<1x1x8xf32, #tpu.memory_space<vmem>>, vector<1x1x8xf32>
    tpu.vector_store %arg6[%c0_12, %c0_13, %c0_14], %14 {strides = array<i32>} : memref<1x1x8xf32, #tpu.memory_space<vmem>>, vector<1x1x8xf32>,
    return
  }
  func.func @transform_0(%arg0: i32) -> (i32, i32) {
    %c0_i32 = arith.constant 0 : i32
    %c0_i32_0 = arith.constant 0 : i32
    return %arg0, %c0_i32 : i32, i32
  }
  func.func @transform_1(%arg0: i32) -> (i32, i32) {
    %c0_i32 = arith.constant 0 : i32
    %c0_i32_0 = arith.constant 0 : i32
    %c0_i32_1 = arith.constant 0 : i32
    return %c0_i32, %c0_i32_0 : i32, i32
  }
  func.func @transform_2(%arg0: i32) -> (i32, i32) {
    %c0_i32 = arith.constant 0 : i32
    %c0_i32_0 = arith.constant 0 : i32
    %c0_i32_1 = arith.constant 0 : i32
    return %c0_i32, %c0_i32_0 : i32, i32
  }
  func.func @transform_3(%arg0: i32) -> (i32, i32) {
    %c0_i32 = arith.constant 0 : i32
    %c0_i32_0 = arith.constant 0 : i32
    return %arg0, %c0_i32 : i32, i32
  }
  func.func @transform_4(%arg0: i32) -> (i32, i32, i32) {
    %c0_i32 = arith.constant 0 : i32
    %c0_i32_0 = arith.constant 0 : i32
    %c0_i32_1 = arith.constant 0 : i32
    return %arg0, %c0_i32, %c0_i32_0 : i32, i32, i32
  }
  func.func @transform_5(%arg0: i32) -> (i32, i32, i32) {
    %c0_i32 = arith.constant 0 : i32
    %c0_i32_0 = arith.constant 0 : i32
    %c0_i32_1 = arith.constant 0 : i32
    return %arg0, %c0_i32, %c0_i32_0 : i32, i32, i32
  }
}

module attributes {stable_mosaic.version = 11 : i64} {
  func.func @_bn_residual_relu_kernel(%arg0: i32, %arg1: memref<512x8xf32, #tpu.memory_space<vmem>>, %arg2: memref<512x4xbf16, #tpu.memory_space<vmem>>, %arg3: memref<4x8xbf16, #tpu.memory_space<vmem>>, %arg4: memref<1x8xf32, #tpu.memory_space<vmem>>, %arg5: memref<1x8xf32, #tpu.memory_space<vmem>>, %arg6: memref<1x8xf32, #tpu.memory_space<vmem>>, %arg7: memref<512x8xf32, #tpu.memory_space<vmem>>) attributes {dimension_semantics = [#tpu.dimension_semantics<parallel>], iteration_bounds = array<i64: 16>, scalar_prefetch = 0 : i64, scratch_operands = 0 : i64, tpu.core_type = #tpu.core_type<tc>, window_params = [{transform_indices = @transform_0, window_bounds = array<i64: 512, 8>}, {transform_indices = @transform_1, window_bounds = array<i64: 512, 4>}, {pipeline_mode = #tpu.pipeline_mode<synchronous>, transform_indices = @transform_2, window_bounds = array<i64: 4, 8>}, {pipeline_mode = #tpu.pipeline_mode<synchronous>, transform_indices = @transform_3, window_bounds = array<i64: 1, 8>}, {pipeline_mode = #tpu.pipeline_mode<synchronous>, transform_indices = @transform_4, window_bounds = array<i64: 1, 8>}, {pipeline_mode = #tpu.pipeline_mode<synchronous>, transform_indices = @transform_5, window_bounds = array<i64: 1, 8>}, {transform_indices = @transform_6, window_bounds = array<i64: 512, 8>}]} {
    %c0 = arith.constant 0 : index
    %c0_0 = arith.constant 0 : index
    %0 = vector.load %arg1[%c0, %c0_0] : memref<512x8xf32, #tpu.memory_space<vmem>>, vector<512x8xf32>
    %c0_1 = arith.constant 0 : index
    %c0_2 = arith.constant 0 : index
    %1 = vector.load %arg4[%c0_1, %c0_2] : memref<1x8xf32, #tpu.memory_space<vmem>>, vector<1x8xf32>
    %2 = vector.broadcast %1 : vector<1x8xf32> to vector<512x8xf32>
    %3 = arith.mulf %0, %2 : vector<512x8xf32>
    %c0_3 = arith.constant 0 : index
    %c0_4 = arith.constant 0 : index
    %4 = vector.load %arg5[%c0_3, %c0_4] : memref<1x8xf32, #tpu.memory_space<vmem>>, vector<1x8xf32>
    %5 = vector.broadcast %4 : vector<1x8xf32> to vector<512x8xf32>
    %6 = arith.addf %3, %5 : vector<512x8xf32>
    %cst = arith.constant 0.000000e+00 : f32
    %7 = vector.broadcast %cst : f32 to vector<512x8xf32>
    %8 = arith.maximumf %6, %7 : vector<512x8xf32>
    %c0_5 = arith.constant 0 : index
    %c0_6 = arith.constant 0 : index
    %9 = vector.load %arg2[%c0_5, %c0_6] : memref<512x4xbf16, #tpu.memory_space<vmem>>, vector<512x4xbf16>
    %c0_7 = arith.constant 0 : index
    %c0_8 = arith.constant 0 : index
    %10 = vector.load %arg3[%c0_7, %c0_8] : memref<4x8xbf16, #tpu.memory_space<vmem>>, vector<4x8xbf16>
    %cst_9 = arith.constant dense<0.000000e+00> : vector<512x8xf32>
    %11 = tpu.matmul %9, %10, %cst_9 {dimension_numbers = #tpu.dot_dimension_numbers<[1], [0], [0], [1], [0, 0, 1, 1], [], []>} : vector<512x4xbf16>, vector<4x8xbf16>, vector<512x8xf32> -> vector<512x8xf32>
    %c0_10 = arith.constant 0 : index
    %c0_11 = arith.constant 0 : index
    %12 = vector.load %arg6[%c0_10, %c0_11] : memref<1x8xf32, #tpu.memory_space<vmem>>, vector<1x8xf32>
    %13 = vector.broadcast %12 : vector<1x8xf32> to vector<512x8xf32>
    %14 = arith.addf %11, %13 : vector<512x8xf32>
    %15 = arith.addf %8, %14 : vector<512x8xf32>
    %cst_12 = arith.constant 0.000000e+00 : f32
    %16 = vector.broadcast %cst_12 : f32 to vector<512x8xf32>
    %17 = arith.maximumf %15, %16 : vector<512x8xf32>
    %c0_13 = arith.constant 0 : index
    %c0_14 = arith.constant 0 : index
    %18 = vector.load %arg7[%c0_13, %c0_14] : memref<512x8xf32, #tpu.memory_space<vmem>>, vector<512x8xf32>
    tpu.vector_store %arg7[%c0_13, %c0_14], %17 {strides = array<i32>} : memref<512x8xf32, #tpu.memory_space<vmem>>, vector<512x8xf32>,
    return
  }
  func.func @transform_0(%arg0: i32) -> (i32, i32) {
    %c0_i32 = arith.constant 0 : i32
    %c0_i32_0 = arith.constant 0 : i32
    return %arg0, %c0_i32 : i32, i32
  }
  func.func @transform_1(%arg0: i32) -> (i32, i32) {
    %c0_i32 = arith.constant 0 : i32
    %c0_i32_0 = arith.constant 0 : i32
    return %arg0, %c0_i32 : i32, i32
  }
  func.func @transform_2(%arg0: i32) -> (i32, i32) {
    %c0_i32 = arith.constant 0 : i32
    %c0_i32_0 = arith.constant 0 : i32
    %c0_i32_1 = arith.constant 0 : i32
    return %c0_i32, %c0_i32_0 : i32, i32
  }
  func.func @transform_3(%arg0: i32) -> (i32, i32) {
    %c0_i32 = arith.constant 0 : i32
    %c0_i32_0 = arith.constant 0 : i32
    %c0_i32_1 = arith.constant 0 : i32
    return %c0_i32, %c0_i32_0 : i32, i32
  }
  func.func @transform_4(%arg0: i32) -> (i32, i32) {
    %c0_i32 = arith.constant 0 : i32
    %c0_i32_0 = arith.constant 0 : i32
    %c0_i32_1 = arith.constant 0 : i32
    return %c0_i32, %c0_i32_0 : i32, i32
  }
  func.func @transform_5(%arg0: i32) -> (i32, i32) {
    %c0_i32 = arith.constant 0 : i32
    %c0_i32_0 = arith.constant 0 : i32
    %c0_i32_1 = arith.constant 0 : i32
    return %c0_i32, %c0_i32_0 : i32, i32
  }
  func.func @transform_6(%arg0: i32) -> (i32, i32) {
    %c0_i32 = arith.constant 0 : i32
    %c0_i32_0 = arith.constant 0 : i32
    return %arg0, %c0_i32 : i32, i32
  }
}

</mosaic_0001>

<bundles_post_ra>
// kernel: double_conv_forward.4
= control target key start
LH: loop header
LB: loop body
LE: loop exit
PB: predicated region body
PF: predicated region fallthrough
CT: control target
= control target key end

     0   :  { %s1609_s18 = smov 0   ;;  %s2394_s0 = inlined_call_operand.vmem [shape: bf16[8192,108], index: 0, kind: input, shape index: {}]   ;;  %s2395_s1 = inlined_call_operand.vmem [shape: bf16[108,8], index: 1, kind: input, shape index: {}]   ;;  %s2396_s2 = inlined_call_operand.vmem [shape: f32[1,8], index: 2, kind: input, shape index: {}]   ;;  %s2397_s3 = inlined_call_operand.vmem [shape: f32[8192,8], index: 3, kind: output, shape index: {0}]   ;;  %s2398_s4 = inlined_call_operand.vmem [shape: f32[16,1,8], index: 4, kind: output, shape index: {1}]   ;;  %s2399_s5 = inlined_call_operand.vmem [shape: f32[16,1,8], index: 5, kind: output, shape index: {2}]  }
   0x1 LB: > { %s1615_s19 = sadd.s32 4294967295, %s1577_s18   ;;  %p1307_p0 = scmp.ge.s32.totalorder %s1577_s18, 1  ;;  %s1577_s18 = sphi %s1609_s18, %s16_s18  }
   0x2   : > { %p193_p1 = scmp.lt.s32.totalorder %s1577_s18, 17 }
   0x4   : > { %p194_p2 = pnand %p1307_p0, %p193_p1 }
   0x5   : > { %s1308_s28 = sshll.u32 (!%p194_p2), %s1615_s19, 6  ;;  %p239_p4 = scmp.lt.s32.totalorder (!%p194_p2), %s1615_s19, 15 }
   0x6   : > { %197 = sbr.rel (%p194_p2) target bundleno = 404 (0x194), region = 32  ;;  %p228_p3 = scmp.lt.s32.totalorder (!%p194_p2), %s1308_s28, 1023 }
   0xb   : > { %v1466_v0 = vld [vmem:[%s2395_s1 + $0x30] sm:$0xf]  ;;  %v1540_v1 = vld [vmem:[%s2395_s1 + $0x30] sm:$0x30]  ;;  %vm626_vm0 = vcmask 1045504   ;;  %v1539_v4 = vld [vmem:[%s2395_s1 + $0x28] sm:$0xff] }
   0xc   : > { %v1467_v2 = vor.u32 %v1540_v1, %v1466_v0  ;;  %v1538_v5 = vld [vmem:[%s2395_s1 + $0x20] sm:$0xff]  ;;  %v1537_v6 = vld [vmem:[%s2395_s1 + $0x18] sm:$0xff]  ;;  %v1536_v7 = vld [vmem:[%s2395_s1 + $0x10] sm:$0xff]  ;;  %s2401_s28 = smov (!%p228_p3, %s1308_s28), 1023  ;;  %vm529_vm1 = vcmask 883712   ;;  %vm799_vm2 = vcmask 64512  }
   0xd   : > { %v1535_v8 = vld [vmem:[%s2395_s1 + $0x8] sm:$0xff]  ;;  %s1309_s10 = sshll.u32 %s2401_s28, 2  ;;  %v1534_v9 = vld [vmem:[%s2395_s1] sm:$0xff]  ;;  %s1311_s16 = sshll.u32 %s2401_s28, 3  ;;  %vm997_vm3 = vcmask 57344  }
   0xe   : > { %v628_v3 = vsel %vm626_vm0, %v1467_v2, 0  ;;  %s1650_s15 = scalar_lea.vmem %s2394_s0, %s1309_s10  ;;  %v1712_v38 = vld [vmem:[%s2396_s2] ss:$0 sm:$0xff]  ;;  %s1717_s23 = scalar_lea.vmem %s2397_s3, %s1311_s16 }
   0xf   : > { %631 = vmatpush.bf16.msra.mxu0 %v628_v3  ;;  %1541 = vmatpush.bf16.msra.mxu1 %v628_v3  ;;  %v1502_v10 = vld [vmem:[%s1650_s15] sm:$0xff]  ;;  %v1503_v12 = vld [vmem:[%s1650_s15 + $0x8] sm:$0xff]  ;;  %v1504_v15 = vld [vmem:[%s1650_s15 + $0x10] sm:$0xff]  ;;  %s2403_s19 = smov (!%p239_p4, %s1615_s19), 15 }
  0x10   : > { %1542 = vmatpush.bf16.msra.mxu2 %v628_v3  ;;  %1543 = vmatpush.bf16.msra.mxu3 %v628_v3  ;;  %v1510_v11 = vld [vmem:[%s1650_s15 + $0x40] sm:$0xff]  ;;  %v1511_v13 = vld [vmem:[%s1650_s15 + $0x48] sm:$0xff]  ;;  %v1512_v16 = vld [vmem:[%s1650_s15 + $0x50] sm:$0xff]  ;;  %s241_s26 = scalar_lea.vmem %s2398_s4, %s2403_s19  ;;  %s244_s29 = scalar_lea.vmem %s2399_s5, %s2403_s19 }
  0x11   : > { %v1518_v14 = vld [vmem:[%s1650_s15 + $0x80] sm:$0xff]  ;;  %v1519_v17 = vld [vmem:[%s1650_s15 + $0x88] sm:$0xff]  ;;  %v1505_v18 = vld [vmem:[%s1650_s15 + $0x18] sm:$0xff] }
  0x12   : > { %v1513_v19 = vld [vmem:[%s1650_s15 + $0x58] sm:$0xff]  ;;  %v1520_v20 = vld [vmem:[%s1650_s15 + $0x90] sm:$0xff]  ;;  %v1526_v21 = vld [vmem:[%s1650_s15 + $0xc0] sm:$0xff] }
  0x13   : > { %632 = vmatpush.bf16.msra.mxu0 %v1539_v4  ;;  %1544 = vmatpush.bf16.msra.mxu1 %v1539_v4  ;;  %v1506_v22 = vld [vmem:[%s1650_s15 + $0x20] sm:$0xff]  ;;  %v1521_v24 = vld [vmem:[%s1650_s15 + $0x98] sm:$0xff]  ;;  %v1527_v25 = vld [vmem:[%s1650_s15 + $0xc8] sm:$0xff] }
  0x14   : > { %1545 = vmatpush.bf16.msra.mxu2 %v1539_v4  ;;  %1546 = vmatpush.bf16.msra.mxu3 %v1539_v4  ;;  %v1514_v23 = vld [vmem:[%s1650_s15 + $0x60] sm:$0xff]  ;;  %v1507_v26 = vld [vmem:[%s1650_s15 + $0x28] sm:$0xff]  ;;  %v1528_v29 = vld [vmem:[%s1650_s15 + $0xd0] sm:$0xff] }
  0x15   : > { %v1515_v27 = vld [vmem:[%s1650_s15 + $0x68] sm:$0xff]  ;;  %v1522_v28 = vld [vmem:[%s1650_s15 + $0xa0] sm:$0xff]  ;;  %v1508_v30 = vld [vmem:[%s1650_s15 + $0x30] sm:$0xff] }
  0x16   : > { %v1516_v31 = vld [vmem:[%s1650_s15 + $0x70] sm:$0xff]  ;;  %v1523_v32 = vld [vmem:[%s1650_s15 + $0xa8] sm:$0xff]  ;;  %v1529_v33 = vld [vmem:[%s1650_s15 + $0xd8] sm:$0xff] }
  0x17   : > { %633 = vmatpush.bf16.msra.mxu0 %v1538_v5  ;;  %1547 = vmatpush.bf16.msra.mxu1 %v1538_v5  ;;  %v1509_v34 = vld [vmem:[%s1650_s15 + $0x38] sm:$0xff]  ;;  %v1524_v36 = vld [vmem:[%s1650_s15 + $0xb0] sm:$0xff]  ;;  %v1530_v37 = vld [vmem:[%s1650_s15 + $0xe0] sm:$0xff] }
  0x18   : > { %1548 = vmatpush.bf16.msra.mxu2 %v1538_v5  ;;  %1549 = vmatpush.bf16.msra.mxu3 %v1538_v5  ;;  %v1517_v35 = vld [vmem:[%s1650_s15 + $0x78] sm:$0xff]  ;;  %v1531_v44 = vld [vmem:[%s1650_s15 + $0xe8] sm:$0xff]  ;;  %v1532_v63 = vld [vmem:[%s1650_s15 + $0xf0] sm:$0xff] }
  0x19   : > { %v1525_v43 = vld [vmem:[%s1650_s15 + $0xb8] sm:$0xff] }
  0x1b   : > { %634 = vmatpush.bf16.msra.mxu0 %v1537_v6  ;;  %1550 = vmatpush.bf16.msra.mxu1 %v1537_v6 }
  0x1c   : > { %1551 = vmatpush.bf16.msra.mxu2 %v1537_v6  ;;  %1552 = vmatpush.bf16.msra.mxu3 %v1537_v6 }
  0x1f   : > { %635 = vmatpush.bf16.msra.mxu0 %v1536_v7  ;;  %1553 = vmatpush.bf16.msra.mxu1 %v1536_v7 }
  0x20   : > { %1554 = vmatpush.bf16.msra.mxu2 %v1536_v7  ;;  %1555 = vmatpush.bf16.msra.mxu3 %v1536_v7 }
  0x23   : > { %636 = vmatpush.bf16.msra.mxu0 %v1535_v8  ;;  %1556 = vmatpush.bf16.msra.mxu1 %v1535_v8 }
  0x24   : > { %1557 = vmatpush.bf16.msra.mxu2 %v1535_v8  ;;  %1558 = vmatpush.bf16.msra.mxu3 %v1535_v8 }
  0x27   : > { %637 = vmatpush.bf16.msra.mxu0 %v1534_v9  ;;  %1559 = vmatpush.bf16.msra.mxu1 %v1534_v9 }
  0x28   : > { %1560 = vmatpush.bf16.msra.mxu2 %v1534_v9  ;;  %1561 = vmatpush.bf16.msra.mxu3 %v1534_v9 }
  0x2a   : > { %1468 = vmatmul.msk.bf16.vlgmr.msra.gmra.mxu0 %vm529_vm1, %v1502_v10  ;;  %1476 = vmatmul.msk.bf16.vlgmr.msra.gmra.mxu1 %vm529_vm1, %v1510_v11 }
  0x2b   : > { %1484 = vmatmul.msk.bf16.vlgmr.msra.gmra.mxu2 %vm529_vm1, %v1518_v14  ;;  %1492 = vmatmul.msk.bf16.vlgmr.msra.gmra.mxu3 %vm529_vm1, %v1526_v21 }
  0x3a   : > { %1469 = vmatmul.msk.bf16.gmra.mxu0 %vm529_vm1, %v1503_v12  ;;  %1477 = vmatmul.msk.bf16.gmra.mxu1 %vm529_vm1, %v1511_v13 }
  0x3b   : > { %1485 = vmatmul.msk.bf16.gmra.mxu2 %vm529_vm1, %v1519_v17  ;;  %1493 = vmatmul.msk.bf16.gmra.mxu3 %vm529_vm1, %v1527_v25 }
  0x4a   : > { %1470 = vmatmul.msk.bf16.gmra.mxu0 %vm529_vm1, %v1504_v15  ;;  %1478 = vmatmul.msk.bf16.gmra.mxu1 %vm529_vm1, %v1512_v16 }
  0x4b   : > { %1486 = vmatmul.msk.bf16.gmra.mxu2 %vm529_vm1, %v1520_v20  ;;  %1494 = vmatmul.msk.bf16.gmra.mxu3 %vm529_vm1, %v1528_v29 }
  0x5a   : > { %1471 = vmatmul.msk.bf16.gmra.mxu0 %vm529_vm1, %v1505_v18  ;;  %1479 = vmatmul.msk.bf16.gmra.mxu1 %vm529_vm1, %v1513_v19 }
  0x5b   : > { %1487 = vmatmul.msk.bf16.gmra.mxu2 %vm529_vm1, %v1521_v24  ;;  %1495 = vmatmul.msk.bf16.gmra.mxu3 %vm529_vm1, %v1529_v33 }
  0x6a   : > { %1472 = vmatmul.msk.bf16.gmra.mxu0 %vm529_vm1, %v1506_v22  ;;  %1480 = vmatmul.msk.bf16.gmra.mxu1 %vm529_vm1, %v1514_v23  ;;  %v1533_v22 = vld [vmem:[%s1650_s15 + $0xf8] sm:$0xff] }
  0x6b   : > { %1488 = vmatmul.msk.bf16.gmra.mxu2 %vm529_vm1, %v1522_v28  ;;  %1496 = vmatmul.msk.bf16.gmra.mxu3 %vm529_vm1, %v1530_v37 }
  0x7a   : > { %1473 = vmatmul.msk.bf16.gmra.mxu0 %vm529_vm1, %v1507_v26  ;;  %1481 = vmatmul.msk.bf16.gmra.mxu1 %vm529_vm1, %v1515_v27 }
  0x7b   : > { %1489 = vmatmul.msk.bf16.gmra.mxu2 %vm529_vm1, %v1523_v32  ;;  %1497 = vmatmul.msk.bf16.gmra.mxu3 %vm529_vm1, %v1531_v44 }
  0x8a   : > { %1474 = vmatmul.msk.bf16.gmra.mxu0 %vm529_vm1, %v1508_v30  ;;  %1482 = vmatmul.msk.bf16.gmra.mxu1 %vm529_vm1, %v1516_v31 }
  0x8b   : > { %1490 = vmatmul.msk.bf16.gmra.mxu2 %vm529_vm1, %v1524_v36  ;;  %1498 = vmatmul.msk.bf16.gmra.mxu3 %vm529_vm1, %v1532_v63 }
  0x9a   : > { %1475 = vmatmul.msk.bf16.gmra.mxu0 %vm529_vm1, %v1509_v34  ;;  %1483 = vmatmul.msk.bf16.gmra.mxu1 %vm529_vm1, %v1517_v35 }
  0x9b   : > { %1491 = vmatmul.msk.bf16.gmra.mxu2 %vm529_vm1, %v1525_v43  ;;  %1499 = vmatmul.msk.bf16.gmra.mxu3 %vm529_vm1, %v1533_v22 }
  0xa7   : > { %v639_v39 = vpop.f32.mrf.mxu0  ;;  %v679_v40 = vpop.f32.mrf.mxu1 }
  0xa8   : > { %v640_v41 = vadd.f32 %v1712_v38, %v639_v39  ;;  %v1721_v42 = vadd.f32 %v1712_v38, %v679_v40 }
  0xaa   : > { %800 = vst.msk [vmem:[%s1717_s23] sm:$0xff] %vm799_vm2, %v640_v41  ;;  %v999_v47 = vmul.f32 %v640_v41, %v640_v41  ;;  %v864_v50 = vsel %vm799_vm2, %v640_v41, 0.0 }
  0xab   : > { %816 = vst.msk [vmem:[%s1717_s23 + $0x80] sm:$0xff] %vm799_vm2, %v1721_v42 }
  0xac   : > { %v1063_v54 = vsel %vm799_vm2, %v999_v47, 0.0 }
  0xae   : > { %v719_v7 = vpop.f32.mrf.mxu2 }
  0xaf   : > { %v641_v45 = vpop.f32.mrf.mxu0  ;;  %v681_v46 = vpop.f32.mrf.mxu1  ;;  %v1770_v13 = vadd.f32 %v1712_v38, %v719_v7 }
  0xb0   : > { %v642_v48 = vadd.f32 %v1712_v38, %v641_v45  ;;  %v1734_v49 = vadd.f32 %v1712_v38, %v681_v46  ;;  %v759_v45 = vpop.f32.mrf.mxu3 }
  0xb1   : > { %832 = vst.msk [vmem:[%s1717_s23 + $0x100] sm:$0xff] %vm799_vm2, %v1770_v13  ;;  %v1850_v47 = vadd.f32 %v1712_v38, %v759_v45 }
  0xb2   : > { %801 = vst.msk [vmem:[%s1717_s23 + $0x8] sm:$0xff] %vm799_vm2, %v642_v48  ;;  %v865_v51 = vsel %vm799_vm2, %v642_v48, 0.0  ;;  %v1000_v52 = vmul.f32 %v642_v48, %v642_v48 }
  0xb3   : > { %v866_v53 = vadd.f32 %v865_v51, %v864_v50  ;;  %817 = vst.msk [vmem:[%s1717_s23 + $0x88] sm:$0xff] %vm799_vm2, %v1734_v49 }
  0xb4   : > { %v1064_v55 = vsel %vm799_vm2, %v1000_v52, 0.0  ;;  %848 = vst.msk [vmem:[%s1717_s23 + $0x180] sm:$0xff] %vm799_vm2, %v1850_v47 }
  0xb5   : > { %v1065_v56 = vadd.f32 %v1064_v55, %v1063_v54 }
  0xb6   : > { %v721_v18 = vpop.f32.mrf.mxu2 }
  0xb7   : > { %v644_v57 = vpop.f32.mrf.mxu0  ;;  %v684_v58 = vpop.f32.mrf.mxu1  ;;  %v1780_v19 = vadd.f32 %v1712_v38, %v721_v18 }
  0xb8   : > { %v645_v59 = vadd.f32 %v1712_v38, %v644_v57  ;;  %v1747_v60 = vadd.f32 %v1712_v38, %v684_v58  ;;  %v761_v54 = vpop.f32.mrf.mxu3 }
  0xb9   : > { %833 = vst.msk [vmem:[%s1717_s23 + $0x108] sm:$0xff] %vm799_vm2, %v1780_v19 }
  0xba   : > { %802 = vst.msk [vmem:[%s1717_s23 + $0x10] sm:$0xff] %vm799_vm2, %v645_v59  ;;  %v867_v61 = vsel %vm799_vm2, %v645_v59, 0.0  ;;  %v1001_v62 = vmul.f32 %v645_v59, %v645_v59 }
  0xbb   : > { %v868_v0 = vadd.f32 %v867_v61, %v866_v53  ;;  %818 = vst.msk [vmem:[%s1717_s23 + $0x90] sm:$0xff] %vm799_vm2, %v1747_v60 }
  0xbc   : > { %v1066_v1 = vsel %vm799_vm2, %v1001_v62, 0.0 }
  0xbd   : > { %v1067_v2 = vadd.f32 %v1066_v1, %v1065_v56  ;;  %v1868_v56 = vadd.f32 %v1712_v38, %v761_v54 }
  0xbe   : > { %v724_v30 = vpop.f32.mrf.mxu2 }
  0xbf   : > { %v646_v3 = vpop.f32.mrf.mxu0  ;;  %v686_v4 = vpop.f32.mrf.mxu1  ;;  %v1811_v31 = vadd.f32 %v1712_v38, %v724_v30  ;;  %849 = vst.msk [vmem:[%s1717_s23 + $0x188] sm:$0xff] %vm799_vm2, %v1868_v56 }
  0xc0   : > { %v647_v5 = vadd.f32 %v1712_v38, %v646_v3  ;;  %v1760_v6 = vadd.f32 %v1712_v38, %v686_v4  ;;  %v764_v63 = vpop.f32.mrf.mxu3 }
  0xc1   : > { %834 = vst.msk [vmem:[%s1717_s23 + $0x110] sm:$0xff] %vm799_vm2, %v1811_v31  ;;  %v1898_v1 = vadd.f32 %v1712_v38, %v764_v63 }
  0xc2   : > { %803 = vst.msk [vmem:[%s1717_s23 + $0x18] sm:$0xff] %vm799_vm2, %v647_v5  ;;  %v869_v8 = vsel %vm799_vm2, %v647_v5, 0.0  ;;  %v1002_v9 = vmul.f32 %v647_v5, %v647_v5 }
  0xc3   : > { %v870_v10 = vadd.f32 %v869_v8, %v868_v0  ;;  %819 = vst.msk [vmem:[%s1717_s23 + $0x98] sm:$0xff] %vm799_vm2, %v1760_v6 }
  0xc4   : > { %v1068_v11 = vsel %vm799_vm2, %v1002_v9, 0.0  ;;  %850 = vst.msk [vmem:[%s1717_s23 + $0x190] sm:$0xff] %vm799_vm2, %v1898_v1 }
  0xc5   : > { %v1069_v12 = vadd.f32 %v1068_v11, %v1067_v2 }
  0xc6   : > { %v726_v36 = vpop.f32.mrf.mxu2 }
  0xc7   : > { %v649_v14 = vpop.f32.mrf.mxu0  ;;  %v689_v15 = vpop.f32.mrf.mxu1  ;;  %v1823_v37 = vadd.f32 %v1712_v38, %v726_v36 }
  0xc8   : > { %v650_v16 = vadd.f32 %v1712_v38, %v649_v14  ;;  %v1777_v17 = vadd.f32 %v1712_v38, %v689_v15  ;;  %v766_v8 = vpop.f32.mrf.mxu3 }
  0xc9   : > { %835 = vst.msk [vmem:[%s1717_s23 + $0x118] sm:$0xff] %vm799_vm2, %v1823_v37 }
  0xca   : > { %804 = vst.msk [vmem:[%s1717_s23 + $0x20] sm:$0xff] %vm799_vm2, %v650_v16  ;;  %v871_v20 = vsel %vm799_vm2, %v650_v16, 0.0  ;;  %v1003_v21 = vmul.f32 %v650_v16, %v650_v16 }
  0xcb   : > { %v1786_v23 = vadd.f32 %v871_v20, %v870_v10  ;;  %820 = vst.msk [vmem:[%s1717_s23 + $0xa0] sm:$0xff] %vm799_vm2, %v1777_v17  ;;  %v1916_v10 = vadd.f32 %v1712_v38, %v766_v8 }
  0xcc   : > { %v1070_v24 = vsel %vm799_vm2, %v1003_v21, 0.0 }
  0xcd   : > { %v1796_v25 = vadd.f32 %v1070_v24, %v1069_v12  ;;  %851 = vst.msk [vmem:[%s1717_s23 + $0x198] sm:$0xff] %vm799_vm2, %v1916_v10 }
  0xce   : > { %v729_v44 = vpop.f32.mrf.mxu2 }
  0xcf   : > { %v651_v26 = vpop.f32.mrf.mxu0  ;;  %v691_v27 = vpop.f32.mrf.mxu1  ;;  %v1847_v46 = vadd.f32 %v1712_v38, %v729_v44 }
  0xd0   : > { %v1799_v28 = vadd.f32 %v1712_v38, %v651_v26  ;;  %v1802_v29 = vadd.f32 %v1712_v38, %v691_v27  ;;  %v769_v18 = vpop.f32.mrf.mxu3 }
  0xd1   : > { %836 = vst.msk [vmem:[%s1717_s23 + $0x120] sm:$0xff] %vm799_vm2, %v1847_v46 }
  0xd2   : > { %805 = vst.msk [vmem:[%s1717_s23 + $0x28] sm:$0xff] %vm799_vm2, %v1799_v28  ;;  %v873_v44 = vsel %vm799_vm2, %v1799_v28, 0.0 }
  0xd3   : > { %821 = vst.msk [vmem:[%s1717_s23 + $0xa8] sm:$0xff] %vm799_vm2, %v1802_v29 }
  0xd6   : > { %v731_v53 = vpop.f32.mrf.mxu2 }
  0xd7   : > { %v654_v32 = vpop.f32.mrf.mxu0  ;;  %v694_v33 = vpop.f32.mrf.mxu1  ;;  %v1865_v55 = vadd.f32 %v1712_v38, %v731_v53  ;;  %v874_v53 = vadd.f32 %v873_v44, %v1786_v23 }
  0xd8   : > { %v1817_v34 = vadd.f32 %v1712_v38, %v654_v32  ;;  %v1820_v35 = vadd.f32 %v1712_v38, %v694_v33  ;;  %v771_v30 = vpop.f32.mrf.mxu3  ;;  %v1949_v32 = vadd.f32 %v1712_v38, %v769_v18  ;;  %v1004_v33 = vmul.f32 %v1799_v28, %v1799_v28 }
  0xd9   : > { %837 = vst.msk [vmem:[%s1717_s23 + $0x128] sm:$0xff] %vm799_vm2, %v1865_v55 }
  0xda   : > { %806 = vst.msk [vmem:[%s1717_s23 + $0x30] sm:$0xff] %vm799_vm2, %v1817_v34  ;;  %v1072_v45 = vsel %vm799_vm2, %v1004_v33, 0.0 }
  0xdb   : > { %822 = vst.msk [vmem:[%s1717_s23 + $0xb0] sm:$0xff] %vm799_vm2, %v1820_v35 }
  0xdc   : > { %852 = vst.msk [vmem:[%s1717_s23 + $0x1a0] sm:$0xff] %vm799_vm2, %v1949_v32 }
  0xde   : > { %v734_v62 = vpop.f32.mrf.mxu2 }
  0xdf   : > { %v656_v39 = vpop.f32.mrf.mxu0  ;;  %v696_v40 = vpop.f32.mrf.mxu1  ;;  %v1895_v0 = vadd.f32 %v1712_v38, %v734_v62 }
  0xe0   : > { %v1835_v41 = vadd.f32 %v1712_v38, %v656_v39  ;;  %v1838_v43 = vadd.f32 %v1712_v38, %v696_v40  ;;  %v1005_v39 = vmul.f32 %v1817_v34, %v1817_v34  ;;  %v1965_v40 = vadd.f32 %v1712_v38, %v771_v30 }
  0xe1   : > { %838 = vst.msk [vmem:[%s1717_s23 + $0x130] sm:$0xff] %vm799_vm2, %v1895_v0 }
  0xe2   : > { %807 = vst.msk [vmem:[%s1717_s23 + $0x38] sm:$0xff] %vm799_vm2, %v1835_v41  ;;  %v1074_v28 = vsel %vm799_vm2, %v1005_v39, 0.0 }
  0xe3   : > { %823 = vst.msk [vmem:[%s1717_s23 + $0xb8] sm:$0xff] %vm799_vm2, %v1838_v43 }
  0xe4   : > { %853 = vst.msk [vmem:[%s1717_s23 + $0x1a8] sm:$0xff] %vm799_vm2, %v1965_v40 }
  0xe6   : > { %v736_v7 = vpop.f32.mrf.mxu2 }
  0xe7   : > { %v659_v48 = vpop.f32.mrf.mxu0  ;;  %v699_v50 = vpop.f32.mrf.mxu1  ;;  %v1913_v9 = vadd.f32 %v1712_v38, %v736_v7 }
  0xe8   : > { %v1856_v51 = vadd.f32 %v1712_v38, %v659_v48  ;;  %v1859_v52 = vadd.f32 %v1712_v38, %v699_v50  ;;  %v875_v48 = vsel %vm799_vm2, %v1817_v34, 0.0  ;;  %v1006_v50 = vmul.f32 %v1835_v41, %v1835_v41 }
  0xe9   : > { %839 = vst.msk [vmem:[%s1717_s23 + $0x138] sm:$0xff] %vm799_vm2, %v1913_v9  ;;  %v877_v34 = vsel %vm799_vm2, %v1835_v41, 0.0  ;;  %v876_v7 = vadd.f32 %v875_v48, %v874_v53 }
  0xea   : > { %808 = vst.msk [vmem:[%s1717_s23 + $0x40] sm:$0xff] %vm799_vm2, %v1856_v51  ;;  %v1076_v8 = vsel %vm799_vm2, %v1006_v50, 0.0 }
  0xeb   : > { %824 = vst.msk [vmem:[%s1717_s23 + $0xc0] sm:$0xff] %vm799_vm2, %v1859_v52 }
  0xee   : > { %v739_v16 = vpop.f32.mrf.mxu2 }
  0xef   : > { %v661_v57 = vpop.f32.mrf.mxu0  ;;  %v701_v58 = vpop.f32.mrf.mxu1  ;;  %v1946_v26 = vadd.f32 %v1712_v38, %v739_v16  ;;  %v878_v16 = vadd.f32 %v877_v34, %v876_v7 }
  0xf0   : > { %v1883_v59 = vadd.f32 %v1712_v38, %v661_v57  ;;  %v1886_v61 = vadd.f32 %v1712_v38, %v701_v58  ;;  %v1007_v58 = vmul.f32 %v1856_v51, %v1856_v51 }
  0xf1   : > { %840 = vst.msk [vmem:[%s1717_s23 + $0x140] sm:$0xff] %vm799_vm2, %v1946_v26 }
  0xf2   : > { %809 = vst.msk [vmem:[%s1717_s23 + $0x48] sm:$0xff] %vm799_vm2, %v1883_v59  ;;  %v1008_v41 = vmul.f32 %v1883_v59, %v1883_v59 }
  0xf3   : > { %825 = vst.msk [vmem:[%s1717_s23 + $0xc8] sm:$0xff] %vm799_vm2, %v1886_v61 }
  0xf6   : > { %v741_v27 = vpop.f32.mrf.mxu2 }
  0xf7   : > { %v664_v2 = vpop.f32.mrf.mxu0  ;;  %v704_v3 = vpop.f32.mrf.mxu1  ;;  %v1957_v36 = vadd.f32 %v1712_v38, %v741_v27  ;;  %v1080_v27 = vsel %vm799_vm2, %v1008_v41, 0.0 }
  0xf8   : > { %v1904_v4 = vadd.f32 %v1712_v38, %v664_v2  ;;  %v1907_v5 = vadd.f32 %v1712_v38, %v704_v3  ;;  %v774_v2 = vpop.f32.mrf.mxu3  ;;  %v1073_v3 = vadd.f32 %v1072_v45, %v1796_v25  ;;  %v1078_v25 = vsel %vm799_vm2, %v1007_v58, 0.0 }
  0xf9   : > { %841 = vst.msk [vmem:[%s1717_s23 + $0x148] sm:$0xff] %vm799_vm2, %v1957_v36 }
  0xfa   : > { %810 = vst.msk [vmem:[%s1717_s23 + $0x50] sm:$0xff] %vm799_vm2, %v1904_v4  ;;  %v1009_v18 = vmul.f32 %v1904_v4, %v1904_v4  ;;  %v883_v30 = vsel %vm799_vm2, %v1904_v4, 0.0 }
  0xfb   : > { %826 = vst.msk [vmem:[%s1717_s23 + $0xd0] sm:$0xff] %vm799_vm2, %v1907_v5 }
  0xfc   : > { %v1082_v45 = vsel %vm799_vm2, %v1009_v18, 0.0 }
  0xfe   : > { %v744_v23 = vpop.f32.mrf.mxu2 }
  0xff   : > { %v666_v11 = vpop.f32.mrf.mxu0  ;;  %v706_v12 = vpop.f32.mrf.mxu1  ;;  %v2024_v4 = vadd.f32 %v1712_v38, %v744_v23 }
 0x100   : > { %v667_v14 = vadd.f32 %v1712_v38, %v666_v11  ;;  %v1932_v15 = vadd.f32 %v1712_v38, %v706_v12  ;;  %v879_v11 = vsel %vm799_vm2, %v1856_v51, 0.0  ;;  %v1075_v12 = vadd.f32 %v1074_v28, %v1073_v3  ;;  %v776_v34 = vpop.f32.mrf.mxu3 }
 0x101   : > { %v880_v51 = vadd.f32 %v879_v11, %v878_v16  ;;  %842 = vst.msk [vmem:[%s1717_s23 + $0x150] sm:$0xff] %vm799_vm2, %v2024_v4 }
 0x102   : > { %811 = vst.msk [vmem:[%s1717_s23 + $0x58] sm:$0xff] %vm799_vm2, %v667_v14  ;;  %v1010_v33 = vmul.f32 %v667_v14, %v667_v14  ;;  %v885_v48 = vsel %vm799_vm2, %v667_v14, 0.0  ;;  %v2027_v14 = vadd.f32 %v1712_v38, %v774_v2  ;;  %v2041_v2 = vadd.f32 %v1712_v38, %v776_v34 }
 0x103   : > { %827 = vst.msk [vmem:[%s1717_s23 + $0xd8] sm:$0xff] %vm799_vm2, %v1932_v15 }
 0x104   : > { %v1084_v7 = vsel %vm799_vm2, %v1010_v33, 0.0  ;;  %854 = vst.msk [vmem:[%s1717_s23 + $0x1b0] sm:$0xff] %vm799_vm2, %v2027_v14 }
 0x105   : > { %855 = vst.msk [vmem:[%s1717_s23 + $0x1b8] sm:$0xff] %vm799_vm2, %v2041_v2 }
 0x107   : > { %v669_v20 = vpop.f32.mrf.mxu0  ;;  %v709_v21 = vpop.f32.mrf.mxu1 }
 0x108   : > { %v1940_v22 = vadd.f32 %v1712_v38, %v669_v20  ;;  %v1943_v24 = vadd.f32 %v1712_v38, %v709_v21  ;;  %v881_v20 = vsel %vm799_vm2, %v1883_v59, 0.0  ;;  %v1077_v21 = vadd.f32 %v1076_v8, %v1075_v12 }
 0x109   : > { %v882_v44 = vadd.f32 %v881_v20, %v880_v51 }
 0x10a   : > { %812 = vst.msk [vmem:[%s1717_s23 + $0x60] sm:$0xff] %vm799_vm2, %v1940_v22  ;;  %v1079_v39 = vadd.f32 %v1078_v25, %v1077_v21  ;;  %v1011_v59 = vmul.f32 %v1940_v22, %v1940_v22  ;;  %v887_v8 = vsel %vm799_vm2, %v1940_v22, 0.0 }
 0x10b   : > { %828 = vst.msk [vmem:[%s1717_s23 + $0xe0] sm:$0xff] %vm799_vm2, %v1943_v24  ;;  %v884_v3 = vadd.f32 %v883_v30, %v882_v44 }
 0x10c   : > { %v1081_v58 = vadd.f32 %v1080_v27, %v1079_v39  ;;  %v1086_v16 = vsel %vm799_vm2, %v1011_v59, 0.0 }
 0x10d   : > { %v886_v12 = vadd.f32 %v885_v48, %v884_v3 }
 0x10e   : > { %v1083_v41 = vadd.f32 %v1082_v45, %v1081_v58  ;;  %v1016_v58 = vmul.f32 %v1734_v49, %v1734_v49 }
 0x10f   : > { %v671_v54 = vpop.f32.mrf.mxu0  ;;  %v711_v57 = vpop.f32.mrf.mxu1  ;;  %v888_v20 = vadd.f32 %v887_v8, %v886_v12  ;;  %v895_v8 = vsel %vm799_vm2, %v1721_v42, 0.0 }
 0x110   : > { %v672_v62 = vadd.f32 %v1712_v38, %v671_v54  ;;  %v1994_v63 = vadd.f32 %v1712_v38, %v711_v57  ;;  %v746_v57 = vpop.f32.mrf.mxu2  ;;  %v1085_v25 = vadd.f32 %v1084_v7, %v1083_v41 }
 0x111   : > { %v2035_v23 = vadd.f32 %v1712_v38, %v746_v57 }
 0x112   : > { %813 = vst.msk [vmem:[%s1717_s23 + $0x68] sm:$0xff] %vm799_vm2, %v672_v62  ;;  %v1012_v11 = vmul.f32 %v672_v62, %v672_v62  ;;  %v889_v22 = vsel %vm799_vm2, %v672_v62, 0.0  ;;  %v1087_v27 = vadd.f32 %v1086_v16, %v1085_v25  ;;  %v1096_v25 = vsel %vm799_vm2, %v1016_v58, 0.0 }
 0x113   : > { %829 = vst.msk [vmem:[%s1717_s23 + $0xe8] sm:$0xff] %vm799_vm2, %v1994_v63  ;;  %v890_v30 = vadd.f32 %v889_v22, %v888_v20  ;;  %v897_v22 = vsel %vm799_vm2, %v1734_v49, 0.0  ;;  %v1020_v58 = vmul.f32 %v1802_v29, %v1802_v29 }
 0x114   : > { %v1088_v21 = vsel %vm799_vm2, %v1012_v11, 0.0  ;;  %843 = vst.msk [vmem:[%s1717_s23 + $0x158] sm:$0xff] %vm799_vm2, %v2035_v23 }
 0x117   : > { %v674_v50 = vpop.f32.mrf.mxu0  ;;  %v714_v53 = vpop.f32.mrf.mxu1 }
 0x118   : > { %v675_v28 = vadd.f32 %v1712_v38, %v674_v50  ;;  %v2021_v54 = vadd.f32 %v1712_v38, %v714_v53  ;;  %v749_v48 = vpop.f32.mrf.mxu2  ;;  %v779_v50 = vpop.f32.mrf.mxu3  ;;  %v1089_v53 = vadd.f32 %v1088_v21, %v1087_v27 }
 0x119   : > { %v2088_v27 = vadd.f32 %v1712_v38, %v749_v48  ;;  %v2091_v49 = vadd.f32 %v1712_v38, %v779_v50  ;;  %v901_v48 = vsel %vm799_vm2, %v1760_v6, 0.0  ;;  %v1019_v50 = vmul.f32 %v1777_v17, %v1777_v17 }
 0x11a   : > { %814 = vst.msk [vmem:[%s1717_s23 + $0x70] sm:$0xff] %vm799_vm2, %v675_v28  ;;  %v1013_v18 = vmul.f32 %v675_v28, %v675_v28  ;;  %v891_v51 = vsel %vm799_vm2, %v675_v28, 0.0  ;;  %v1015_v28 = vmul.f32 %v1721_v42, %v1721_v42  ;;  %v899_v42 = vsel %vm799_vm2, %v1747_v60, 0.0 }
 0x11b   : > { %830 = vst.msk [vmem:[%s1717_s23 + $0xf0] sm:$0xff] %vm799_vm2, %v2021_v54  ;;  %v892_v59 = vadd.f32 %v891_v51, %v890_v30  ;;  %v1018_v51 = vmul.f32 %v1760_v6, %v1760_v6 }
 0x11c   : > { %v1090_v39 = vsel %vm799_vm2, %v1013_v18, 0.0  ;;  %v1094_v16 = vsel %vm799_vm2, %v1015_v28, 0.0  ;;  %v1017_v18 = vmul.f32 %v1747_v60, %v1747_v60  ;;  %844 = vst.msk [vmem:[%s1717_s23 + $0x160] sm:$0xff] %vm799_vm2, %v2088_v27 }
 0x11d   : > { %v1091_v3 = vadd.f32 %v1090_v39, %v1089_v53  ;;  %856 = vst.msk [vmem:[%s1717_s23 + $0x1c0] sm:$0xff] %vm799_vm2, %v2091_v49 }
 0x11e   : > { %v1098_v53 = vsel %vm799_vm2, %v1017_v18, 0.0 }
 0x11f   : > { %v676_v62 = vpop.f32.mrf.mxu0  ;;  %v716_v33 = vpop.f32.mrf.mxu1 }
 0x120   : > { %v677_v44 = vadd.f32 %v1712_v38, %v676_v62  ;;  %v2062_v45 = vadd.f32 %v1712_v38, %v716_v33  ;;  %v751_v30 = vpop.f32.mrf.mxu2  ;;  %v781_v62 = vpop.f32.mrf.mxu3 }
 0x121   : > { %v2097_v60 = vadd.f32 %v1712_v38, %v781_v62 }
 0x122   : > { %815 = vst.msk [vmem:[%s1717_s23 + $0x78] sm:$0xff] %vm799_vm2, %v677_v44  ;;  %v893_v57 = vsel %vm799_vm2, %v677_v44, 0.0  ;;  %v1014_v34 = vmul.f32 %v677_v44, %v677_v44  ;;  %v2094_v44 = vadd.f32 %v1712_v38, %v751_v30  ;;  %v1024_v30 = vmul.f32 %v1886_v61, %v1886_v61 }
 0x123   : > { %v894_v7 = vadd.f32 %v893_v57, %v892_v59  ;;  %831 = vst.msk [vmem:[%s1717_s23 + $0xf8] sm:$0xff] %vm799_vm2, %v2062_v45  ;;  %v1100_v57 = vsel %vm799_vm2, %v1018_v51, 0.0  ;;  %v1023_v51 = vmul.f32 %v1859_v52, %v1859_v52 }
 0x124   : > { %v1092_v11 = vsel %vm799_vm2, %v1014_v34, 0.0  ;;  %v903_v34 = vsel %vm799_vm2, %v1777_v17, 0.0  ;;  %845 = vst.msk [vmem:[%s1717_s23 + $0x168] sm:$0xff] %vm799_vm2, %v2094_v44 }
 0x125   : > { %v896_v41 = vadd.f32 %v895_v8, %v894_v7  ;;  %v1093_v12 = vadd.f32 %v1092_v11, %v1091_v3  ;;  %857 = vst.msk [vmem:[%s1717_s23 + $0x1c8] sm:$0xff] %vm799_vm2, %v2097_v60  ;;  %v1102_v7 = vsel %vm799_vm2, %v1019_v50, 0.0  ;;  %v905_v8 = vsel %vm799_vm2, %v1802_v29, 0.0 }
 0x126   : > { %v1021_v11 = vmul.f32 %v1820_v35, %v1820_v35  ;;  %v909_v29 = vsel %vm799_vm2, %v1838_v43, 0.0  ;;  %v1110_v50 = vsel %vm799_vm2, %v1023_v51, 0.0  ;;  %v921_v51 = vsel %vm799_vm2, %v1994_v63, 0.0 }
 0x127   : > { %v898_v20 = vadd.f32 %v897_v22, %v896_v41  ;;  %v1095_v21 = vadd.f32 %v1094_v16, %v1093_v12  ;;  %v1104_v12 = vsel %vm799_vm2, %v1020_v58, 0.0  ;;  %v907_v16 = vsel %vm799_vm2, %v1820_v35, 0.0 }
 0x128   : > { %v1022_v22 = vmul.f32 %v1838_v43, %v1838_v43  ;;  %v754_v18 = vpop.f32.mrf.mxu2  ;;  %v913_v43 = vsel %vm799_vm2, %v1886_v61, 0.0  ;;  %v915_v58 = vsel %vm799_vm2, %v1907_v5, 0.0 }
 0x129   : > { %v900_v33 = vadd.f32 %v899_v42, %v898_v20  ;;  %v1097_v39 = vadd.f32 %v1096_v25, %v1095_v21  ;;  %v784_v25 = vpop.f32.mrf.mxu3  ;;  %v1106_v42 = vsel %vm799_vm2, %v1021_v11, 0.0 }
 0x12a   : > { %v2155_v61 = vadd.f32 %v1712_v38, %v784_v25 }
 0x12b   : > { %v902_v59 = vadd.f32 %v901_v48, %v900_v33  ;;  %v1099_v28 = vadd.f32 %v1098_v53, %v1097_v39  ;;  %v1108_v33 = vsel %vm799_vm2, %v1022_v22, 0.0  ;;  %v911_v39 = vsel %vm799_vm2, %v1859_v52, 0.0 }
 0x12c   : > { %v1026_v52 = vmul.f32 %v1932_v15, %v1932_v15  ;;  %858 = vst.msk [vmem:[%s1717_s23 + $0x1d0] sm:$0xff] %vm799_vm2, %v2155_v61 }
 0x12d   : > { %v904_v6 = vadd.f32 %v903_v34, %v902_v59  ;;  %v1101_v3 = vadd.f32 %v1100_v57, %v1099_v28  ;;  %v1025_v59 = vmul.f32 %v1907_v5, %v1907_v5  ;;  %v1112_v28 = vsel %vm799_vm2, %v1024_v30, 0.0 }
 0x12e   : > { %v1116_v25 = vsel %vm799_vm2, %v1026_v52, 0.0  ;;  %v1029_v30 = vmul.f32 %v2021_v54, %v2021_v54 }
 0x12f   : > { %v906_v17 = vadd.f32 %v905_v8, %v904_v6  ;;  %v1103_v41 = vadd.f32 %v1102_v7, %v1101_v3  ;;  %v2152_v6 = vadd.f32 %v1712_v38, %v754_v18 }
 0x130   : > { %v756_v3 = vpop.f32.mrf.mxu2 }
 0x131   : > { %v1105_v20 = vadd.f32 %v1104_v12, %v1103_v41  ;;  %v908_v21 = vadd.f32 %v907_v16, %v906_v17  ;;  %v786_v7 = vpop.f32.mrf.mxu3  ;;  %v2158_v17 = vadd.f32 %v1712_v38, %v756_v3  ;;  %v1114_v41 = vsel %vm799_vm2, %v1025_v59, 0.0  ;;  %846 = vst.msk [vmem:[%s1717_s23 + $0x170] sm:$0xff] %vm799_vm2, %v2152_v6 }
 0x132   : > { %v2161_v5 = vadd.f32 %v1712_v38, %v786_v7  ;;  %v917_v12 = vsel %vm799_vm2, %v1932_v15, 0.0  ;;  %v1027_v16 = vmul.f32 %v1943_v24, %v1943_v24  ;;  %v925_v59 = vsel %vm799_vm2, %v2062_v45, 0.0 }
 0x133   : > { %v910_v62 = vadd.f32 %v909_v29, %v908_v21  ;;  %v1107_v35 = vadd.f32 %v1106_v42, %v1105_v20  ;;  %v919_v20 = vsel %vm799_vm2, %v1943_v24, 0.0  ;;  %v1028_v21 = vmul.f32 %v1994_v63, %v1994_v63  ;;  %847 = vst.msk [vmem:[%s1717_s23 + $0x178] sm:$0xff] %vm799_vm2, %v2158_v17 }
 0x134   : > { %859 = vst.msk [vmem:[%s1717_s23 + $0x1d8] sm:$0xff] %vm799_vm2, %v2161_v5  ;;  %v1118_v29 = vsel %vm799_vm2, %v1027_v16, 0.0  ;;  %v1122_v63 = vsel %vm799_vm2, %v1029_v30, 0.0  ;;  %v1034_v16 = vmul.f32 %v1823_v37, %v1823_v37  ;;  %v935_v30 = vsel %vm799_vm2, %v1847_v46, 0.0 }
 0x135   : > { %v912_v53 = vadd.f32 %v911_v39, %v910_v62  ;;  %v1109_v48 = vadd.f32 %v1108_v33, %v1107_v35  ;;  %v1120_v35 = vsel %vm799_vm2, %v1028_v21, 0.0  ;;  %v923_v33 = vsel %vm799_vm2, %v2021_v54, 0.0 }
 0x136   : > { %v1030_v39 = vmul.f32 %v2062_v45, %v2062_v45  ;;  %v1032_v54 = vmul.f32 %v1780_v19, %v1780_v19  ;;  %v1033_v45 = vmul.f32 %v1811_v31, %v1811_v31 }
 0x137   : > { %v914_v57 = vadd.f32 %v913_v43, %v912_v53  ;;  %v1111_v34 = vadd.f32 %v1110_v50, %v1109_v48  ;;  %v1031_v43 = vmul.f32 %v1770_v13, %v1770_v13 }
 0x138   : > { %v1130_v21 = vsel %vm799_vm2, %v1033_v45, 0.0 }
 0x139   : > { %v916_v8 = vadd.f32 %v915_v58, %v914_v57  ;;  %v1113_v11 = vadd.f32 %v1112_v28, %v1111_v34  ;;  %v789_v53 = vpop.f32.mrf.mxu3  ;;  %v927_v34 = vsel %vm799_vm2, %v1770_v13, 0.0  ;;  %v1124_v58 = vsel %vm799_vm2, %v1030_v39, 0.0 }
 0x13a   : > { %v1126_v7 = vsel %vm799_vm2, %v1031_v43, 0.0  ;;  %v1128_v13 = vsel %vm799_vm2, %v1032_v54, 0.0  ;;  %v1037_v39 = vmul.f32 %v1895_v0, %v1895_v0  ;;  %v1038_v43 = vmul.f32 %v1913_v9, %v1913_v9 }
 0x13b   : > { %v918_v22 = vadd.f32 %v917_v12, %v916_v8  ;;  %v1115_v18 = vadd.f32 %v1114_v41, %v1113_v11  ;;  %v929_v8 = vsel %vm799_vm2, %v1780_v19, 0.0  ;;  %v931_v12 = vsel %vm799_vm2, %v1811_v31, 0.0 }
 0x13c   : > { %v1035_v31 = vmul.f32 %v1847_v46, %v1847_v46  ;;  %v939_v46 = vsel %vm799_vm2, %v1895_v0, 0.0  ;;  %v943_v0 = vsel %vm799_vm2, %v1946_v26, 0.0 }
 0x13d   : > { %v920_v15 = vadd.f32 %v919_v20, %v918_v22  ;;  %v1117_v42 = vadd.f32 %v1116_v25, %v1115_v18  ;;  %v2216_v22 = vadd.f32 %v1712_v38, %v789_v53 }
 0x13f   : > { %v1119_v24 = vadd.f32 %v1118_v29, %v1117_v42  ;;  %v922_v62 = vadd.f32 %v921_v51, %v920_v15  ;;  %v933_v15 = vsel %vm799_vm2, %v1823_v37, 0.0  ;;  %860 = vst.msk [vmem:[%s1717_s23 + $0x1e0] sm:$0xff] %vm799_vm2, %v2216_v22  ;;  %v1132_v51 = vsel %vm799_vm2, %v1034_v16, 0.0 }
 0x140   : > { %v1042_v16 = vmul.f32 %v2035_v23, %v2035_v23 }
 0x141   : > { %v1121_v48 = vadd.f32 %v1120_v35, %v1119_v24  ;;  %v924_v50 = vadd.f32 %v923_v33, %v922_v62  ;;  %v791_v18 = vpop.f32.mrf.mxu3  ;;  %v1036_v24 = vmul.f32 %v1865_v55, %v1865_v55  ;;  %v1134_v35 = vsel %vm799_vm2, %v1035_v31, 0.0 }
 0x142   : > { %v2219_v20 = vadd.f32 %v1712_v38, %v791_v18  ;;  %v937_v33 = vsel %vm799_vm2, %v1865_v55, 0.0  ;;  %v941_v55 = vsel %vm799_vm2, %v1913_v9, 0.0  ;;  %v945_v9 = vsel %vm799_vm2, %v1957_v36, 0.0 }
 0x143   : > { %v1123_v28 = vadd.f32 %v1122_v63, %v1121_v48  ;;  %v926_v57 = vadd.f32 %v925_v59, %v924_v50  ;;  %v1136_v50 = vsel %vm799_vm2, %v1036_v24, 0.0  ;;  %v949_v31 = vsel %vm799_vm2, %v2035_v23, 0.0 }
 0x144   : > { %861 = vst.msk [vmem:[%s1717_s23 + $0x1e8] sm:$0xff] %vm799_vm2, %v2219_v20 }
 0x145   : > { %v928_v52 = vadd.f32 %v927_v34, %v926_v57  ;;  %v1125_v3 = vadd.f32 %v1124_v58, %v1123_v28  ;;  %v1138_v57 = vsel %vm799_vm2, %v1037_v39, 0.0  ;;  %v1039_v34 = vmul.f32 %v1946_v26, %v1946_v26 }
 0x146   : > { %v947_v26 = vsel %vm799_vm2, %v2024_v4, 0.0 }
 0x147   : > { %v930_v11 = vadd.f32 %v929_v8, %v928_v52  ;;  %v1127_v41 = vadd.f32 %v1126_v7, %v1125_v3  ;;  %v1140_v52 = vsel %vm799_vm2, %v1038_v43, 0.0  ;;  %v1040_v3 = vmul.f32 %v1957_v36, %v1957_v36 }
 0x148   : > { %v1142_v45 = vsel %vm799_vm2, %v1039_v34, 0.0  ;;  %v1047_v43 = vmul.f32 %v1850_v47, %v1850_v47 }
 0x149   : > { %v932_v25 = vadd.f32 %v931_v12, %v930_v11  ;;  %v1129_v19 = vadd.f32 %v1128_v13, %v1127_v41  ;;  %v794_v63 = vpop.f32.mrf.mxu3  ;;  %v1041_v11 = vmul.f32 %v2024_v4, %v2024_v4  ;;  %v1144_v12 = vsel %vm799_vm2, %v1040_v3, 0.0 }
 0x14a   : > { %v2268_v18 = vadd.f32 %v1712_v38, %v794_v63  ;;  %v1043_v4 = vmul.f32 %v2088_v27, %v2088_v27  ;;  %v957_v63 = vsel %vm799_vm2, %v2158_v17, 0.0 }
 0x14b   : > { %v934_v42 = vadd.f32 %v933_v15, %v932_v25  ;;  %v1131_v29 = vadd.f32 %v1130_v21, %v1129_v19  ;;  %v1146_v15 = vsel %vm799_vm2, %v1041_v11, 0.0 }
 0x14c   : > { %862 = vst.msk [vmem:[%s1717_s23 + $0x1f0] sm:$0xff] %vm799_vm2, %v2268_v18 }
 0x14d   : > { %v936_v37 = vadd.f32 %v935_v30, %v934_v42  ;;  %v1133_v62 = vadd.f32 %v1132_v51, %v1131_v29  ;;  %v1148_v51 = vsel %vm799_vm2, %v1042_v16, 0.0  ;;  %v1044_v30 = vmul.f32 %v2094_v44, %v2094_v44 }
 0x14e   : > { %v1052_v16 = vmul.f32 %v1965_v40, %v1965_v40 }
 0x14f   : > { %v1135_v53 = vadd.f32 %v1134_v35, %v1133_v62  ;;  %v938_v48 = vadd.f32 %v937_v33, %v936_v37  ;;  %v1150_v37 = vsel %vm799_vm2, %v1043_v4, 0.0  ;;  %v953_v62 = vsel %vm799_vm2, %v2094_v44, 0.0 }
 0x150   : > { %v1045_v35 = vmul.f32 %v2152_v6, %v2152_v6 }
 0x151   : > { %v940_v59 = vadd.f32 %v939_v46, %v938_v48  ;;  %v1137_v28 = vadd.f32 %v1136_v50, %v1135_v53  ;;  %v796_v25 = vpop.f32.mrf.mxu3  ;;  %v1152_v53 = vsel %vm799_vm2, %v1044_v30, 0.0  ;;  %v1046_v48 = vmul.f32 %v2158_v17, %v2158_v17 }
 0x152   : > { %v2271_v21 = vadd.f32 %v1712_v38, %v796_v25  ;;  %v951_v38 = vsel %vm799_vm2, %v2088_v27, 0.0  ;;  %v955_v27 = vsel %vm799_vm2, %v2152_v6, 0.0  ;;  %v1154_v44 = vsel %vm799_vm2, %v1045_v35, 0.0 }
 0x153   : > { %v942_v54 = vadd.f32 %v941_v55, %v940_v59  ;;  %v1139_v58 = vadd.f32 %v1138_v57, %v1137_v28  ;;  %v959_v57 = vsel %vm799_vm2, %v1850_v47, 0.0  ;;  %v1048_v6 = vmul.f32 %v1868_v56, %v1868_v56 }
 0x154   : > { %863 = vst.msk [vmem:[%s1717_s23 + $0x1f8] sm:$0xff] %vm799_vm2, %v2271_v21  ;;  %v1156_v55 = vsel %vm799_vm2, %v1046_v48, 0.0  ;;  %v1049_v17 = vmul.f32 %v1898_v1, %v1898_v1  ;;  %v963_v47 = vsel %vm799_vm2, %v1898_v1, 0.0  ;;  %v967_v1 = vsel %vm799_vm2, %v1949_v32, 0.0 }
 0x155   : > { %v944_v7 = vadd.f32 %v943_v0, %v942_v54  ;;  %v1141_v8 = vadd.f32 %v1140_v52, %v1139_v58  ;;  %v1158_v58 = vsel %vm799_vm2, %v1047_v43, 0.0  ;;  %v961_v52 = vsel %vm799_vm2, %v1868_v56, 0.0 }
 0x156   : > { %v1162_v11 = vsel %vm799_vm2, %v1049_v17, 0.0  ;;  %v965_v56 = vsel %vm799_vm2, %v1916_v10, 0.0  ;;  %v1056_v35 = vmul.f32 %v2097_v60, %v2097_v60  ;;  %v1058_v43 = vmul.f32 %v2161_v5, %v2161_v5 }
 0x157   : > { %v946_v41 = vadd.f32 %v945_v9, %v944_v7  ;;  %v1143_v13 = vadd.f32 %v1142_v45, %v1141_v8  ;;  %v1160_v7 = vsel %vm799_vm2, %v1048_v6, 0.0  ;;  %v1050_v8 = vmul.f32 %v1916_v10, %v1916_v10 }
 0x158   : > { %v969_v10 = vsel %vm799_vm2, %v1965_v40, 0.0  ;;  %v973_v40 = vsel %vm799_vm2, %v2041_v2, 0.0  ;;  %v1061_v17 = vmul.f32 %v2268_v18, %v2268_v18 }
 0x159   : > { %v948_v19 = vadd.f32 %v947_v26, %v946_v41  ;;  %v1145_v36 = vadd.f32 %v1144_v12, %v1143_v13  ;;  %v1051_v41 = vmul.f32 %v1949_v32, %v1949_v32  ;;  %v1164_v26 = vsel %vm799_vm2, %v1050_v8, 0.0 }
 0x15a   : > { %v971_v32 = vsel %vm799_vm2, %v2027_v14, 0.0 }
 0x15b   : > { %v950_v42 = vadd.f32 %v949_v31, %v948_v19  ;;  %v1147_v29 = vadd.f32 %v1146_v15, %v1145_v36  ;;  %v1166_v36 = vsel %vm799_vm2, %v1051_v41, 0.0  ;;  %v1053_v15 = vmul.f32 %v2027_v14, %v2027_v14 }
 0x15c   : > { %v975_v14 = vsel %vm799_vm2, %v2091_v49, 0.0 }
 0x15d   : > { %v1149_v23 = vadd.f32 %v1148_v51, %v1147_v29  ;;  %v952_v24 = vadd.f32 %v951_v38, %v950_v42  ;;  %v1168_v42 = vsel %vm799_vm2, %v1052_v16, 0.0  ;;  %v1054_v29 = vmul.f32 %v2041_v2, %v2041_v2 }
 0x15e   : > { %v1170_v30 = vsel %vm799_vm2, %v1053_v15, 0.0  ;;  %v977_v2 = vsel %vm799_vm2, %v2097_v60, 0.0  ;;  %v981_v60 = vsel %vm799_vm2, %v2161_v5, 0.0  ;;  %v985_v5 = vsel %vm799_vm2, %v2219_v20, 0.0 }
 0x15f   : > { %v1151_v33 = vadd.f32 %v1150_v37, %v1149_v23  ;;  %v954_v39 = vadd.f32 %v953_v62, %v952_v24  ;;  %v1055_v23 = vmul.f32 %v2091_v49, %v2091_v49  ;;  %v1172_v62 = vsel %vm799_vm2, %v1054_v29, 0.0 }
 0x160   : > { %v979_v49 = vsel %vm799_vm2, %v2155_v61, 0.0 }
 0x161   : > { %v1153_v50 = vadd.f32 %v1152_v53, %v1151_v33  ;;  %v956_v46 = vadd.f32 %v955_v27, %v954_v39  ;;  %v1174_v53 = vsel %vm799_vm2, %v1055_v23, 0.0  ;;  %v1057_v27 = vmul.f32 %v2155_v61, %v2155_v61 }
 0x162   : > { %v983_v61 = vsel %vm799_vm2, %v2216_v22, 0.0 }
 0x163   : > { %v1155_v59 = vadd.f32 %v1154_v44, %v1153_v50  ;;  %v958_v28 = vadd.f32 %v957_v63, %v956_v46  ;;  %v1176_v46 = vsel %vm799_vm2, %v1056_v35, 0.0 }
 0x165   : > { %v960_v34 = vadd.f32 %v959_v57, %v958_v28  ;;  %v1157_v54 = vadd.f32 %v1156_v55, %v1155_v59  ;;  %v1178_v59 = vsel %vm799_vm2, %v1057_v27, 0.0  ;;  %v1059_v28 = vmul.f32 %v2216_v22, %v2216_v22 }
 0x166   : > { %v1180_v55 = vsel %vm799_vm2, %v1058_v43, 0.0  ;;  %v987_v22 = vsel %vm799_vm2, %v2268_v18, 0.0 }
 0x167   : > { %v962_v0 = vadd.f32 %v961_v52, %v960_v34  ;;  %v1159_v3 = vadd.f32 %v1158_v58, %v1157_v54  ;;  %v1060_v34 = vmul.f32 %v2219_v20, %v2219_v20  ;;  %v1182_v52 = vsel %vm799_vm2, %v1059_v28, 0.0 }
 0x168   : > { %v989_v20 = vsel %vm799_vm2, %v2271_v21, 0.0 }
 0x169   : > { %v964_v45 = vadd.f32 %v963_v47, %v962_v0  ;;  %v1161_v9 = vadd.f32 %v1160_v7, %v1159_v3  ;;  %v1184_v7 = vsel %vm799_vm2, %v1060_v34, 0.0  ;;  %v1062_v47 = vmul.f32 %v2271_v21, %v2271_v21 }
 0x16b   : > { %v966_v13 = vadd.f32 %v965_v56, %v964_v45  ;;  %v1163_v12 = vadd.f32 %v1162_v11, %v1161_v9  ;;  %v1186_v9 = vsel %vm799_vm2, %v1061_v17, 0.0  ;;  %v1188_v41 = vsel %vm799_vm2, %v1062_v47, 0.0 }
 0x16d   : > { %v968_v25 = vadd.f32 %v967_v1, %v966_v13  ;;  %v1165_v19 = vadd.f32 %v1164_v26, %v1163_v12 }
 0x16f   : > { %v1167_v31 = vadd.f32 %v1166_v36, %v1165_v19  ;;  %v970_v4 = vadd.f32 %v969_v10, %v968_v25 }
 0x171   : > { %v972_v51 = vadd.f32 %v971_v32, %v970_v4  ;;  %v1169_v38 = vadd.f32 %v1168_v42, %v1167_v31 }
 0x173   : > { %v974_v24 = vadd.f32 %v973_v40, %v972_v51  ;;  %v1171_v37 = vadd.f32 %v1170_v30, %v1169_v38 }
 0x175   : > { %v976_v33 = vadd.f32 %v975_v14, %v974_v24  ;;  %v1173_v39 = vadd.f32 %v1172_v62, %v1171_v37 }
 0x177   : > { %v978_v48 = vadd.f32 %v977_v2, %v976_v33  ;;  %v1175_v50 = vadd.f32 %v1174_v53, %v1173_v39 }
 0x179   : > { %v980_v44 = vadd.f32 %v979_v49, %v978_v48  ;;  %v1177_v63 = vadd.f32 %v1176_v46, %v1175_v50 }
 0x17b   : > { %v982_v57 = vadd.f32 %v981_v60, %v980_v44  ;;  %v1179_v6 = vadd.f32 %v1178_v59, %v1177_v63 }
 0x17d   : > { %v1181_v54 = vadd.f32 %v1180_v55, %v1179_v6  ;;  %v984_v58 = vadd.f32 %v983_v61, %v982_v57 }
 0x17f   : > { %v1183_v0 = vadd.f32 %v1182_v52, %v1181_v54  ;;  %v986_v3 = vadd.f32 %v985_v5, %v984_v58 }
 0x181   : > { %v1185_v8 = vadd.f32 %v1184_v7, %v1183_v0  ;;  %v988_v45 = vadd.f32 %v987_v22, %v986_v3 }
 0x183   : > { %v1187_v11 = vadd.f32 %v1186_v9, %v1185_v8  ;;  %v990_v56 = vadd.f32 %v989_v20, %v988_v45 }
 0x185   : > { %v991_v13 = vrot.slane %v990_v56, 4  ;;  %v1189_v12 = vadd.f32 %v1188_v41, %v1187_v11 }
 0x187   : > { %v992_v26 = vadd.f32 %v991_v13, %v990_v56  ;;  %v1190_v18 = vrot.slane %v1189_v12, 4 }
 0x189   : > { %v993_v1 = vrot.slane %v992_v26, 2  ;;  %v1191_v16 = vadd.f32 %v1190_v18, %v1189_v12 }
 0x18b   : > { %v994_v25 = vadd.f32 %v993_v1, %v992_v26  ;;  %v1192_v19 = vrot.slane %v1191_v16, 2 }
 0x18d   : > { %v995_v36 = vrot.slane %v994_v25, 1  ;;  %v1193_v10 = vadd.f32 %v1192_v19, %v1191_v16 }
 0x18f   : > { %v996_v21 = vadd.f32 %v995_v36, %v994_v25  ;;  %v1194_v15 = vrot.slane %v1193_v10, 1 }
 0x191   : > { %998 = vst.msk [vmem:[%s241_s26] sm:$0x1] %vm997_vm3, %v996_v21  ;;  %v1195_v31 = vadd.f32 %v1194_v15, %v1193_v10 }
 0x193   : > { %1196 = vst.msk [vmem:[%s244_s29] sm:$0x1] %vm997_vm3, %v1195_v31 }
 0x194 PF: > { %s16_s18 = sadd.s32 1, %s1577_s18  }
 0x195   : > { %p13_p5 = scmp.ge.s32.totalorder %s16_s18, 18  }
 0x197   :  { %15 = sbr.rel (!%p13_p5) target bundleno = 1 (0x1), region = 86 }

// kernel: double_conv_forward.5
= control target key start
LH: loop header
LB: loop body
LE: loop exit
PB: predicated region body
PF: predicated region fallthrough
CT: control target
= control target key end

     0   :  { %s672_s12 = smov 0   ;;  %s1027_s0 = inlined_call_operand.vmem [shape: f32[8192,8], index: 0, kind: input, shape index: {}]   ;;  %s1028_s1 = inlined_call_operand.vmem [shape: f32[1,8], index: 1, kind: input, shape index: {}]   ;;  %s1029_s2 = inlined_call_operand.vmem [shape: f32[1,8], index: 2, kind: input, shape index: {}]   ;;  %s1030_s3 = inlined_call_operand.vmem [shape: bf16[8192,8], index: 3, kind: output, shape index: {}]  }
   0x1 LB: > { %s623_s13 = sadd.s32 4294967295, %s650_s12   ;;  %p627_p0 = scmp.ge.s32.totalorder %s650_s12, 1  ;;  %s650_s12 = sphi %s672_s12, %s13_s12  }
   0x2   : > { %p138_p1 = scmp.lt.s32.totalorder %s650_s12, 17 }
   0x4   : > { %p139_p2 = pnand %p627_p0, %p138_p1 }
   0x5   : > { %s628_s14 = sshll.u32 (!%p139_p2), %s623_s13, 6 }
   0x6   : > { %142 = sbr.rel (%p139_p2) target bundleno = 87 (0x57), region = 32  ;;  %p163_p3 = scmp.lt.s32.totalorder (!%p139_p2), %s628_s14, 1023 }
   0xb   : > { %s1032_s14 = smov (!%p163_p3, %s628_s14), 1023  ;;  %v685_v0 = vld [vmem:[%s1028_s1] ss:$0 sm:$0xff]  ;;  %vm502_vm0 = vcmask 60416  }
   0xc   : > { %s629_s17 = sshll.u32 %s1032_s14, 3  ;;  %v696_v1 = vld [vmem:[%s1029_s2] ss:$0 sm:$0xff]  ;;  %s631_s23 = sshll.u32 %s1032_s14, 2 }
   0xd   : > { %s691_s20 = scalar_lea.vmem %s1027_s0, %s629_s17  ;;  %s725_s26 = scalar_lea.vmem %s1030_s3, %s631_s23 }
   0xe   : > { %v174_v2 = vld [vmem:[%s691_s20] sm:$0xff]  ;;  %v175_v3 = vld [vmem:[%s691_s20 + $0x8] sm:$0xff]  ;;  %v176_v4 = vld [vmem:[%s691_s20 + $0x10] sm:$0xff] }
   0xf   : > { %v242_v5 = vmul.f32 %v685_v0, %v174_v2  ;;  %v243_v6 = vmul.f32 %v685_v0, %v175_v3  ;;  %v244_v7 = vmul.f32 %v685_v0, %v176_v4  ;;  %v177_v8 = vld [vmem:[%s691_s20 + $0x18] sm:$0xff]  ;;  %v178_v9 = vld [vmem:[%s691_s20 + $0x20] sm:$0xff]  ;;  %v179_v10 = vld [vmem:[%s691_s20 + $0x28] sm:$0xff] }
  0x10   : > { %v245_v11 = vmul.f32 %v685_v0, %v177_v8  ;;  %v246_v12 = vmul.f32 %v685_v0, %v178_v9  ;;  %v247_v13 = vmul.f32 %v685_v0, %v179_v10  ;;  %v180_v14 = vld [vmem:[%s691_s20 + $0x30] sm:$0xff]  ;;  %v181_v15 = vld [vmem:[%s691_s20 + $0x38] sm:$0xff]  ;;  %v182_v32 = vld [vmem:[%s691_s20 + $0x40] sm:$0xff] }
  0x11   : > { %v310_v16 = vadd.f32 %v696_v1, %v242_v5  ;;  %v311_v17 = vadd.f32 %v696_v1, %v243_v6  ;;  %v312_v18 = vadd.f32 %v696_v1, %v244_v7  ;;  %v248_v19 = vmul.f32 %v685_v0, %v180_v14  ;;  %v183_v33 = vld [vmem:[%s691_s20 + $0x48] sm:$0xff]  ;;  %v184_v34 = vld [vmem:[%s691_s20 + $0x50] sm:$0xff]  ;;  %v185_v39 = vld [vmem:[%s691_s20 + $0x58] sm:$0xff] }
  0x12   : > { %v313_v20 = vadd.f32 %v696_v1, %v245_v11  ;;  %v314_v21 = vadd.f32 %v696_v1, %v246_v12  ;;  %v315_v22 = vadd.f32 %v696_v1, %v247_v13  ;;  %v249_v23 = vmul.f32 %v685_v0, %v181_v15  ;;  %v186_v40 = vld [vmem:[%s691_s20 + $0x60] sm:$0xff]  ;;  %v187_v41 = vld [vmem:[%s691_s20 + $0x68] sm:$0xff]  ;;  %v188_v46 = vld [vmem:[%s691_s20 + $0x70] sm:$0xff] }
  0x13   : > { %v374_v24 = vmax.f32 %v310_v16, 0.0  ;;  %v375_v25 = vmax.f32 %v311_v17, 0.0  ;;  %v376_v26 = vmax.f32 %v312_v18, 0.0  ;;  %v316_v27 = vadd.f32 %v696_v1, %v248_v19  ;;  %v189_v51 = vld [vmem:[%s691_s20 + $0x78] sm:$0xff]  ;;  %v190_v2 = vld [vmem:[%s691_s20 + $0x80] sm:$0xff]  ;;  %v191_v7 = vld [vmem:[%s691_s20 + $0x88] sm:$0xff] }
  0x14   : > { %v377_v28 = vmax.f32 %v313_v20, 0.0  ;;  %v378_v29 = vmax.f32 %v314_v21, 0.0  ;;  %v379_v30 = vmax.f32 %v315_v22, 0.0  ;;  %v317_v31 = vadd.f32 %v696_v1, %v249_v23  ;;  %v192_v12 = vld [vmem:[%s691_s20 + $0x90] sm:$0xff]  ;;  %v193_v17 = vld [vmem:[%s691_s20 + $0x98] sm:$0xff]  ;;  %v194_v18 = vld [vmem:[%s691_s20 + $0xa0] sm:$0xff] }
  0x15   : > { %v438_v35 = vpack.c.bf16 %v374_v24, %v374_v24  ;;  %v439_v36 = vpack.c.bf16 %v375_v25, %v375_v25  ;;  %v440_v37 = vpack.c.bf16 %v376_v26, %v376_v26  ;;  %v380_v38 = vmax.f32 %v316_v27, 0.0  ;;  %v195_v19 = vld [vmem:[%s691_s20 + $0xa8] sm:$0xff]  ;;  %v196_v24 = vld [vmem:[%s691_s20 + $0xb0] sm:$0xff] }
  0x16   : > { %v441_v42 = vpack.c.bf16 %v377_v28, %v377_v28  ;;  %v442_v43 = vpack.c.bf16 %v378_v29, %v378_v29  ;;  %v443_v44 = vpack.c.bf16 %v379_v30, %v379_v30  ;;  %v381_v45 = vmax.f32 %v317_v31, 0.0  ;;  %v197_v29 = vld [vmem:[%s691_s20 + $0xb8] sm:$0xff] }
  0x17   : > { %503 = vst.msk [vmem:[%s725_s26] sm:$0xf] %vm502_vm0, %v438_v35  ;;  %v444_v47 = vpack.c.bf16 %v380_v38, %v380_v38  ;;  %v250_v48 = vmul.f32 %v685_v0, %v182_v32  ;;  %v251_v49 = vmul.f32 %v685_v0, %v183_v33  ;;  %v252_v50 = vmul.f32 %v685_v0, %v184_v34 }
  0x18   : > { %504 = vst.msk [vmem:[%s725_s26 + $0x4] sm:$0xf] %vm502_vm0, %v439_v36  ;;  %v445_v52 = vpack.c.bf16 %v381_v45, %v381_v45  ;;  %v253_v53 = vmul.f32 %v685_v0, %v185_v39  ;;  %v254_v54 = vmul.f32 %v685_v0, %v186_v40  ;;  %v255_v55 = vmul.f32 %v685_v0, %v187_v41 }
  0x19   : > { %505 = vst.msk [vmem:[%s725_s26 + $0x8] sm:$0xf] %vm502_vm0, %v440_v37  ;;  %v318_v56 = vadd.f32 %v696_v1, %v250_v48  ;;  %v319_v57 = vadd.f32 %v696_v1, %v251_v49  ;;  %v320_v58 = vadd.f32 %v696_v1, %v252_v50  ;;  %v256_v59 = vmul.f32 %v685_v0, %v188_v46 }
  0x1a   : > { %506 = vst.msk [vmem:[%s725_s26 + $0xc] sm:$0xf] %vm502_vm0, %v441_v42  ;;  %v321_v60 = vadd.f32 %v696_v1, %v253_v53  ;;  %v322_v61 = vadd.f32 %v696_v1, %v254_v54  ;;  %v323_v62 = vadd.f32 %v696_v1, %v255_v55  ;;  %v257_v63 = vmul.f32 %v685_v0, %v189_v51  ;;  %v198_v42 = vld [vmem:[%s691_s20 + $0xc0] sm:$0xff] }
  0x1b   : > { %507 = vst.msk [vmem:[%s725_s26 + $0x10] sm:$0xf] %vm502_vm0, %v442_v43  ;;  %v382_v3 = vmax.f32 %v318_v56, 0.0  ;;  %v383_v4 = vmax.f32 %v319_v57, 0.0  ;;  %v384_v5 = vmax.f32 %v320_v58, 0.0  ;;  %v324_v6 = vadd.f32 %v696_v1, %v256_v59  ;;  %v201_v57 = vld [vmem:[%s691_s20 + $0xd8] sm:$0xff] }
  0x1c   : > { %508 = vst.msk [vmem:[%s725_s26 + $0x14] sm:$0xf] %vm502_vm0, %v443_v44  ;;  %v385_v8 = vmax.f32 %v321_v60, 0.0  ;;  %v386_v9 = vmax.f32 %v322_v61, 0.0  ;;  %v387_v10 = vmax.f32 %v323_v62, 0.0  ;;  %v325_v11 = vadd.f32 %v696_v1, %v257_v63  ;;  %v202_v58 = vld [vmem:[%s691_s20 + $0xe0] sm:$0xff] }
  0x1d   : > { %509 = vst.msk [vmem:[%s725_s26 + $0x18] sm:$0xf] %vm502_vm0, %v444_v47  ;;  %v446_v13 = vpack.c.bf16 %v382_v3, %v382_v3  ;;  %v447_v14 = vpack.c.bf16 %v383_v4, %v383_v4  ;;  %v448_v15 = vpack.c.bf16 %v384_v5, %v384_v5  ;;  %v388_v16 = vmax.f32 %v324_v6, 0.0  ;;  %v199_v47 = vld [vmem:[%s691_s20 + $0xc8] sm:$0xff] }
  0x1e   : > { %510 = vst.msk [vmem:[%s725_s26 + $0x1c] sm:$0xf] %vm502_vm0, %v445_v52  ;;  %v449_v20 = vpack.c.bf16 %v385_v8, %v385_v8  ;;  %v450_v21 = vpack.c.bf16 %v386_v9, %v386_v9  ;;  %v451_v22 = vpack.c.bf16 %v387_v10, %v387_v10  ;;  %v389_v23 = vmax.f32 %v325_v11, 0.0  ;;  %v200_v52 = vld [vmem:[%s691_s20 + $0xd0] sm:$0xff]  ;;  %v203_v59 = vld [vmem:[%s691_s20 + $0xe8] sm:$0xff] }
  0x1f   : > { %511 = vst.msk [vmem:[%s725_s26 + $0x20] sm:$0xf] %vm502_vm0, %v446_v13  ;;  %v452_v25 = vpack.c.bf16 %v388_v16, %v388_v16  ;;  %v258_v26 = vmul.f32 %v685_v0, %v190_v2  ;;  %v259_v27 = vmul.f32 %v685_v0, %v191_v7  ;;  %v260_v28 = vmul.f32 %v685_v0, %v192_v12  ;;  %v204_v2 = vld [vmem:[%s691_s20 + $0xf0] sm:$0xff]  ;;  %v205_v7 = vld [vmem:[%s691_s20 + $0xf8] sm:$0xff] }
  0x20   : > { %512 = vst.msk [vmem:[%s725_s26 + $0x24] sm:$0xf] %vm502_vm0, %v447_v14  ;;  %v453_v30 = vpack.c.bf16 %v389_v23, %v389_v23  ;;  %v261_v31 = vmul.f32 %v685_v0, %v193_v17  ;;  %v262_v32 = vmul.f32 %v685_v0, %v194_v18  ;;  %v263_v33 = vmul.f32 %v685_v0, %v195_v19 }
  0x21   : > { %513 = vst.msk [vmem:[%s725_s26 + $0x28] sm:$0xf] %vm502_vm0, %v448_v15  ;;  %v326_v34 = vadd.f32 %v696_v1, %v258_v26  ;;  %v327_v35 = vadd.f32 %v696_v1, %v259_v27  ;;  %v328_v36 = vadd.f32 %v696_v1, %v260_v28  ;;  %v264_v37 = vmul.f32 %v685_v0, %v196_v24 }
  0x22   : > { %514 = vst.msk [vmem:[%s725_s26 + $0x2c] sm:$0xf] %vm502_vm0, %v449_v20  ;;  %v329_v38 = vadd.f32 %v696_v1, %v261_v31  ;;  %v330_v39 = vadd.f32 %v696_v1, %v262_v32  ;;  %v331_v40 = vadd.f32 %v696_v1, %v263_v33  ;;  %v265_v41 = vmul.f32 %v685_v0, %v197_v29  ;;  %v206_v20 = vld [vmem:[%s691_s20 + $0x100] sm:$0xff] }
  0x23   : > { %515 = vst.msk [vmem:[%s725_s26 + $0x30] sm:$0xf] %vm502_vm0, %v450_v21  ;;  %v390_v43 = vmax.f32 %v326_v34, 0.0  ;;  %v391_v44 = vmax.f32 %v327_v35, 0.0  ;;  %v392_v45 = vmax.f32 %v328_v36, 0.0  ;;  %v332_v46 = vadd.f32 %v696_v1, %v264_v37  ;;  %v209_v35 = vld [vmem:[%s691_s20 + $0x118] sm:$0xff] }
  0x24   : > { %516 = vst.msk [vmem:[%s725_s26 + $0x34] sm:$0xf] %vm502_vm0, %v451_v22  ;;  %v393_v48 = vmax.f32 %v329_v38, 0.0  ;;  %v394_v49 = vmax.f32 %v330_v39, 0.0  ;;  %v395_v50 = vmax.f32 %v331_v40, 0.0  ;;  %v333_v51 = vadd.f32 %v696_v1, %v265_v41  ;;  %v210_v36 = vld [vmem:[%s691_s20 + $0x120] sm:$0xff] }
  0x25   : > { %517 = vst.msk [vmem:[%s725_s26 + $0x38] sm:$0xf] %vm502_vm0, %v452_v25  ;;  %v454_v53 = vpack.c.bf16 %v390_v43, %v390_v43  ;;  %v455_v54 = vpack.c.bf16 %v391_v44, %v391_v44  ;;  %v456_v55 = vpack.c.bf16 %v392_v45, %v392_v45  ;;  %v396_v56 = vmax.f32 %v332_v46, 0.0  ;;  %v207_v25 = vld [vmem:[%s691_s20 + $0x108] sm:$0xff] }
  0x26   : > { %518 = vst.msk [vmem:[%s725_s26 + $0x3c] sm:$0xf] %vm502_vm0, %v453_v30  ;;  %v457_v60 = vpack.c.bf16 %v393_v48, %v393_v48  ;;  %v458_v61 = vpack.c.bf16 %v394_v49, %v394_v49  ;;  %v459_v62 = vpack.c.bf16 %v395_v50, %v395_v50  ;;  %v397_v63 = vmax.f32 %v333_v51, 0.0  ;;  %v208_v30 = vld [vmem:[%s691_s20 + $0x110] sm:$0xff]  ;;  %v211_v37 = vld [vmem:[%s691_s20 + $0x128] sm:$0xff] }
  0x27   : > { %519 = vst.msk [vmem:[%s725_s26 + $0x40] sm:$0xf] %vm502_vm0, %v454_v53  ;;  %v460_v3 = vpack.c.bf16 %v396_v56, %v396_v56  ;;  %v266_v4 = vmul.f32 %v685_v0, %v198_v42  ;;  %v267_v5 = vmul.f32 %v685_v0, %v199_v47  ;;  %v268_v6 = vmul.f32 %v685_v0, %v200_v52  ;;  %v212_v42 = vld [vmem:[%s691_s20 + $0x130] sm:$0xff]  ;;  %v213_v47 = vld [vmem:[%s691_s20 + $0x138] sm:$0xff] }
  0x28   : > { %520 = vst.msk [vmem:[%s725_s26 + $0x44] sm:$0xf] %vm502_vm0, %v455_v54  ;;  %v461_v8 = vpack.c.bf16 %v397_v63, %v397_v63  ;;  %v269_v9 = vmul.f32 %v685_v0, %v201_v57  ;;  %v270_v10 = vmul.f32 %v685_v0, %v202_v58  ;;  %v271_v11 = vmul.f32 %v685_v0, %v203_v59 }
  0x29   : > { %521 = vst.msk [vmem:[%s725_s26 + $0x48] sm:$0xf] %vm502_vm0, %v456_v55  ;;  %v334_v12 = vadd.f32 %v696_v1, %v266_v4  ;;  %v335_v13 = vadd.f32 %v696_v1, %v267_v5  ;;  %v336_v14 = vadd.f32 %v696_v1, %v268_v6  ;;  %v272_v15 = vmul.f32 %v685_v0, %v204_v2 }
  0x2a   : > { %522 = vst.msk [vmem:[%s725_s26 + $0x4c] sm:$0xf] %vm502_vm0, %v457_v60  ;;  %v337_v16 = vadd.f32 %v696_v1, %v269_v9  ;;  %v338_v17 = vadd.f32 %v696_v1, %v270_v10  ;;  %v339_v18 = vadd.f32 %v696_v1, %v271_v11  ;;  %v273_v19 = vmul.f32 %v685_v0, %v205_v7  ;;  %v214_v60 = vld [vmem:[%s691_s20 + $0x140] sm:$0xff] }
  0x2b   : > { %523 = vst.msk [vmem:[%s725_s26 + $0x50] sm:$0xf] %vm502_vm0, %v458_v61  ;;  %v398_v21 = vmax.f32 %v334_v12, 0.0  ;;  %v399_v22 = vmax.f32 %v335_v13, 0.0  ;;  %v400_v23 = vmax.f32 %v336_v14, 0.0  ;;  %v340_v24 = vadd.f32 %v696_v1, %v272_v15  ;;  %v217_v13 = vld [vmem:[%s691_s20 + $0x158] sm:$0xff] }
  0x2c   : > { %524 = vst.msk [vmem:[%s725_s26 + $0x54] sm:$0xf] %vm502_vm0, %v459_v62  ;;  %v401_v26 = vmax.f32 %v337_v16, 0.0  ;;  %v402_v27 = vmax.f32 %v338_v17, 0.0  ;;  %v403_v28 = vmax.f32 %v339_v18, 0.0  ;;  %v341_v29 = vadd.f32 %v696_v1, %v273_v19  ;;  %v218_v14 = vld [vmem:[%s691_s20 + $0x160] sm:$0xff] }
  0x2d   : > { %525 = vst.msk [vmem:[%s725_s26 + $0x58] sm:$0xf] %vm502_vm0, %v460_v3  ;;  %v462_v31 = vpack.c.bf16 %v398_v21, %v398_v21  ;;  %v463_v32 = vpack.c.bf16 %v399_v22, %v399_v22  ;;  %v464_v33 = vpack.c.bf16 %v400_v23, %v400_v23  ;;  %v404_v34 = vmax.f32 %v340_v24, 0.0  ;;  %v215_v3 = vld [vmem:[%s691_s20 + $0x148] sm:$0xff] }
  0x2e   : > { %526 = vst.msk [vmem:[%s725_s26 + $0x5c] sm:$0xf] %vm502_vm0, %v461_v8  ;;  %v465_v38 = vpack.c.bf16 %v401_v26, %v401_v26  ;;  %v466_v39 = vpack.c.bf16 %v402_v27, %v402_v27  ;;  %v467_v40 = vpack.c.bf16 %v403_v28, %v403_v28  ;;  %v405_v41 = vmax.f32 %v341_v29, 0.0  ;;  %v216_v8 = vld [vmem:[%s691_s20 + $0x150] sm:$0xff]  ;;  %v219_v15 = vld [vmem:[%s691_s20 + $0x168] sm:$0xff] }
  0x2f   : > { %527 = vst.msk [vmem:[%s725_s26 + $0x60] sm:$0xf] %vm502_vm0, %v462_v31  ;;  %v468_v43 = vpack.c.bf16 %v404_v34, %v404_v34  ;;  %v274_v44 = vmul.f32 %v685_v0, %v206_v20  ;;  %v275_v45 = vmul.f32 %v685_v0, %v207_v25  ;;  %v276_v46 = vmul.f32 %v685_v0, %v208_v30  ;;  %v220_v20 = vld [vmem:[%s691_s20 + $0x170] sm:$0xff]  ;;  %v221_v25 = vld [vmem:[%s691_s20 + $0x178] sm:$0xff] }
  0x30   : > { %528 = vst.msk [vmem:[%s725_s26 + $0x64] sm:$0xf] %vm502_vm0, %v463_v32  ;;  %v469_v48 = vpack.c.bf16 %v405_v41, %v405_v41  ;;  %v277_v49 = vmul.f32 %v685_v0, %v209_v35  ;;  %v278_v50 = vmul.f32 %v685_v0, %v210_v36  ;;  %v279_v51 = vmul.f32 %v685_v0, %v211_v37 }
  0x31   : > { %529 = vst.msk [vmem:[%s725_s26 + $0x68] sm:$0xf] %vm502_vm0, %v464_v33  ;;  %v342_v52 = vadd.f32 %v696_v1, %v274_v44  ;;  %v343_v53 = vadd.f32 %v696_v1, %v275_v45  ;;  %v344_v54 = vadd.f32 %v696_v1, %v276_v46  ;;  %v280_v55 = vmul.f32 %v685_v0, %v212_v42 }
  0x32   : > { %530 = vst.msk [vmem:[%s725_s26 + $0x6c] sm:$0xf] %vm502_vm0, %v465_v38  ;;  %v345_v56 = vadd.f32 %v696_v1, %v277_v49  ;;  %v346_v57 = vadd.f32 %v696_v1, %v278_v50  ;;  %v347_v58 = vadd.f32 %v696_v1, %v279_v51  ;;  %v281_v59 = vmul.f32 %v685_v0, %v213_v47  ;;  %v222_v38 = vld [vmem:[%s691_s20 + $0x180] sm:$0xff] }
  0x33   : > { %531 = vst.msk [vmem:[%s725_s26 + $0x70] sm:$0xf] %vm502_vm0, %v466_v39  ;;  %v406_v61 = vmax.f32 %v342_v52, 0.0  ;;  %v407_v62 = vmax.f32 %v343_v53, 0.0  ;;  %v408_v63 = vmax.f32 %v344_v54, 0.0  ;;  %v348_v2 = vadd.f32 %v696_v1, %v280_v55  ;;  %v225_v53 = vld [vmem:[%s691_s20 + $0x198] sm:$0xff] }
  0x34   : > { %532 = vst.msk [vmem:[%s725_s26 + $0x74] sm:$0xf] %vm502_vm0, %v467_v40  ;;  %v409_v4 = vmax.f32 %v345_v56, 0.0  ;;  %v410_v5 = vmax.f32 %v346_v57, 0.0  ;;  %v411_v6 = vmax.f32 %v347_v58, 0.0  ;;  %v349_v7 = vadd.f32 %v696_v1, %v281_v59  ;;  %v226_v54 = vld [vmem:[%s691_s20 + $0x1a0] sm:$0xff] }
  0x35   : > { %533 = vst.msk [vmem:[%s725_s26 + $0x78] sm:$0xf] %vm502_vm0, %v468_v43  ;;  %v470_v9 = vpack.c.bf16 %v406_v61, %v406_v61  ;;  %v471_v10 = vpack.c.bf16 %v407_v62, %v407_v62  ;;  %v472_v11 = vpack.c.bf16 %v408_v63, %v408_v63  ;;  %v412_v12 = vmax.f32 %v348_v2, 0.0  ;;  %v223_v43 = vld [vmem:[%s691_s20 + $0x188] sm:$0xff] }
  0x36   : > { %534 = vst.msk [vmem:[%s725_s26 + $0x7c] sm:$0xf] %vm502_vm0, %v469_v48  ;;  %v473_v16 = vpack.c.bf16 %v409_v4, %v409_v4  ;;  %v474_v17 = vpack.c.bf16 %v410_v5, %v410_v5  ;;  %v475_v18 = vpack.c.bf16 %v411_v6, %v411_v6  ;;  %v413_v19 = vmax.f32 %v349_v7, 0.0  ;;  %v224_v48 = vld [vmem:[%s691_s20 + $0x190] sm:$0xff]  ;;  %v227_v55 = vld [vmem:[%s691_s20 + $0x1a8] sm:$0xff] }
  0x37   : > { %535 = vst.msk [vmem:[%s725_s26 + $0x80] sm:$0xf] %vm502_vm0, %v470_v9  ;;  %v476_v21 = vpack.c.bf16 %v412_v12, %v412_v12  ;;  %v282_v22 = vmul.f32 %v685_v0, %v214_v60  ;;  %v283_v23 = vmul.f32 %v685_v0, %v215_v3  ;;  %v284_v24 = vmul.f32 %v685_v0, %v216_v8  ;;  %v228_v60 = vld [vmem:[%s691_s20 + $0x1b0] sm:$0xff]  ;;  %v229_v3 = vld [vmem:[%s691_s20 + $0x1b8] sm:$0xff] }
  0x38   : > { %536 = vst.msk [vmem:[%s725_s26 + $0x84] sm:$0xf] %vm502_vm0, %v471_v10  ;;  %v477_v26 = vpack.c.bf16 %v413_v19, %v413_v19  ;;  %v285_v27 = vmul.f32 %v685_v0, %v217_v13  ;;  %v286_v28 = vmul.f32 %v685_v0, %v218_v14  ;;  %v287_v29 = vmul.f32 %v685_v0, %v219_v15 }
  0x39   : > { %537 = vst.msk [vmem:[%s725_s26 + $0x88] sm:$0xf] %vm502_vm0, %v472_v11  ;;  %v350_v30 = vadd.f32 %v696_v1, %v282_v22  ;;  %v351_v31 = vadd.f32 %v696_v1, %v283_v23  ;;  %v352_v32 = vadd.f32 %v696_v1, %v284_v24  ;;  %v288_v33 = vmul.f32 %v685_v0, %v220_v20 }
  0x3a   : > { %538 = vst.msk [vmem:[%s725_s26 + $0x8c] sm:$0xf] %vm502_vm0, %v473_v16  ;;  %v353_v34 = vadd.f32 %v696_v1, %v285_v27  ;;  %v354_v35 = vadd.f32 %v696_v1, %v286_v28  ;;  %v355_v36 = vadd.f32 %v696_v1, %v287_v29  ;;  %v289_v37 = vmul.f32 %v685_v0, %v221_v25  ;;  %v230_v16 = vld [vmem:[%s691_s20 + $0x1c0] sm:$0xff] }
  0x3b   : > { %539 = vst.msk [vmem:[%s725_s26 + $0x90] sm:$0xf] %vm502_vm0, %v474_v17  ;;  %v414_v39 = vmax.f32 %v350_v30, 0.0  ;;  %v415_v40 = vmax.f32 %v351_v31, 0.0  ;;  %v416_v41 = vmax.f32 %v352_v32, 0.0  ;;  %v356_v42 = vadd.f32 %v696_v1, %v288_v33  ;;  %v233_v31 = vld [vmem:[%s691_s20 + $0x1d8] sm:$0xff] }
  0x3c   : > { %540 = vst.msk [vmem:[%s725_s26 + $0x94] sm:$0xf] %vm502_vm0, %v475_v18  ;;  %v417_v44 = vmax.f32 %v353_v34, 0.0  ;;  %v418_v45 = vmax.f32 %v354_v35, 0.0  ;;  %v419_v46 = vmax.f32 %v355_v36, 0.0  ;;  %v357_v47 = vadd.f32 %v696_v1, %v289_v37  ;;  %v234_v32 = vld [vmem:[%s691_s20 + $0x1e0] sm:$0xff] }
  0x3d   : > { %541 = vst.msk [vmem:[%s725_s26 + $0x98] sm:$0xf] %vm502_vm0, %v476_v21  ;;  %v478_v49 = vpack.c.bf16 %v414_v39, %v414_v39  ;;  %v479_v50 = vpack.c.bf16 %v415_v40, %v415_v40  ;;  %v480_v51 = vpack.c.bf16 %v416_v41, %v416_v41  ;;  %v420_v52 = vmax.f32 %v356_v42, 0.0  ;;  %v231_v21 = vld [vmem:[%s691_s20 + $0x1c8] sm:$0xff] }
  0x3e   : > { %542 = vst.msk [vmem:[%s725_s26 + $0x9c] sm:$0xf] %vm502_vm0, %v477_v26  ;;  %v481_v56 = vpack.c.bf16 %v417_v44, %v417_v44  ;;  %v482_v57 = vpack.c.bf16 %v418_v45, %v418_v45  ;;  %v483_v58 = vpack.c.bf16 %v419_v46, %v419_v46  ;;  %v421_v59 = vmax.f32 %v357_v47, 0.0  ;;  %v232_v26 = vld [vmem:[%s691_s20 + $0x1d0] sm:$0xff]  ;;  %v235_v33 = vld [vmem:[%s691_s20 + $0x1e8] sm:$0xff] }
  0x3f   : > { %543 = vst.msk [vmem:[%s725_s26 + $0xa0] sm:$0xf] %vm502_vm0, %v478_v49  ;;  %v484_v61 = vpack.c.bf16 %v420_v52, %v420_v52  ;;  %v290_v62 = vmul.f32 %v685_v0, %v222_v38  ;;  %v291_v63 = vmul.f32 %v685_v0, %v223_v43  ;;  %v292_v2 = vmul.f32 %v685_v0, %v224_v48  ;;  %v236_v38 = vld [vmem:[%s691_s20 + $0x1f0] sm:$0xff]  ;;  %v237_v43 = vld [vmem:[%s691_s20 + $0x1f8] sm:$0xff] }
  0x40   : > { %544 = vst.msk [vmem:[%s725_s26 + $0xa4] sm:$0xf] %vm502_vm0, %v479_v50  ;;  %v485_v4 = vpack.c.bf16 %v421_v59, %v421_v59  ;;  %v293_v5 = vmul.f32 %v685_v0, %v225_v53  ;;  %v294_v6 = vmul.f32 %v685_v0, %v226_v54  ;;  %v295_v7 = vmul.f32 %v685_v0, %v227_v55 }
  0x41   : > { %545 = vst.msk [vmem:[%s725_s26 + $0xa8] sm:$0xf] %vm502_vm0, %v480_v51  ;;  %v358_v8 = vadd.f32 %v696_v1, %v290_v62  ;;  %v359_v9 = vadd.f32 %v696_v1, %v291_v63  ;;  %v360_v10 = vadd.f32 %v696_v1, %v292_v2  ;;  %v296_v11 = vmul.f32 %v685_v0, %v228_v60 }
  0x42   : > { %546 = vst.msk [vmem:[%s725_s26 + $0xac] sm:$0xf] %vm502_vm0, %v481_v56  ;;  %v361_v12 = vadd.f32 %v696_v1, %v293_v5  ;;  %v362_v13 = vadd.f32 %v696_v1, %v294_v6  ;;  %v363_v14 = vadd.f32 %v696_v1, %v295_v7  ;;  %v297_v15 = vmul.f32 %v685_v0, %v229_v3 }
  0x43   : > { %547 = vst.msk [vmem:[%s725_s26 + $0xb0] sm:$0xf] %vm502_vm0, %v482_v57  ;;  %v422_v17 = vmax.f32 %v358_v8, 0.0  ;;  %v423_v18 = vmax.f32 %v359_v9, 0.0  ;;  %v424_v19 = vmax.f32 %v360_v10, 0.0  ;;  %v364_v20 = vadd.f32 %v696_v1, %v296_v11 }
  0x44   : > { %548 = vst.msk [vmem:[%s725_s26 + $0xb4] sm:$0xf] %vm502_vm0, %v483_v58  ;;  %v425_v22 = vmax.f32 %v361_v12, 0.0  ;;  %v426_v23 = vmax.f32 %v362_v13, 0.0  ;;  %v427_v24 = vmax.f32 %v363_v14, 0.0  ;;  %v365_v25 = vadd.f32 %v696_v1, %v297_v15 }
  0x45   : > { %549 = vst.msk [vmem:[%s725_s26 + $0xb8] sm:$0xf] %vm502_vm0, %v484_v61  ;;  %v486_v27 = vpack.c.bf16 %v422_v17, %v422_v17  ;;  %v487_v28 = vpack.c.bf16 %v423_v18, %v423_v18  ;;  %v488_v29 = vpack.c.bf16 %v424_v19, %v424_v19  ;;  %v428_v30 = vmax.f32 %v364_v20, 0.0 }
  0x46   : > { %550 = vst.msk [vmem:[%s725_s26 + $0xbc] sm:$0xf] %vm502_vm0, %v485_v4  ;;  %v489_v34 = vpack.c.bf16 %v425_v22, %v425_v22  ;;  %v490_v35 = vpack.c.bf16 %v426_v23, %v426_v23  ;;  %v491_v36 = vpack.c.bf16 %v427_v24, %v427_v24  ;;  %v429_v37 = vmax.f32 %v365_v25, 0.0 }
  0x47   : > { %551 = vst.msk [vmem:[%s725_s26 + $0xc0] sm:$0xf] %vm502_vm0, %v486_v27  ;;  %v492_v39 = vpack.c.bf16 %v428_v30, %v428_v30  ;;  %v298_v40 = vmul.f32 %v685_v0, %v230_v16  ;;  %v299_v41 = vmul.f32 %v685_v0, %v231_v21  ;;  %v300_v42 = vmul.f32 %v685_v0, %v232_v26 }
  0x48   : > { %552 = vst.msk [vmem:[%s725_s26 + $0xc4] sm:$0xf] %vm502_vm0, %v487_v28  ;;  %v493_v44 = vpack.c.bf16 %v429_v37, %v429_v37  ;;  %v301_v45 = vmul.f32 %v685_v0, %v233_v31  ;;  %v302_v46 = vmul.f32 %v685_v0, %v234_v32  ;;  %v303_v47 = vmul.f32 %v685_v0, %v235_v33 }
  0x49   : > { %553 = vst.msk [vmem:[%s725_s26 + $0xc8] sm:$0xf] %vm502_vm0, %v488_v29  ;;  %v366_v48 = vadd.f32 %v696_v1, %v298_v40  ;;  %v367_v49 = vadd.f32 %v696_v1, %v299_v41  ;;  %v368_v50 = vadd.f32 %v696_v1, %v300_v42  ;;  %v304_v51 = vmul.f32 %v685_v0, %v236_v38 }
  0x4a   : > { %554 = vst.msk [vmem:[%s725_s26 + $0xcc] sm:$0xf] %vm502_vm0, %v489_v34  ;;  %v369_v52 = vadd.f32 %v696_v1, %v301_v45  ;;  %v370_v53 = vadd.f32 %v696_v1, %v302_v46  ;;  %v371_v54 = vadd.f32 %v696_v1, %v303_v47  ;;  %v305_v55 = vmul.f32 %v685_v0, %v237_v43 }
  0x4b   : > { %555 = vst.msk [vmem:[%s725_s26 + $0xd0] sm:$0xf] %vm502_vm0, %v490_v35  ;;  %v430_v56 = vmax.f32 %v366_v48, 0.0  ;;  %v431_v57 = vmax.f32 %v367_v49, 0.0  ;;  %v432_v58 = vmax.f32 %v368_v50, 0.0  ;;  %v372_v59 = vadd.f32 %v696_v1, %v304_v51 }
  0x4c   : > { %556 = vst.msk [vmem:[%s725_s26 + $0xd4] sm:$0xf] %vm502_vm0, %v491_v36  ;;  %v433_v60 = vmax.f32 %v369_v52, 0.0  ;;  %v434_v61 = vmax.f32 %v370_v53, 0.0  ;;  %v435_v62 = vmax.f32 %v371_v54, 0.0  ;;  %v373_v63 = vadd.f32 %v696_v1, %v305_v55 }
  0x4d   : > { %557 = vst.msk [vmem:[%s725_s26 + $0xd8] sm:$0xf] %vm502_vm0, %v492_v39  ;;  %v494_v0 = vpack.c.bf16 %v430_v56, %v430_v56  ;;  %v495_v2 = vpack.c.bf16 %v431_v57, %v431_v57  ;;  %v496_v3 = vpack.c.bf16 %v432_v58, %v432_v58  ;;  %v436_v4 = vmax.f32 %v372_v59, 0.0 }
  0x4e   : > { %558 = vst.msk [vmem:[%s725_s26 + $0xdc] sm:$0xf] %vm502_vm0, %v493_v44  ;;  %v497_v5 = vpack.c.bf16 %v433_v60, %v433_v60  ;;  %v437_v6 = vmax.f32 %v373_v63, 0.0  ;;  %v498_v7 = vpack.c.bf16 %v434_v61, %v434_v61  ;;  %v499_v1 = vpack.c.bf16 %v435_v62, %v435_v62 }
  0x4f   : > { %559 = vst.msk [vmem:[%s725_s26 + $0xe0] sm:$0xf] %vm502_vm0, %v494_v0  ;;  %v500_v8 = vpack.c.bf16 %v436_v4, %v436_v4 }
  0x50   : > { %560 = vst.msk [vmem:[%s725_s26 + $0xe4] sm:$0xf] %vm502_vm0, %v495_v2  ;;  %v501_v9 = vpack.c.bf16 %v437_v6, %v437_v6 }
  0x51   : > { %561 = vst.msk [vmem:[%s725_s26 + $0xe8] sm:$0xf] %vm502_vm0, %v496_v3 }
  0x52   : > { %562 = vst.msk [vmem:[%s725_s26 + $0xec] sm:$0xf] %vm502_vm0, %v497_v5 }
  0x53   : > { %563 = vst.msk [vmem:[%s725_s26 + $0xf0] sm:$0xf] %vm502_vm0, %v498_v7 }
  0x54   : > { %564 = vst.msk [vmem:[%s725_s26 + $0xf4] sm:$0xf] %vm502_vm0, %v499_v1 }
  0x55   : > { %565 = vst.msk [vmem:[%s725_s26 + $0xf8] sm:$0xf] %vm502_vm0, %v500_v8 }
  0x56   : > { %566 = vst.msk [vmem:[%s725_s26 + $0xfc] sm:$0xf] %vm502_vm0, %v501_v9 }
  0x57 PF: > { %s13_s12 = sadd.s32 1, %s650_s12  }
  0x58   : > { %p10_p4 = scmp.ge.s32.totalorder %s13_s12, 18  }
  0x5a   :  { %12 = sbr.rel (!%p10_p4) target bundleno = 1 (0x1), region = 62 }

// kernel: double_conv_forward.6
= control target key start
LH: loop header
LB: loop body
LE: loop exit
PB: predicated region body
PF: predicated region fallthrough
CT: control target
= control target key end

     0   :  { %s2148_s18 = smov 0   ;;  %s2923_s0 = inlined_call_operand.vmem [shape: bf16[8192,216], index: 0, kind: input, shape index: {}]   ;;  %s2924_s1 = inlined_call_operand.vmem [shape: bf16[216,8], index: 1, kind: input, shape index: {}]   ;;  %s2925_s2 = inlined_call_operand.vmem [shape: f32[1,8], index: 2, kind: input, shape index: {}]   ;;  %s2926_s3 = inlined_call_operand.vmem [shape: f32[8192,8], index: 3, kind: output, shape index: {0}]   ;;  %s2927_s4 = inlined_call_operand.vmem [shape: f32[16,1,8], index: 4, kind: output, shape index: {1}]   ;;  %s2928_s5 = inlined_call_operand.vmem [shape: f32[16,1,8], index: 5, kind: output, shape index: {2}]  }
   0x1 LB: > { %s2154_s19 = sadd.s32 4294967295, %s2116_s18   ;;  %p1660_p0 = scmp.ge.s32.totalorder %s2116_s18, 1  ;;  %s2116_s18 = sphi %s2148_s18, %s16_s18  }
   0x2   : > { %p194_p1 = scmp.lt.s32.totalorder %s2116_s18, 17 }
   0x4   : > { %p195_p2 = pnand %p1660_p0, %p194_p1 }
   0x5   : > { %s1661_s26 = sshll.u32 (!%p195_p2), %s2154_s19, 6  ;;  %p242_p4 = scmp.lt.s32.totalorder (!%p195_p2), %s2154_s19, 15 }
   0x6   : > { %198 = sbr.rel (%p195_p2) target bundleno = 510 (0x1fe), region = 32  ;;  %p230_p3 = scmp.lt.s32.totalorder (!%p195_p2), %s1661_s26, 1023 }
   0xb   : > { %v2080_v0 = vld [vmem:[%s2924_s1 + $0x38] sm:$0xff]  ;;  %v339_v1 = vld [vmem:[%s2924_s1 + $0x68] sm:$0xf]  ;;  %vm810_vm0 = vcmask 1043456   ;;  %v2079_v3 = vld [vmem:[%s2924_s1 + $0x30] sm:$0xff]  ;;  %s2930_s26 = smov (!%p230_p3, %s1661_s26), 1023 }
   0xc   : > { %v685_v2 = vunpack.c.l.b16 %v339_v1  ;;  %814 = vmatpush.bf16.msra.mxu0 %v2080_v0  ;;  %2086 = vmatpush.bf16.msra.mxu2 %v2080_v0  ;;  %v2085_v6 = vld [vmem:[%s2924_s1 + $0x60] sm:$0xff]  ;;  %v2078_v7 = vld [vmem:[%s2924_s1 + $0x28] sm:$0xff]  ;;  %v2084_v8 = vld [vmem:[%s2924_s1 + $0x58] sm:$0xff]  ;;  %s2008_s14 = sshll.u32 %s2930_s26, 3  ;;  %vm713_vm1 = vcmask 719872   ;;  %vm1152_vm2 = vcmask 64512  }
   0xd   : > { %v2077_v9 = vld [vmem:[%s2924_s1 + $0x20] sm:$0xff]  ;;  %v2083_v10 = vld [vmem:[%s2924_s1 + $0x50] sm:$0xff]  ;;  %v2076_v11 = vld [vmem:[%s2924_s1 + $0x18] sm:$0xff]  ;;  %s2200_s23 = scalar_lea.vmem %s2923_s0, %s2008_s14  ;;  %s2299_s10 = scalar_lea.vmem %s2926_s3, %s2008_s14  ;;  %vm1350_vm3 = vcmask 57344  }
   0xe   : > { %v699_v4 = vpack.c.b16 %v685_v2, %v685_v2  ;;  %v2082_v12 = vld [vmem:[%s2924_s1 + $0x48] sm:$0xff]  ;;  %v2075_v13 = vld [vmem:[%s2924_s1 + $0x10] sm:$0xff]  ;;  %v2081_v14 = vld [vmem:[%s2924_s1 + $0x40] sm:$0xff]  ;;  %s2932_s19 = smov (!%p242_p4, %s2154_s19), 15 }
   0xf   : > { %v2074_v15 = vld [vmem:[%s2924_s1 + $0x8] sm:$0xff]  ;;  %v2009_v16 = vld [vmem:[%s2200_s23 + $0x4] sm:$0xf]  ;;  %v1668_v20 = vld [vmem:[%s2200_s23] sm:$0xf]  ;;  %s244_s14 = scalar_lea.vmem %s2927_s4, %s2932_s19  ;;  %s247_s17 = scalar_lea.vmem %s2928_s5, %s2932_s19 }
  0x10   : > { %v812_v5 = vsel %vm810_vm0, %v699_v4, 0  ;;  %815 = vmatpush.bf16.msra.mxu0 %v2079_v3  ;;  %2087 = vmatpush.bf16.msra.mxu2 %v2079_v3  ;;  %v1670_v17 = vld [vmem:[%s2200_s23 + $0x8] sm:$0xf0]  ;;  %v2073_v19 = vld [vmem:[%s2924_s1] sm:$0xff]  ;;  %v2010_v21 = vld [vmem:[%s2200_s23 + $0x4] sm:$0xf0] }
  0x11   : > { %985 = vmatpush.bf16.msra.mxu1 %v812_v5  ;;  %2094 = vmatpush.bf16.msra.mxu3 %v812_v5  ;;  %v1673_v18 = vor.u32 %v2009_v16, %v1670_v17  ;;  %v1669_v22 = vor.u32 %v2010_v21, %v1668_v20  ;;  %v2011_v23 = vld [vmem:[%s2200_s23 + $0x14] sm:$0xf]  ;;  %v1678_v24 = vld [vmem:[%s2200_s23 + $0x18] sm:$0xf0]  ;;  %v1676_v26 = vld [vmem:[%s2200_s23 + $0x10] sm:$0xf] }
  0x12   : > { %v1681_v25 = vor.u32 %v2011_v23, %v1678_v24  ;;  %v2012_v27 = vld [vmem:[%s2200_s23 + $0x14] sm:$0xf0]  ;;  %v1796_v29 = vld [vmem:[%s2200_s23 + $0x100] sm:$0xf]  ;;  %v2042_v30 = vld [vmem:[%s2200_s23 + $0x104] sm:$0xf0] }
  0x13   : > { %v1677_v28 = vor.u32 %v2012_v27, %v1676_v26  ;;  %v1797_v31 = vor.u32 %v2042_v30, %v1796_v29  ;;  %v2013_v32 = vld [vmem:[%s2200_s23 + $0x24] sm:$0xf]  ;;  %v1686_v33 = vld [vmem:[%s2200_s23 + $0x28] sm:$0xf0]  ;;  %v1684_v35 = vld [vmem:[%s2200_s23 + $0x20] sm:$0xf] }
  0x14   : > { %816 = vmatpush.bf16.msra.mxu0 %v2078_v7  ;;  %2088 = vmatpush.bf16.msra.mxu2 %v2078_v7  ;;  %v1689_v34 = vor.u32 %v2013_v32, %v1686_v33  ;;  %v2014_v36 = vld [vmem:[%s2200_s23 + $0x24] sm:$0xf0]  ;;  %v1804_v38 = vld [vmem:[%s2200_s23 + $0x110] sm:$0xf]  ;;  %v2044_v39 = vld [vmem:[%s2200_s23 + $0x114] sm:$0xf0] }
  0x15   : > { %986 = vmatpush.bf16.msra.mxu1 %v2085_v6  ;;  %2095 = vmatpush.bf16.msra.mxu3 %v2085_v6  ;;  %v1685_v37 = vor.u32 %v2014_v36, %v1684_v35  ;;  %v2043_v40 = vld [vmem:[%s2200_s23 + $0x114] sm:$0xf]  ;;  %v1805_v41 = vor.u32 %v2044_v39, %v1804_v38  ;;  %v1806_v42 = vld [vmem:[%s2200_s23 + $0x118] sm:$0xf0]  ;;  %v1692_v47 = vld [vmem:[%s2200_s23 + $0x30] sm:$0xf] }
  0x16   : > { %v1809_v43 = vor.u32 %v2043_v40, %v1806_v42  ;;  %v2015_v44 = vld [vmem:[%s2200_s23 + $0x34] sm:$0xf]  ;;  %v1694_v45 = vld [vmem:[%s2200_s23 + $0x38] sm:$0xf0]  ;;  %v2016_v48 = vld [vmem:[%s2200_s23 + $0x34] sm:$0xf0] }
  0x17   : > { %v1697_v46 = vor.u32 %v2015_v44, %v1694_v45  ;;  %v1693_v49 = vor.u32 %v2016_v48, %v1692_v47  ;;  %v1812_v50 = vld [vmem:[%s2200_s23 + $0x120] sm:$0xf]  ;;  %v2046_v51 = vld [vmem:[%s2200_s23 + $0x124] sm:$0xf0]  ;;  %v2045_v52 = vld [vmem:[%s2200_s23 + $0x124] sm:$0xf] }
  0x18   : > { %817 = vmatpush.bf16.msra.mxu0 %v2077_v9  ;;  %2089 = vmatpush.bf16.msra.mxu2 %v2077_v9  ;;  %v1813_v53 = vor.u32 %v2046_v51, %v1812_v50  ;;  %v1814_v54 = vld [vmem:[%s2200_s23 + $0x128] sm:$0xf0]  ;;  %v2017_v56 = vld [vmem:[%s2200_s23 + $0x44] sm:$0xf]  ;;  %v1700_v59 = vld [vmem:[%s2200_s23 + $0x40] sm:$0xf] }
  0x19   : > { %987 = vmatpush.bf16.msra.mxu1 %v2084_v8  ;;  %2096 = vmatpush.bf16.msra.mxu3 %v2084_v8  ;;  %v1817_v55 = vor.u32 %v2045_v52, %v1814_v54  ;;  %v1702_v57 = vld [vmem:[%s2200_s23 + $0x48] sm:$0xf0]  ;;  %v2018_v60 = vld [vmem:[%s2200_s23 + $0x44] sm:$0xf0]  ;;  %v1820_v62 = vld [vmem:[%s2200_s23 + $0x130] sm:$0xf] }
  0x1a   : > { %v1705_v58 = vor.u32 %v2017_v56, %v1702_v57  ;;  %v1701_v61 = vor.u32 %v2018_v60, %v1700_v59  ;;  %v2048_v63 = vld [vmem:[%s2200_s23 + $0x134] sm:$0xf0]  ;;  %v2047_v0 = vld [vmem:[%s2200_s23 + $0x134] sm:$0xf]  ;;  %v1822_v2 = vld [vmem:[%s2200_s23 + $0x138] sm:$0xf0] }
  0x1b   : > { %v1821_v1 = vor.u32 %v2048_v63, %v1820_v62  ;;  %v1825_v3 = vor.u32 %v2047_v0, %v1822_v2  ;;  %v2019_v4 = vld [vmem:[%s2200_s23 + $0x54] sm:$0xf]  ;;  %v1710_v5 = vld [vmem:[%s2200_s23 + $0x58] sm:$0xf0]  ;;  %v1708_v7 = vld [vmem:[%s2200_s23 + $0x50] sm:$0xf] }
  0x1c   : > { %818 = vmatpush.bf16.msra.mxu0 %v2076_v11  ;;  %2090 = vmatpush.bf16.msra.mxu2 %v2076_v11  ;;  %v1713_v6 = vor.u32 %v2019_v4, %v1710_v5  ;;  %v2020_v8 = vld [vmem:[%s2200_s23 + $0x54] sm:$0xf0]  ;;  %v2050_v11 = vld [vmem:[%s2200_s23 + $0x144] sm:$0xf0]  ;;  %v1830_v16 = vld [vmem:[%s2200_s23 + $0x148] sm:$0xf0] }
  0x1d   : > { %988 = vmatpush.bf16.msra.mxu1 %v2083_v10  ;;  %2097 = vmatpush.bf16.msra.mxu3 %v2083_v10  ;;  %v1709_v9 = vor.u32 %v2020_v8, %v1708_v7  ;;  %v1828_v10 = vld [vmem:[%s2200_s23 + $0x140] sm:$0xf]  ;;  %v2022_v20 = vld [vmem:[%s2200_s23 + $0x64] sm:$0xf0]  ;;  %v1726_v23 = vld [vmem:[%s2200_s23 + $0x78] sm:$0xf0] }
  0x1e   : > { %v1836_v24 = vld [vmem:[%s2200_s23 + $0x150] sm:$0xf]  ;;  %v2051_v27 = vld [vmem:[%s2200_s23 + $0x154] sm:$0xf]  ;;  %v2024_v32 = vld [vmem:[%s2200_s23 + $0x74] sm:$0xf0] }
  0x1f   : > { %v1734_v35 = vld [vmem:[%s2200_s23 + $0x88] sm:$0xf0]  ;;  %v1844_v36 = vld [vmem:[%s2200_s23 + $0x160] sm:$0xf]  ;;  %v2053_v39 = vld [vmem:[%s2200_s23 + $0x164] sm:$0xf] }
  0x20   : > { %819 = vmatpush.bf16.msra.mxu0 %v2075_v13  ;;  %2091 = vmatpush.bf16.msra.mxu2 %v2075_v13  ;;  %v2021_v13 = vld [vmem:[%s2200_s23 + $0x64] sm:$0xf]  ;;  %v1846_v40 = vld [vmem:[%s2200_s23 + $0x168] sm:$0xf0]  ;;  %v1732_v44 = vld [vmem:[%s2200_s23 + $0x80] sm:$0xf] }
  0x21   : > { %989 = vmatpush.bf16.msra.mxu1 %v2082_v12  ;;  %2098 = vmatpush.bf16.msra.mxu3 %v2082_v12  ;;  %v1829_v12 = vor.u32 %v2050_v11, %v1828_v10  ;;  %v1849_v42 = vor.u32 %v2053_v39, %v1846_v40  ;;  %v2026_v45 = vld [vmem:[%s2200_s23 + $0x84] sm:$0xf0]  ;;  %v2027_v52 = vld [vmem:[%s2200_s23 + $0x94] sm:$0xf]  ;;  %v1742_v54 = vld [vmem:[%s2200_s23 + $0x98] sm:$0xf0] }
  0x22   : > { %v1733_v47 = vor.u32 %v2026_v45, %v1732_v44  ;;  %v2056_v56 = vld [vmem:[%s2200_s23 + $0x174] sm:$0xf0]  ;;  %v2055_v59 = vld [vmem:[%s2200_s23 + $0x174] sm:$0xf]  ;;  %v1854_v60 = vld [vmem:[%s2200_s23 + $0x178] sm:$0xf0]  ;;  %v1745_v63 = vor.u32 %v2027_v52, %v1742_v54 }
  0x23   : > { %v1857_v0 = vor.u32 %v2055_v59, %v1854_v60  ;;  %v1740_v2 = vld [vmem:[%s2200_s23 + $0x90] sm:$0xf] }
  0x24   : > { %820 = vmatpush.bf16.msra.mxu0 %v2074_v15  ;;  %2092 = vmatpush.bf16.msra.mxu2 %v2074_v15  ;;  %v2049_v15 = vld [vmem:[%s2200_s23 + $0x144] sm:$0xf] }
  0x25   : > { %990 = vmatpush.bf16.msra.mxu1 %v2081_v14  ;;  %2099 = vmatpush.bf16.msra.mxu3 %v2081_v14  ;;  %v1718_v14 = vld [vmem:[%s2200_s23 + $0x68] sm:$0xf0] }
  0x26   : > { %v1721_v17 = vor.u32 %v2021_v13, %v1718_v14 }
  0x28   : > { %1974 = vmatmul.msk.bf16.vlgmr.msra.gmra.mxu1 %vm713_vm1, %v1673_v18  ;;  %821 = vmatpush.bf16.msra.mxu0 %v2073_v19  ;;  %v1833_v18 = vor.u32 %v2049_v15, %v1830_v16 }
  0x29   : > { %2093 = vmatpush.bf16.msra.mxu2 %v2073_v19  ;;  %1991 = vmatmul.msk.bf16.vlgmr.msra.gmra.mxu3 %vm713_vm1, %v1809_v43  ;;  %v1716_v19 = vld [vmem:[%s2200_s23 + $0x60] sm:$0xf] }
  0x2a   : > { %v1717_v21 = vor.u32 %v2022_v20, %v1716_v19  ;;  %v2029_v20 = vld [vmem:[%s2200_s23 + $0xa4] sm:$0xf] }
  0x2b   : > { %822 = vmatmul.bf16.vlgmr.msra.gmra.mxu0 %v1669_v22  ;;  %v2023_v22 = vld [vmem:[%s2200_s23 + $0x74] sm:$0xf] }
  0x2c   : > { %902 = vmatmul.bf16.vlgmr.msra.gmra.mxu2 %v1797_v31  ;;  %v1729_v29 = vor.u32 %v2023_v22, %v1726_v23  ;;  %v1724_v31 = vld [vmem:[%s2200_s23 + $0x70] sm:$0xf]  ;;  %v1750_v23 = vld [vmem:[%s2200_s23 + $0xa8] sm:$0xf0] }
  0x2d   : > { %v1725_v33 = vor.u32 %v2024_v32, %v1724_v31  ;;  %v1753_v31 = vor.u32 %v2029_v20, %v1750_v23 }
  0x38   : > { %1975 = vmatmul.msk.bf16.gmra.mxu1 %vm713_vm1, %v1681_v25  ;;  %v2052_v25 = vld [vmem:[%s2200_s23 + $0x154] sm:$0xf0] }
  0x39   : > { %1992 = vmatmul.msk.bf16.gmra.mxu3 %vm713_vm1, %v1817_v55  ;;  %v1837_v26 = vor.u32 %v2052_v25, %v1836_v24  ;;  %v1852_v55 = vld [vmem:[%s2200_s23 + $0x170] sm:$0xf]  ;;  %v1860_v24 = vld [vmem:[%s2200_s23 + $0x180] sm:$0xf]  ;;  %v2058_v25 = vld [vmem:[%s2200_s23 + $0x184] sm:$0xf0] }
  0x3b   : > { %827 = vmatmul.bf16.gmra.mxu0 %v1677_v28  ;;  %v1838_v28 = vld [vmem:[%s2200_s23 + $0x158] sm:$0xf0] }
  0x3c   : > { %907 = vmatmul.bf16.gmra.mxu2 %v1805_v41  ;;  %v1841_v30 = vor.u32 %v2051_v27, %v1838_v28  ;;  %v1861_v27 = vor.u32 %v2058_v25, %v1860_v24  ;;  %v2057_v28 = vld [vmem:[%s2200_s23 + $0x184] sm:$0xf] }
  0x3d   : > { %v2033_v24 = vld [vmem:[%s2200_s23 + $0xc4] sm:$0xf] }
  0x48   : > { %1976 = vmatmul.msk.bf16.gmra.mxu1 %vm713_vm1, %v1689_v34  ;;  %v2025_v34 = vld [vmem:[%s2200_s23 + $0x84] sm:$0xf] }
  0x49   : > { %1993 = vmatmul.msk.bf16.gmra.mxu3 %vm713_vm1, %v1825_v3  ;;  %v1737_v41 = vor.u32 %v2025_v34, %v1734_v35  ;;  %v2028_v3 = vld [vmem:[%s2200_s23 + $0x94] sm:$0xf0]  ;;  %v1748_v34 = vld [vmem:[%s2200_s23 + $0xa0] sm:$0xf]  ;;  %v2030_v35 = vld [vmem:[%s2200_s23 + $0xa4] sm:$0xf0] }
  0x4a   : > { %v1741_v10 = vor.u32 %v2028_v3, %v1740_v2  ;;  %v1756_v3 = vld [vmem:[%s2200_s23 + $0xb0] sm:$0xf] }
  0x4b   : > { %832 = vmatmul.bf16.gmra.mxu0 %v1685_v37  ;;  %v2054_v37 = vld [vmem:[%s2200_s23 + $0x164] sm:$0xf0] }
  0x4c   : > { %912 = vmatmul.bf16.gmra.mxu2 %v1813_v53  ;;  %v1845_v38 = vor.u32 %v2054_v37, %v1844_v36 }
  0x58   : > { %1977 = vmatmul.msk.bf16.gmra.mxu1 %vm713_vm1, %v1697_v46  ;;  %v2289_v46 = vld [vmem:[%s2925_s2] ss:$0 sm:$0xff] }
  0x59   : > { %1994 = vmatmul.msk.bf16.gmra.mxu3 %vm713_vm1, %v1833_v18 }
  0x5b   : > { %837 = vmatmul.bf16.gmra.mxu0 %v1693_v49 }
  0x5c   : > { %917 = vmatmul.bf16.gmra.mxu2 %v1821_v1 }
  0x68   : > { %1978 = vmatmul.msk.bf16.gmra.mxu1 %vm713_vm1, %v1705_v58  ;;  %v1853_v58 = vor.u32 %v2056_v56, %v1852_v55  ;;  %v1758_v56 = vld [vmem:[%s2200_s23 + $0xb8] sm:$0xf0] }
  0x69   : > { %1995 = vmatmul.msk.bf16.gmra.mxu3 %vm713_vm1, %v1841_v30 }
  0x6b   : > { %842 = vmatmul.bf16.gmra.mxu0 %v1701_v61 }
  0x6c   : > { %922 = vmatmul.bf16.gmra.mxu2 %v1829_v12 }
  0x78   : > { %1979 = vmatmul.msk.bf16.gmra.mxu1 %vm713_vm1, %v1713_v6 }
  0x79   : > { %1996 = vmatmul.msk.bf16.gmra.mxu3 %vm713_vm1, %v1849_v42 }
  0x7b   : > { %847 = vmatmul.bf16.gmra.mxu0 %v1709_v9 }
  0x7c   : > { %927 = vmatmul.bf16.gmra.mxu2 %v1837_v26 }
  0x88   : > { %1980 = vmatmul.msk.bf16.gmra.mxu1 %vm713_vm1, %v1721_v17 }
  0x89   : > { %1997 = vmatmul.msk.bf16.gmra.mxu3 %vm713_vm1, %v1857_v0 }
  0x8b   : > { %852 = vmatmul.bf16.gmra.mxu0 %v1717_v21 }
  0x8c   : > { %932 = vmatmul.bf16.gmra.mxu2 %v1845_v38 }
  0x98   : > { %1981 = vmatmul.msk.bf16.gmra.mxu1 %vm713_vm1, %v1729_v29  ;;  %v1862_v29 = vld [vmem:[%s2200_s23 + $0x188] sm:$0xf0] }
  0x99   : > { %v1865_v32 = vor.u32 %v2057_v28, %v1862_v29  ;;  %v1766_v28 = vld [vmem:[%s2200_s23 + $0xc8] sm:$0xf0] }
  0x9b   : > { %857 = vmatmul.bf16.gmra.mxu0 %v1725_v33  ;;  %1998 = vmatmul.msk.bf16.gmra.mxu3 %vm713_vm1, %v1865_v32 }
  0x9c   : > { %937 = vmatmul.bf16.gmra.mxu2 %v1853_v58  ;;  %v2060_v58 = vld [vmem:[%s2200_s23 + $0x194] sm:$0xf0] }
  0xa5   : > { %v992_v43 = vpop.f32.mrf.mxu1 }
  0xa8   : > { %1982 = vmatmul.msk.bf16.gmra.mxu1 %vm713_vm1, %v1737_v41  ;;  %v823_v48 = vpop.f32.mrf.mxu0  ;;  %v1749_v41 = vor.u32 %v2030_v35, %v1748_v34  ;;  %v2061_v35 = vld [vmem:[%s2200_s23 + $0x1a4] sm:$0xf] }
  0xa9   : > { %v824_v49 = vadd.f32 %v2289_v46, %v823_v48 }
  0xab   : > { %v993_v50 = vadd.f32 %v992_v43, %v824_v49  ;;  %862 = vmatmul.bf16.gmra.mxu0 %v1733_v47 }
  0xac   : > { %942 = vmatmul.bf16.gmra.mxu2 %v1861_v27 }
  0xad   : > { %v994_v51 = vpop.f32.mrf.mxu1  ;;  %1153 = vst.msk [vmem:[%s2299_s10] sm:$0xff] %vm1152_vm2, %v993_v50  ;;  %v1352_v61 = vmul.f32 %v993_v50, %v993_v50  ;;  %v1217_v4 = vsel %vm1152_vm2, %v993_v50, 0.0 }
  0xaf   : > { %v1416_v8 = vsel %vm1152_vm2, %v1352_v61, 0.0  ;;  %v2338_v39 = vpop.f32.mrf.mxu2  ;;  %v2059_v61 = vld [vmem:[%s2200_s23 + $0x194] sm:$0xf] }
  0xb0   : > { %v825_v53 = vpop.f32.mrf.mxu0 }
  0xb1   : > { %v826_v57 = vadd.f32 %v2289_v46, %v825_v53  ;;  %v2031_v53 = vld [vmem:[%s2200_s23 + $0xb4] sm:$0xf] }
  0xb2   : > { %v1761_v0 = vor.u32 %v2031_v53, %v1758_v56 }
  0xb3   : > { %v995_v62 = vadd.f32 %v994_v51, %v826_v57  ;;  %v1868_v57 = vld [vmem:[%s2200_s23 + $0x190] sm:$0xf] }
  0xb4   : > { %v1869_v60 = vor.u32 %v2060_v58, %v1868_v57 }
  0xb5   : > { %v997_v1 = vpop.f32.mrf.mxu1  ;;  %1154 = vst.msk [vmem:[%s2299_s10 + $0x8] sm:$0xff] %vm1152_vm2, %v995_v62  ;;  %v1218_v5 = vsel %vm1152_vm2, %v995_v62, 0.0  ;;  %v1353_v6 = vmul.f32 %v995_v62, %v995_v62  ;;  %v1870_v62 = vld [vmem:[%s2200_s23 + $0x198] sm:$0xf0] }
  0xb6   : > { %v1219_v7 = vadd.f32 %v1218_v5, %v1217_v4  ;;  %v2032_v4 = vld [vmem:[%s2200_s23 + $0xb4] sm:$0xf0] }
  0xb7   : > { %v1417_v9 = vsel %vm1152_vm2, %v1353_v6, 0.0  ;;  %v2346_v51 = vpop.f32.mrf.mxu2 }
  0xb8   : > { %1983 = vmatmul.msk.bf16.gmra.mxu1 %vm713_vm1, %v1745_v63  ;;  %v1418_v11 = vadd.f32 %v1417_v9, %v1416_v8  ;;  %v828_v12 = vpop.f32.mrf.mxu0 }
  0xb9   : > { %v829_v13 = vadd.f32 %v2289_v46, %v828_v12 }
  0xbb   : > { %v998_v14 = vadd.f32 %v997_v1, %v829_v13  ;;  %867 = vmatmul.bf16.gmra.mxu0 %v1741_v10  ;;  %v1873_v1 = vor.u32 %v2059_v61, %v1870_v62  ;;  %v1757_v10 = vor.u32 %v2032_v4, %v1756_v3 }
  0xbc   : > { %947 = vmatmul.bf16.gmra.mxu2 %v1869_v60 }
  0xbd   : > { %v999_v15 = vpop.f32.mrf.mxu1  ;;  %1155 = vst.msk [vmem:[%s2299_s10 + $0x10] sm:$0xff] %vm1152_vm2, %v998_v14  ;;  %v1220_v16 = vsel %vm1152_vm2, %v998_v14, 0.0  ;;  %v1354_v17 = vmul.f32 %v998_v14, %v998_v14  ;;  %1999 = vmatmul.msk.bf16.gmra.mxu3 %vm713_vm1, %v1873_v1  ;;  %v1077_v14 = vpop.f32.mrf.mxu3  ;;  %v2035_v1 = vld [vmem:[%s2200_s23 + $0xd4] sm:$0xf] }
  0xbe   : > { %v1221_v18 = vadd.f32 %v1220_v16, %v1219_v7 }
  0xbf   : > { %v1419_v19 = vsel %vm1152_vm2, %v1354_v17, 0.0  ;;  %v908_v8 = vpop.f32.mrf.mxu2 }
  0xc0   : > { %v1420_v21 = vadd.f32 %v1419_v19, %v1418_v11  ;;  %v830_v22 = vpop.f32.mrf.mxu0  ;;  %v909_v13 = vadd.f32 %v2289_v46, %v908_v8  ;;  %v2064_v8 = vld [vmem:[%s2200_s23 + $0x1b4] sm:$0xf0] }
  0xc1   : > { %v831_v26 = vadd.f32 %v2289_v46, %v830_v22 }
  0xc2   : > { %v2366_v16 = vadd.f32 %v1077_v14, %v909_v13  ;;  %v1886_v13 = vld [vmem:[%s2200_s23 + $0x1b8] sm:$0xf0] }
  0xc3   : > { %v1000_v30 = vadd.f32 %v999_v15, %v831_v26 }
  0xc4   : > { %1187 = vst.msk [vmem:[%s2299_s10 + $0x110] sm:$0xff] %vm1152_vm2, %v2366_v16 }
  0xc5   : > { %v1002_v33 = vpop.f32.mrf.mxu1  ;;  %1156 = vst.msk [vmem:[%s2299_s10 + $0x18] sm:$0xff] %vm1152_vm2, %v1000_v30  ;;  %v1222_v36 = vsel %vm1152_vm2, %v1000_v30, 0.0  ;;  %v1355_v37 = vmul.f32 %v1000_v30, %v1000_v30  ;;  %v1079_v29 = vpop.f32.mrf.mxu3  ;;  %v1876_v30 = vld [vmem:[%s2200_s23 + $0x1a0] sm:$0xf] }
  0xc6   : > { %v1223_v38 = vadd.f32 %v1222_v36, %v1221_v18  ;;  %v1878_v36 = vld [vmem:[%s2200_s23 + $0x1a8] sm:$0xf0] }
  0xc7   : > { %v1421_v40 = vsel %vm1152_vm2, %v1355_v37, 0.0  ;;  %v910_v22 = vpop.f32.mrf.mxu2 }
  0xc8   : > { %1984 = vmatmul.msk.bf16.gmra.mxu1 %vm713_vm1, %v1753_v31  ;;  %v1422_v42 = vadd.f32 %v1421_v40, %v1420_v21  ;;  %v833_v43 = vpop.f32.mrf.mxu0  ;;  %v911_v25 = vadd.f32 %v2289_v46, %v910_v22  ;;  %v2062_v31 = vld [vmem:[%s2200_s23 + $0x1a4] sm:$0xf0]  ;;  %v1881_v40 = vor.u32 %v2061_v35, %v1878_v36 }
  0xc9   : > { %v834_v44 = vadd.f32 %v2289_v46, %v833_v43  ;;  %v1877_v34 = vor.u32 %v2062_v31, %v1876_v30  ;;  %v2034_v43 = vld [vmem:[%s2200_s23 + $0xc4] sm:$0xf0] }
  0xcb   : > { %v1003_v45 = vadd.f32 %v1002_v33, %v834_v44  ;;  %872 = vmatmul.bf16.gmra.mxu0 %v1749_v41  ;;  %v2381_v33 = vadd.f32 %v1079_v29, %v911_v25 }
  0xcc   : > { %952 = vmatmul.bf16.gmra.mxu2 %v1877_v34 }
  0xcd   : > { %v1004_v47 = vpop.f32.mrf.mxu1  ;;  %1157 = vst.msk [vmem:[%s2299_s10 + $0x20] sm:$0xff] %vm1152_vm2, %v1003_v45  ;;  %v1224_v48 = vsel %vm1152_vm2, %v1003_v45, 0.0  ;;  %v1356_v49 = vmul.f32 %v1003_v45, %v1003_v45  ;;  %2000 = vmatmul.msk.bf16.gmra.mxu3 %vm713_vm1, %v1881_v40 }
  0xce   : > { %v1225_v50 = vadd.f32 %v1224_v48, %v1223_v38  ;;  %v1769_v38 = vor.u32 %v2033_v24, %v1766_v28  ;;  %1188 = vst.msk [vmem:[%s2299_s10 + $0x118] sm:$0xff] %vm1152_vm2, %v2381_v33 }
  0xcf   : > { %v1423_v52 = vsel %vm1152_vm2, %v1356_v49, 0.0  ;;  %v913_v48 = vpop.f32.mrf.mxu2 }
  0xd0   : > { %v1424_v54 = vadd.f32 %v1423_v52, %v1422_v42  ;;  %v835_v55 = vpop.f32.mrf.mxu0  ;;  %v1764_v42 = vld [vmem:[%s2200_s23 + $0xc0] sm:$0xf] }
  0xd1   : > { %v836_v59 = vadd.f32 %v2289_v46, %v835_v55  ;;  %v1082_v55 = vpop.f32.mrf.mxu3 }
  0xd3   : > { %v1005_v63 = vadd.f32 %v1004_v47, %v836_v59 }
  0xd5   : > { %v1007_v2 = vpop.f32.mrf.mxu1  ;;  %1158 = vst.msk [vmem:[%s2299_s10 + $0x28] sm:$0xff] %vm1152_vm2, %v1005_v63  ;;  %v1226_v5 = vsel %vm1152_vm2, %v1005_v63, 0.0  ;;  %v1357_v6 = vmul.f32 %v1005_v63, %v1005_v63 }
  0xd6   : > { %v1227_v7 = vadd.f32 %v1226_v5, %v1225_v50  ;;  %v1765_v50 = vor.u32 %v2034_v43, %v1764_v42  ;;  %v1774_v5 = vld [vmem:[%s2200_s23 + $0xd8] sm:$0xf0]  ;;  %v2037_v42 = vld [vmem:[%s2200_s23 + $0xe4] sm:$0xf] }
  0xd7   : > { %v1425_v9 = vsel %vm1152_vm2, %v1357_v6, 0.0  ;;  %v915_v63 = vpop.f32.mrf.mxu2 }
  0xd8   : > { %1985 = vmatmul.msk.bf16.gmra.mxu1 %vm713_vm1, %v1761_v0  ;;  %v1426_v11 = vadd.f32 %v1425_v9, %v1424_v54  ;;  %v838_v12 = vpop.f32.mrf.mxu0  ;;  %v914_v54 = vadd.f32 %v2289_v46, %v913_v48 }
  0xd9   : > { %v839_v15 = vadd.f32 %v2289_v46, %v838_v12  ;;  %v1084_v6 = vpop.f32.mrf.mxu3  ;;  %v2063_v12 = vld [vmem:[%s2200_s23 + $0x1b4] sm:$0xf] }
  0xda   : > { %v2398_v57 = vadd.f32 %v1082_v55, %v914_v54  ;;  %v2065_v55 = vld [vmem:[%s2200_s23 + $0x1c4] sm:$0xf] }
  0xdb   : > { %v1008_v17 = vadd.f32 %v1007_v2, %v839_v15  ;;  %877 = vmatmul.bf16.gmra.mxu0 %v1757_v10  ;;  %v916_v2 = vadd.f32 %v2289_v46, %v915_v63  ;;  %v1777_v15 = vor.u32 %v2035_v1, %v1774_v5  ;;  %v2038_v63 = vld [vmem:[%s2200_s23 + $0xe4] sm:$0xf0] }
  0xdc   : > { %1189 = vst.msk [vmem:[%s2299_s10 + $0x120] sm:$0xff] %vm1152_vm2, %v2398_v57 }
  0xdd   : > { %v1009_v18 = vpop.f32.mrf.mxu1  ;;  %1159 = vst.msk [vmem:[%s2299_s10 + $0x30] sm:$0xff] %vm1152_vm2, %v1008_v17  ;;  %v1228_v19 = vsel %vm1152_vm2, %v1008_v17, 0.0  ;;  %v1358_v20 = vmul.f32 %v1008_v17, %v1008_v17  ;;  %v2413_v10 = vadd.f32 %v1084_v6, %v916_v2  ;;  %v1889_v17 = vor.u32 %v2063_v12, %v1886_v13 }
  0xde   : > { %v1229_v21 = vadd.f32 %v1228_v19, %v1227_v7  ;;  %v1884_v7 = vld [vmem:[%s2200_s23 + $0x1b0] sm:$0xf] }
  0xdf   : > { %v1427_v23 = vsel %vm1152_vm2, %v1358_v20, 0.0  ;;  %1190 = vst.msk [vmem:[%s2299_s10 + $0x128] sm:$0xff] %vm1152_vm2, %v2413_v10  ;;  %v1772_v19 = vld [vmem:[%s2200_s23 + $0xd0] sm:$0xf]  ;;  %v2036_v20 = vld [vmem:[%s2200_s23 + $0xd4] sm:$0xf0]  ;;  %2001 = vmatmul.msk.bf16.gmra.mxu3 %vm713_vm1, %v1889_v17  ;;  %v918_v24 = vpop.f32.mrf.mxu2 }
  0xe0   : > { %v1428_v26 = vadd.f32 %v1427_v23, %v1426_v11  ;;  %v840_v27 = vpop.f32.mrf.mxu0  ;;  %v1885_v11 = vor.u32 %v2064_v8, %v1884_v7  ;;  %v919_v29 = vadd.f32 %v2289_v46, %v918_v24 }
  0xe1   : > { %v841_v32 = vadd.f32 %v2289_v46, %v840_v27  ;;  %v1087_v30 = vpop.f32.mrf.mxu3 }
  0xe2   : > { %957 = vmatmul.bf16.gmra.mxu2 %v1885_v11 }
  0xe3   : > { %v1010_v37 = vadd.f32 %v1009_v18, %v841_v32  ;;  %v2430_v32 = vadd.f32 %v1087_v30, %v919_v29 }
  0xe5   : > { %v1012_v41 = vpop.f32.mrf.mxu1  ;;  %1160 = vst.msk [vmem:[%s2299_s10 + $0x38] sm:$0xff] %vm1152_vm2, %v1010_v37  ;;  %v1230_v44 = vsel %vm1152_vm2, %v1010_v37, 0.0  ;;  %v1359_v45 = vmul.f32 %v1010_v37, %v1010_v37 }
  0xe6   : > { %v1231_v47 = vadd.f32 %v1230_v44, %v1229_v21  ;;  %1191 = vst.msk [vmem:[%s2299_s10 + $0x130] sm:$0xff] %vm1152_vm2, %v2430_v32 }
  0xe7   : > { %v1429_v49 = vsel %vm1152_vm2, %v1359_v45, 0.0  ;;  %v920_v40 = vpop.f32.mrf.mxu2 }
  0xe8   : > { %1986 = vmatmul.msk.bf16.gmra.mxu1 %vm713_vm1, %v1769_v38  ;;  %v1430_v52 = vadd.f32 %v1429_v49, %v1428_v26  ;;  %v843_v53 = vpop.f32.mrf.mxu0  ;;  %v1773_v26 = vor.u32 %v2036_v20, %v1772_v19  ;;  %v921_v43 = vadd.f32 %v2289_v46, %v920_v40  ;;  %v1892_v49 = vld [vmem:[%s2200_s23 + $0x1c0] sm:$0xf] }
  0xe9   : > { %v844_v56 = vadd.f32 %v2289_v46, %v843_v53  ;;  %v1089_v48 = vpop.f32.mrf.mxu3 }
  0xea   : > { %v2445_v53 = vadd.f32 %v1089_v48, %v921_v43 }
  0xeb   : > { %v1013_v58 = vadd.f32 %v1012_v41, %v844_v56  ;;  %882 = vmatmul.bf16.gmra.mxu0 %v1765_v50  ;;  %v2066_v50 = vld [vmem:[%s2200_s23 + $0x1c4] sm:$0xf0]  ;;  %v1894_v56 = vld [vmem:[%s2200_s23 + $0x1c8] sm:$0xf0] }
  0xec   : > { %v1893_v54 = vor.u32 %v2066_v50, %v1892_v49  ;;  %1192 = vst.msk [vmem:[%s2299_s10 + $0x138] sm:$0xff] %vm1152_vm2, %v2445_v53 }
  0xed   : > { %v1014_v59 = vpop.f32.mrf.mxu1  ;;  %1161 = vst.msk [vmem:[%s2299_s10 + $0x40] sm:$0xff] %vm1152_vm2, %v1013_v58  ;;  %v1232_v60 = vsel %vm1152_vm2, %v1013_v58, 0.0  ;;  %v1360_v61 = vmul.f32 %v1013_v58, %v1013_v58 }
  0xee   : > { %v1233_v62 = vadd.f32 %v1232_v60, %v1231_v47  ;;  %v1782_v47 = vld [vmem:[%s2200_s23 + $0xe8] sm:$0xf0]  ;;  %v1897_v60 = vor.u32 %v2065_v55, %v1894_v56 }
  0xef   : > { %v1431_v0 = vsel %vm1152_vm2, %v1360_v61, 0.0 }
  0xf0   : > { %v1432_v3 = vadd.f32 %v1431_v0, %v1430_v52  ;;  %v845_v4 = vpop.f32.mrf.mxu0  ;;  %2002 = vmatmul.msk.bf16.gmra.mxu3 %vm713_vm1, %v1897_v60 }
  0xf1   : > { %v846_v9 = vadd.f32 %v2289_v46, %v845_v4 }
  0xf2   : > { %962 = vmatmul.bf16.gmra.mxu2 %v1893_v54 }
  0xf3   : > { %v1015_v14 = vadd.f32 %v1014_v59, %v846_v9  ;;  %v1785_v59 = vor.u32 %v2037_v42, %v1782_v47  ;;  %v1092_v9 = vpop.f32.mrf.mxu3  ;;  %v2040_v42 = vld [vmem:[%s2200_s23 + $0xf4] sm:$0xf0] }
  0xf5   : > { %v1017_v18 = vpop.f32.mrf.mxu1  ;;  %1162 = vst.msk [vmem:[%s2299_s10 + $0x48] sm:$0xff] %vm1152_vm2, %v1015_v14  ;;  %v1234_v21 = vsel %vm1152_vm2, %v1015_v14, 0.0  ;;  %v1361_v22 = vmul.f32 %v1015_v14, %v1015_v14 }
  0xf6   : > { %v1235_v23 = vadd.f32 %v1234_v21, %v1233_v62  ;;  %v1780_v62 = vld [vmem:[%s2200_s23 + $0xe0] sm:$0xf]  ;;  %v2039_v21 = vld [vmem:[%s2200_s23 + $0xf4] sm:$0xf] }
  0xf7   : > { %v1433_v25 = vsel %vm1152_vm2, %v1361_v22, 0.0  ;;  %v1781_v5 = vor.u32 %v2038_v63, %v1780_v62 }
  0xf8   : > { %1987 = vmatmul.msk.bf16.gmra.mxu1 %vm713_vm1, %v1777_v15  ;;  %v1434_v27 = vadd.f32 %v1433_v25, %v1432_v3  ;;  %v848_v28 = vpop.f32.mrf.mxu0  ;;  %v923_v3 = vpop.f32.mrf.mxu2  ;;  %v1790_v25 = vld [vmem:[%s2200_s23 + $0xf8] sm:$0xf0] }
  0xf9   : > { %v849_v31 = vadd.f32 %v2289_v46, %v848_v28  ;;  %v924_v8 = vadd.f32 %v2289_v46, %v923_v3  ;;  %v2068_v28 = vld [vmem:[%s2200_s23 + $0x1d4] sm:$0xf0] }
  0xfb   : > { %v1018_v34 = vadd.f32 %v1017_v18, %v849_v31  ;;  %887 = vmatmul.bf16.gmra.mxu0 %v1773_v26  ;;  %v2462_v12 = vadd.f32 %v1092_v9, %v924_v8  ;;  %v1094_v26 = vpop.f32.mrf.mxu3  ;;  %v1908_v8 = vld [vmem:[%s2200_s23 + $0x1e0] sm:$0xf]  ;;  %v2070_v9 = vld [vmem:[%s2200_s23 + $0x1e4] sm:$0xf0] }
  0xfd   : > { %v1019_v35 = vpop.f32.mrf.mxu1  ;;  %1163 = vst.msk [vmem:[%s2299_s10 + $0x50] sm:$0xff] %vm1152_vm2, %v1018_v34  ;;  %v1236_v36 = vsel %vm1152_vm2, %v1018_v34, 0.0  ;;  %v1362_v37 = vmul.f32 %v1018_v34, %v1018_v34  ;;  %v2067_v34 = vld [vmem:[%s2200_s23 + $0x1d4] sm:$0xf] }
  0xfe   : > { %v1237_v38 = vadd.f32 %v1236_v36, %v1235_v23  ;;  %1193 = vst.msk [vmem:[%s2299_s10 + $0x140] sm:$0xff] %vm1152_vm2, %v2462_v12 }
  0xff   : > { %v1435_v41 = vsel %vm1152_vm2, %v1362_v37, 0.0  ;;  %v1793_v37 = vor.u32 %v2039_v21, %v1790_v25 }
 0x100   : > { %v1436_v44 = vadd.f32 %v1435_v41, %v1434_v27  ;;  %v850_v45 = vpop.f32.mrf.mxu0  ;;  %v925_v19 = vpop.f32.mrf.mxu2  ;;  %v1900_v27 = vld [vmem:[%s2200_s23 + $0x1d0] sm:$0xf] }
 0x101   : > { %v851_v52 = vadd.f32 %v2289_v46, %v850_v45  ;;  %v926_v22 = vadd.f32 %v2289_v46, %v925_v19  ;;  %v1901_v31 = vor.u32 %v2068_v28, %v1900_v27  ;;  %v1788_v41 = vld [vmem:[%s2200_s23 + $0xf0] sm:$0xf] }
 0x102   : > { %v1789_v49 = vor.u32 %v2040_v42, %v1788_v41 }
 0x103   : > { %v1020_v58 = vadd.f32 %v1019_v35, %v851_v52  ;;  %v2477_v30 = vadd.f32 %v1094_v26, %v926_v22  ;;  %v1902_v35 = vld [vmem:[%s2200_s23 + $0x1d8] sm:$0xf0]  ;;  %967 = vmatmul.bf16.gmra.mxu2 %v1901_v31  ;;  %v1097_v55 = vpop.f32.mrf.mxu3 }
 0x105   : > { %v1022_v61 = vpop.f32.mrf.mxu1  ;;  %1164 = vst.msk [vmem:[%s2299_s10 + $0x58] sm:$0xff] %vm1152_vm2, %v1020_v58  ;;  %v1238_v0 = vsel %vm1152_vm2, %v1020_v58, 0.0  ;;  %v1363_v1 = vmul.f32 %v1020_v58, %v1020_v58 }
 0x106   : > { %v1239_v2 = vadd.f32 %v1238_v0, %v1237_v38  ;;  %1194 = vst.msk [vmem:[%s2299_s10 + $0x148] sm:$0xff] %vm1152_vm2, %v2477_v30  ;;  %v1905_v38 = vor.u32 %v2067_v34, %v1902_v35 }
 0x107   : > { %v1437_v4 = vsel %vm1152_vm2, %v1363_v1, 0.0 }
 0x108   : > { %1988 = vmatmul.msk.bf16.gmra.mxu1 %vm713_vm1, %v1785_v59  ;;  %v1438_v6 = vadd.f32 %v1437_v4, %v1436_v44  ;;  %v853_v7 = vpop.f32.mrf.mxu0  ;;  %2003 = vmatmul.msk.bf16.gmra.mxu3 %vm713_vm1, %v1905_v38  ;;  %v928_v47 = vpop.f32.mrf.mxu2 }
 0x109   : > { %v854_v11 = vadd.f32 %v2289_v46, %v853_v7  ;;  %v929_v54 = vadd.f32 %v2289_v46, %v928_v47 }
 0x10b   : > { %v1023_v13 = vadd.f32 %v1022_v61, %v854_v11  ;;  %892 = vmatmul.bf16.gmra.mxu0 %v1781_v5  ;;  %v2494_v58 = vadd.f32 %v1097_v55, %v929_v54  ;;  %v1099_v7 = vpop.f32.mrf.mxu3 }
 0x10d   : > { %v1024_v14 = vpop.f32.mrf.mxu1  ;;  %1165 = vst.msk [vmem:[%s2299_s10 + $0x60] sm:$0xff] %vm1152_vm2, %v1023_v13  ;;  %v1240_v15 = vsel %vm1152_vm2, %v1023_v13, 0.0  ;;  %v1364_v17 = vmul.f32 %v1023_v13, %v1023_v13 }
 0x10e   : > { %v1241_v18 = vadd.f32 %v1240_v15, %v1239_v2  ;;  %1195 = vst.msk [vmem:[%s2299_s10 + $0x150] sm:$0xff] %vm1152_vm2, %v2494_v58  ;;  %v2041_v2 = vld [vmem:[%s2200_s23 + $0x104] sm:$0xf] }
 0x10f   : > { %v1439_v20 = vsel %vm1152_vm2, %v1364_v17, 0.0  ;;  %v2069_v15 = vld [vmem:[%s2200_s23 + $0x1e4] sm:$0xf]  ;;  %v1910_v17 = vld [vmem:[%s2200_s23 + $0x1e8] sm:$0xf0] }
 0x110   : > { %v1440_v23 = vadd.f32 %v1439_v20, %v1438_v6  ;;  %v855_v24 = vpop.f32.mrf.mxu0  ;;  %v930_v0 = vpop.f32.mrf.mxu2  ;;  %v1798_v6 = vld [vmem:[%s2200_s23 + $0x108] sm:$0xf0]  ;;  %v1913_v20 = vor.u32 %v2069_v15, %v1910_v17 }
 0x111   : > { %v856_v29 = vadd.f32 %v2289_v46, %v855_v24  ;;  %v931_v3 = vadd.f32 %v2289_v46, %v930_v0  ;;  %v1801_v19 = vor.u32 %v2041_v2, %v1798_v6 }
 0x113   : > { %v1025_v36 = vadd.f32 %v1024_v14, %v856_v29  ;;  %v2509_v13 = vadd.f32 %v1099_v7, %v931_v3  ;;  %v1909_v14 = vor.u32 %v2070_v9, %v1908_v8  ;;  %v1102_v31 = vpop.f32.mrf.mxu3 }
 0x115   : > { %v1027_v40 = vpop.f32.mrf.mxu1  ;;  %1166 = vst.msk [vmem:[%s2299_s10 + $0x68] sm:$0xff] %vm1152_vm2, %v1025_v36  ;;  %v1242_v43 = vsel %vm1152_vm2, %v1025_v36, 0.0  ;;  %v1365_v44 = vmul.f32 %v1025_v36, %v1025_v36  ;;  %972 = vmatmul.bf16.gmra.mxu2 %v1909_v14 }
 0x116   : > { %v1243_v45 = vadd.f32 %v1242_v43, %v1241_v18  ;;  %1196 = vst.msk [vmem:[%s2299_s10 + $0x158] sm:$0xff] %vm1152_vm2, %v2509_v13 }
 0x117   : > { %v1441_v48 = vsel %vm1152_vm2, %v1365_v44, 0.0 }
 0x118   : > { %1989 = vmatmul.msk.bf16.gmra.mxu1 %vm713_vm1, %v1793_v37  ;;  %v1442_v50 = vadd.f32 %v1441_v48, %v1440_v23  ;;  %v858_v52 = vpop.f32.mrf.mxu0  ;;  %2004 = vmatmul.msk.bf16.gmra.mxu3 %vm713_vm1, %v1913_v20  ;;  %v933_v25 = vpop.f32.mrf.mxu2 }
 0x119   : > { %v859_v56 = vadd.f32 %v2289_v46, %v858_v52  ;;  %v934_v29 = vadd.f32 %v2289_v46, %v933_v25 }
 0x11b   : > { %v1028_v59 = vadd.f32 %v1027_v40, %v859_v56  ;;  %897 = vmatmul.bf16.gmra.mxu0 %v1789_v49  ;;  %v2524_v35 = vadd.f32 %v1102_v31, %v934_v29  ;;  %v1104_v48 = vpop.f32.mrf.mxu3  ;;  %v1916_v49 = vld [vmem:[%s2200_s23 + $0x1f0] sm:$0xf]  ;;  %v2071_v56 = vld [vmem:[%s2200_s23 + $0x1f4] sm:$0xf] }
 0x11d   : > { %v1029_v60 = vpop.f32.mrf.mxu1  ;;  %1167 = vst.msk [vmem:[%s2299_s10 + $0x70] sm:$0xff] %vm1152_vm2, %v1028_v59  ;;  %v1244_v61 = vsel %vm1152_vm2, %v1028_v59, 0.0  ;;  %v1366_v62 = vmul.f32 %v1028_v59, %v1028_v59  ;;  %v1918_v59 = vld [vmem:[%s2200_s23 + $0x1f8] sm:$0xf0] }
 0x11e   : > { %v1245_v63 = vadd.f32 %v1244_v61, %v1243_v45  ;;  %1197 = vst.msk [vmem:[%s2299_s10 + $0x160] sm:$0xff] %vm1152_vm2, %v2524_v35  ;;  %v1921_v61 = vor.u32 %v2071_v56, %v1918_v59 }
 0x11f   : > { %v1443_v1 = vsel %vm1152_vm2, %v1366_v62, 0.0 }
 0x120   : > { %v1444_v4 = vadd.f32 %v1443_v1, %v1442_v50  ;;  %v860_v5 = vpop.f32.mrf.mxu0  ;;  %v935_v42 = vpop.f32.mrf.mxu2  ;;  %v2072_v50 = vld [vmem:[%s2200_s23 + $0x1f4] sm:$0xf0] }
 0x121   : > { %v861_v11 = vadd.f32 %v2289_v46, %v860_v5  ;;  %v936_v44 = vadd.f32 %v2289_v46, %v935_v42  ;;  %v1917_v55 = vor.u32 %v2072_v50, %v1916_v49 }
 0x123   : > { %v1030_v18 = vadd.f32 %v1029_v60, %v861_v11  ;;  %v2537_v54 = vadd.f32 %v1104_v48, %v936_v44  ;;  %v1107_v7 = vpop.f32.mrf.mxu3 }
 0x125   : > { %v1032_v21 = vpop.f32.mrf.mxu1  ;;  %1168 = vst.msk [vmem:[%s2299_s10 + $0x78] sm:$0xff] %vm1152_vm2, %v1030_v18  ;;  %v1246_v22 = vsel %vm1152_vm2, %v1030_v18, 0.0  ;;  %v1367_v23 = vmul.f32 %v1030_v18, %v1030_v18  ;;  %977 = vmatmul.bf16.gmra.mxu2 %v1917_v55 }
 0x126   : > { %v1247_v24 = vadd.f32 %v1246_v22, %v1245_v63  ;;  %1198 = vst.msk [vmem:[%s2299_s10 + $0x168] sm:$0xff] %vm1152_vm2, %v2537_v54 }
 0x127   : > { %v1445_v26 = vsel %vm1152_vm2, %v1367_v23, 0.0 }
 0x128   : > { %1990 = vmatmul.msk.bf16.gmra.mxu1 %vm713_vm1, %v1801_v19  ;;  %v1446_v27 = vadd.f32 %v1445_v26, %v1444_v4  ;;  %v863_v28 = vpop.f32.mrf.mxu0  ;;  %2005 = vmatmul.msk.bf16.gmra.mxu3 %vm713_vm1, %v1921_v61  ;;  %v938_v2 = vpop.f32.mrf.mxu2 }
 0x129   : > { %v864_v34 = vadd.f32 %v2289_v46, %v863_v28  ;;  %v939_v6 = vadd.f32 %v2289_v46, %v938_v2 }
 0x12b   : > { %v1033_v36 = vadd.f32 %v1032_v21, %v864_v34  ;;  %v2551_v9 = vadd.f32 %v1107_v7, %v939_v6 }
 0x12d   : > { %v1034_v37 = vpop.f32.mrf.mxu1  ;;  %1169 = vst.msk [vmem:[%s2299_s10 + $0x80] sm:$0xff] %vm1152_vm2, %v1033_v36  ;;  %v1248_v38 = vsel %vm1152_vm2, %v1033_v36, 0.0  ;;  %v1368_v40 = vmul.f32 %v1033_v36, %v1033_v36 }
 0x12e   : > { %v1249_v41 = vadd.f32 %v1248_v38, %v1247_v24  ;;  %1199 = vst.msk [vmem:[%s2299_s10 + $0x170] sm:$0xff] %vm1152_vm2, %v2551_v9  ;;  %v1109_v24 = vpop.f32.mrf.mxu3 }
 0x12f   : > { %v1447_v43 = vsel %vm1152_vm2, %v1368_v40, 0.0 }
 0x130   : > { %v1448_v45 = vadd.f32 %v1447_v43, %v1446_v27  ;;  %v865_v47 = vpop.f32.mrf.mxu0  ;;  %v940_v19 = vpop.f32.mrf.mxu2 }
 0x131   : > { %v866_v52 = vadd.f32 %v2289_v46, %v865_v47  ;;  %v941_v21 = vadd.f32 %v2289_v46, %v940_v19 }
 0x133   : > { %v1035_v60 = vadd.f32 %v1034_v37, %v866_v52  ;;  %v2562_v26 = vadd.f32 %v1109_v24, %v941_v21 }
 0x135   : > { %v1037_v62 = vpop.f32.mrf.mxu1  ;;  %1170 = vst.msk [vmem:[%s2299_s10 + $0x88] sm:$0xff] %vm1152_vm2, %v1035_v60  ;;  %v1250_v63 = vsel %vm1152_vm2, %v1035_v60, 0.0  ;;  %v1369_v0 = vmul.f32 %v1035_v60, %v1035_v60 }
 0x136   : > { %v1251_v1 = vadd.f32 %v1250_v63, %v1249_v41  ;;  %1200 = vst.msk [vmem:[%s2299_s10 + $0x178] sm:$0xff] %vm1152_vm2, %v2562_v26  ;;  %v1112_v42 = vpop.f32.mrf.mxu3 }
 0x137   : > { %v1449_v3 = vsel %vm1152_vm2, %v1369_v0, 0.0 }
 0x138   : > { %v1450_v4 = vadd.f32 %v1449_v3, %v1448_v45  ;;  %v868_v5 = vpop.f32.mrf.mxu0  ;;  %v943_v36 = vpop.f32.mrf.mxu2 }
 0x139   : > { %v869_v8 = vadd.f32 %v2289_v46, %v868_v5  ;;  %v944_v41 = vadd.f32 %v2289_v46, %v943_v36 }
 0x13b   : > { %v1038_v11 = vadd.f32 %v1037_v62, %v869_v8  ;;  %v2573_v44 = vadd.f32 %v1112_v42, %v944_v41 }
 0x13d   : > { %v1039_v14 = vpop.f32.mrf.mxu1  ;;  %1171 = vst.msk [vmem:[%s2299_s10 + $0x90] sm:$0xff] %vm1152_vm2, %v1038_v11  ;;  %v1252_v15 = vsel %vm1152_vm2, %v1038_v11, 0.0  ;;  %v1370_v17 = vmul.f32 %v1038_v11, %v1038_v11 }
 0x13e   : > { %v1253_v18 = vadd.f32 %v1252_v15, %v1251_v1  ;;  %1201 = vst.msk [vmem:[%s2299_s10 + $0x180] sm:$0xff] %vm1152_vm2, %v2573_v44  ;;  %v1114_v61 = vpop.f32.mrf.mxu3 }
 0x13f   : > { %v1451_v20 = vsel %vm1152_vm2, %v1370_v17, 0.0 }
 0x140   : > { %v1452_v22 = vadd.f32 %v1451_v20, %v1450_v4  ;;  %v870_v23 = vpop.f32.mrf.mxu0  ;;  %v945_v52 = vpop.f32.mrf.mxu2 }
 0x141   : > { %v871_v25 = vadd.f32 %v2289_v46, %v870_v23  ;;  %v946_v56 = vadd.f32 %v2289_v46, %v945_v52 }
 0x143   : > { %v1040_v27 = vadd.f32 %v1039_v14, %v871_v25  ;;  %v2584_v63 = vadd.f32 %v1114_v61, %v946_v56 }
 0x145   : > { %v1042_v28 = vpop.f32.mrf.mxu1  ;;  %1172 = vst.msk [vmem:[%s2299_s10 + $0x98] sm:$0xff] %vm1152_vm2, %v1040_v27  ;;  %v1254_v29 = vsel %vm1152_vm2, %v1040_v27, 0.0  ;;  %v1371_v31 = vmul.f32 %v1040_v27, %v1040_v27 }
 0x146   : > { %v1255_v34 = vadd.f32 %v1254_v29, %v1253_v18  ;;  %1202 = vst.msk [vmem:[%s2299_s10 + $0x188] sm:$0xff] %vm1152_vm2, %v2584_v63  ;;  %v1117_v14 = vpop.f32.mrf.mxu3 }
 0x147   : > { %v1453_v37 = vsel %vm1152_vm2, %v1371_v31, 0.0 }
 0x148   : > { %v1454_v38 = vadd.f32 %v1453_v37, %v1452_v22  ;;  %v873_v40 = vpop.f32.mrf.mxu0  ;;  %v948_v5 = vpop.f32.mrf.mxu2 }
 0x149   : > { %v874_v43 = vadd.f32 %v2289_v46, %v873_v40  ;;  %v949_v11 = vadd.f32 %v2289_v46, %v948_v5 }
 0x14b   : > { %v1043_v45 = vadd.f32 %v1042_v28, %v874_v43  ;;  %v2599_v17 = vadd.f32 %v1117_v14, %v949_v11 }
 0x14d   : > { %v1044_v47 = vpop.f32.mrf.mxu1  ;;  %1173 = vst.msk [vmem:[%s2299_s10 + $0xa0] sm:$0xff] %vm1152_vm2, %v1043_v45  ;;  %v1256_v48 = vsel %vm1152_vm2, %v1043_v45, 0.0  ;;  %v1372_v49 = vmul.f32 %v1043_v45, %v1043_v45 }
 0x14e   : > { %v1257_v50 = vadd.f32 %v1256_v48, %v1255_v34  ;;  %1203 = vst.msk [vmem:[%s2299_s10 + $0x190] sm:$0xff] %vm1152_vm2, %v2599_v17  ;;  %v1119_v23 = vpop.f32.mrf.mxu3 }
 0x14f   : > { %v1455_v55 = vsel %vm1152_vm2, %v1372_v49, 0.0 }
 0x150   : > { %v1456_v59 = vadd.f32 %v1455_v55, %v1454_v38  ;;  %v875_v60 = vpop.f32.mrf.mxu0  ;;  %v950_v20 = vpop.f32.mrf.mxu2 }
 0x151   : > { %v876_v62 = vadd.f32 %v2289_v46, %v875_v60  ;;  %v951_v21 = vadd.f32 %v2289_v46, %v950_v20 }
 0x153   : > { %v1045_v0 = vadd.f32 %v1044_v47, %v876_v62  ;;  %v2611_v25 = vadd.f32 %v1119_v23, %v951_v21 }
 0x155   : > { %v1047_v1 = vpop.f32.mrf.mxu1  ;;  %1174 = vst.msk [vmem:[%s2299_s10 + $0xa8] sm:$0xff] %vm1152_vm2, %v1045_v0  ;;  %v1258_v2 = vsel %vm1152_vm2, %v1045_v0, 0.0  ;;  %v1373_v3 = vmul.f32 %v1045_v0, %v1045_v0 }
 0x156   : > { %v2592_v4 = vadd.f32 %v1258_v2, %v1257_v50  ;;  %1204 = vst.msk [vmem:[%s2299_s10 + $0x198] sm:$0xff] %vm1152_vm2, %v2611_v25  ;;  %v1122_v36 = vpop.f32.mrf.mxu3 }
 0x157   : > { %v1457_v6 = vsel %vm1152_vm2, %v1373_v3, 0.0 }
 0x158   : > { %v2595_v7 = vadd.f32 %v1457_v6, %v1456_v59  ;;  %v878_v8 = vpop.f32.mrf.mxu0  ;;  %v953_v29 = vpop.f32.mrf.mxu2 }
 0x159   : > { %v879_v15 = vadd.f32 %v2289_v46, %v878_v8  ;;  %v954_v34 = vadd.f32 %v2289_v46, %v953_v29 }
 0x15b   : > { %v2601_v18 = vadd.f32 %v1047_v1, %v879_v15  ;;  %v2623_v38 = vadd.f32 %v1122_v36, %v954_v34 }
 0x15d   : > { %v1049_v19 = vpop.f32.mrf.mxu1  ;;  %1175 = vst.msk [vmem:[%s2299_s10 + $0xb0] sm:$0xff] %vm1152_vm2, %v2601_v18  ;;  %v1374_v34 = vmul.f32 %v2601_v18, %v2601_v18 }
 0x15e   : > { %1205 = vst.msk [vmem:[%s2299_s10 + $0x1a0] sm:$0xff] %vm1152_vm2, %v2623_v38  ;;  %v1124_v47 = vpop.f32.mrf.mxu3 }
 0x160   : > { %v880_v22 = vpop.f32.mrf.mxu0  ;;  %v955_v42 = vpop.f32.mrf.mxu2 }
 0x161   : > { %v881_v24 = vadd.f32 %v2289_v46, %v880_v22  ;;  %v956_v43 = vadd.f32 %v2289_v46, %v955_v42  ;;  %v1260_v42 = vsel %vm1152_vm2, %v2601_v18, 0.0 }
 0x162   : > { %v1261_v18 = vadd.f32 %v1260_v42, %v2592_v4 }
 0x163   : > { %v2613_v27 = vadd.f32 %v1049_v19, %v881_v24  ;;  %v2632_v49 = vadd.f32 %v1124_v47, %v956_v43 }
 0x165   : > { %v1052_v28 = vpop.f32.mrf.mxu1  ;;  %1176 = vst.msk [vmem:[%s2299_s10 + $0xb8] sm:$0xff] %vm1152_vm2, %v2613_v27  ;;  %v1375_v43 = vmul.f32 %v2613_v27, %v2613_v27 }
 0x166   : > { %1206 = vst.msk [vmem:[%s2299_s10 + $0x1a8] sm:$0xff] %vm1152_vm2, %v2632_v49  ;;  %v1127_v60 = vpop.f32.mrf.mxu3 }
 0x168   : > { %v883_v31 = vpop.f32.mrf.mxu0  ;;  %v958_v55 = vpop.f32.mrf.mxu2 }
 0x169   : > { %v884_v37 = vadd.f32 %v2289_v46, %v883_v31  ;;  %v959_v59 = vadd.f32 %v2289_v46, %v958_v55 }
 0x16b   : > { %v1053_v40 = vadd.f32 %v1052_v28, %v884_v37  ;;  %v2641_v62 = vadd.f32 %v1127_v60, %v959_v59  ;;  %v1461_v60 = vsel %vm1152_vm2, %v1375_v43, 0.0 }
 0x16d   : > { %v1054_v41 = vpop.f32.mrf.mxu1  ;;  %1177 = vst.msk [vmem:[%s2299_s10 + $0xc0] sm:$0xff] %vm1152_vm2, %v1053_v40  ;;  %v1376_v55 = vmul.f32 %v1053_v40, %v1053_v40 }
 0x16e   : > { %1207 = vst.msk [vmem:[%s2299_s10 + $0x1b0] sm:$0xff] %vm1152_vm2, %v2641_v62  ;;  %v1129_v6 = vpop.f32.mrf.mxu3 }
 0x170   : > { %v885_v45 = vpop.f32.mrf.mxu0  ;;  %v960_v2 = vpop.f32.mrf.mxu2 }
 0x171   : > { %v886_v48 = vadd.f32 %v2289_v46, %v885_v45  ;;  %v961_v3 = vadd.f32 %v2289_v46, %v960_v2  ;;  %v2676_v45 = vld [vmem:[%s2925_s2] ss:$0 sm:$0xff] }
 0x173   : > { %v1055_v50 = vadd.f32 %v1054_v41, %v886_v48  ;;  %v2650_v11 = vadd.f32 %v1129_v6, %v961_v3 }
 0x175   : > { %v1057_v52 = vpop.f32.mrf.mxu1  ;;  %1178 = vst.msk [vmem:[%s2299_s10 + $0xc8] sm:$0xff] %vm1152_vm2, %v1055_v50  ;;  %v1266_v6 = vsel %vm1152_vm2, %v1055_v50, 0.0 }
 0x176   : > { %1208 = vst.msk [vmem:[%s2299_s10 + $0x1b8] sm:$0xff] %vm1152_vm2, %v2650_v11  ;;  %v1132_v21 = vpop.f32.mrf.mxu3 }
 0x178   : > { %v888_v56 = vpop.f32.mrf.mxu0  ;;  %v963_v19 = vpop.f32.mrf.mxu2 }
 0x179   : > { %v889_v61 = vadd.f32 %v2289_v46, %v888_v56  ;;  %v964_v23 = vadd.f32 %v2289_v46, %v963_v19 }
 0x17b   : > { %v1058_v0 = vadd.f32 %v1057_v52, %v889_v61  ;;  %v2659_v29 = vadd.f32 %v1132_v21, %v964_v23  ;;  %v1262_v52 = vsel %vm1152_vm2, %v2613_v27, 0.0  ;;  %v1264_v61 = vsel %vm1152_vm2, %v1053_v40, 0.0 }
 0x17c   : > { %v1263_v3 = vadd.f32 %v1262_v52, %v1261_v18  ;;  %v1463_v27 = vsel %vm1152_vm2, %v1376_v55, 0.0 }
 0x17d   : > { %v1059_v1 = vpop.f32.mrf.mxu1  ;;  %1179 = vst.msk [vmem:[%s2299_s10 + $0xd0] sm:$0xff] %vm1152_vm2, %v1058_v0  ;;  %v1268_v40 = vsel %vm1152_vm2, %v1058_v0, 0.0 }
 0x17e   : > { %1209 = vst.msk [vmem:[%s2299_s10 + $0x1c0] sm:$0xff] %vm1152_vm2, %v2659_v29  ;;  %v1134_v41 = vpop.f32.mrf.mxu3  ;;  %v1265_v19 = vadd.f32 %v1264_v61, %v1263_v3 }
 0x180   : > { %v890_v5 = vpop.f32.mrf.mxu0  ;;  %v965_v31 = vpop.f32.mrf.mxu2 }
 0x181   : > { %v891_v8 = vadd.f32 %v2289_v46, %v890_v5  ;;  %v966_v36 = vadd.f32 %v2289_v46, %v965_v31 }
 0x183   : > { %v1060_v14 = vadd.f32 %v1059_v1, %v891_v8  ;;  %v2679_v48 = vadd.f32 %v1134_v41, %v966_v36  ;;  %v1377_v1 = vmul.f32 %v1055_v50, %v1055_v50  ;;  %v1378_v8 = vmul.f32 %v1058_v0, %v1058_v0 }
 0x185   : > { %v1062_v15 = vpop.f32.mrf.mxu1  ;;  %1180 = vst.msk [vmem:[%s2299_s10 + $0xd8] sm:$0xff] %vm1152_vm2, %v1060_v14  ;;  %v1465_v21 = vsel %vm1152_vm2, %v1377_v1, 0.0  ;;  %v1270_v50 = vsel %vm1152_vm2, %v1060_v14, 0.0 }
 0x186   : > { %1210 = vst.msk [vmem:[%s2299_s10 + $0x1c8] sm:$0xff] %vm1152_vm2, %v2679_v48 }
 0x188   : > { %v893_v20 = vpop.f32.mrf.mxu0  ;;  %v968_v5 = vpop.f32.mrf.mxu2 }
 0x189   : > { %v894_v22 = vadd.f32 %v2289_v46, %v893_v20  ;;  %v1459_v46 = vsel %vm1152_vm2, %v1374_v34, 0.0  ;;  %v1467_v34 = vsel %vm1152_vm2, %v1378_v8, 0.0 }
 0x18a   : > { %v1460_v2 = vadd.f32 %v1459_v46, %v2595_v7 }
 0x18b   : > { %v1063_v24 = vadd.f32 %v1062_v15, %v894_v22  ;;  %v1137_v20 = vpop.f32.mrf.mxu3  ;;  %v1379_v22 = vmul.f32 %v1060_v14, %v1060_v14  ;;  %v969_v14 = vadd.f32 %v2676_v45, %v968_v5 }
 0x18c   : > { %v1462_v15 = vadd.f32 %v1461_v60, %v1460_v2 }
 0x18d   : > { %v1064_v28 = vpop.f32.mrf.mxu1  ;;  %1181 = vst.msk [vmem:[%s2299_s10 + $0xe0] sm:$0xff] %vm1152_vm2, %v1063_v24  ;;  %v1380_v31 = vmul.f32 %v1063_v24, %v1063_v24  ;;  %v1272_v46 = vsel %vm1152_vm2, %v1063_v24, 0.0 }
 0x18e   : > { %v1464_v7 = vadd.f32 %v1463_v27, %v1462_v15  ;;  %v2711_v15 = vadd.f32 %v1137_v20, %v969_v14 }
 0x18f   : > { %v1471_v55 = vsel %vm1152_vm2, %v1380_v31, 0.0 }
 0x190   : > { %v895_v37 = vpop.f32.mrf.mxu0  ;;  %v970_v18 = vpop.f32.mrf.mxu2  ;;  %1211 = vst.msk [vmem:[%s2299_s10 + $0x1d0] sm:$0xff] %vm1152_vm2, %v2711_v15 }
 0x191   : > { %v896_v47 = vadd.f32 %v2676_v45, %v895_v37  ;;  %v1466_v37 = vadd.f32 %v1465_v21, %v1464_v7 }
 0x193   : > { %v1065_v56 = vadd.f32 %v1064_v28, %v896_v47  ;;  %v1267_v28 = vadd.f32 %v1266_v6, %v1265_v19  ;;  %v1469_v47 = vsel %vm1152_vm2, %v1379_v22, 0.0  ;;  %v1468_v0 = vadd.f32 %v1467_v34, %v1466_v37  ;;  %v1139_v27 = vpop.f32.mrf.mxu3 }
 0x195   : > { %v1067_v59 = vpop.f32.mrf.mxu1  ;;  %1182 = vst.msk [vmem:[%s2299_s10 + $0xe8] sm:$0xff] %vm1152_vm2, %v1065_v56  ;;  %v1269_v41 = vadd.f32 %v1268_v40, %v1267_v28  ;;  %v1381_v42 = vmul.f32 %v1065_v56, %v1065_v56  ;;  %v1274_v60 = vsel %vm1152_vm2, %v1065_v56, 0.0  ;;  %v1470_v1 = vadd.f32 %v1469_v47, %v1468_v0 }
 0x197   : > { %v1271_v52 = vadd.f32 %v1270_v50, %v1269_v41  ;;  %v1473_v3 = vsel %vm1152_vm2, %v1381_v42, 0.0  ;;  %v1472_v5 = vadd.f32 %v1471_v55, %v1470_v1 }
 0x198   : > { %v898_v4 = vpop.f32.mrf.mxu0  ;;  %v973_v50 = vpop.f32.mrf.mxu2 }
 0x199   : > { %v899_v23 = vadd.f32 %v2676_v45, %v898_v4  ;;  %v1273_v2 = vadd.f32 %v1272_v46, %v1271_v52  ;;  %v904_v4 = vadd.f32 %v2676_v45, %v2338_v39  ;;  %v1474_v22 = vadd.f32 %v1473_v3, %v1472_v5 }
 0x19a   : > { %v906_v52 = vadd.f32 %v2676_v45, %v2346_v51  ;;  %v974_v1 = vadd.f32 %v2676_v45, %v973_v50  ;;  %v1284_v51 = vsel %vm1152_vm2, %v2366_v16, 0.0  ;;  %v1290_v50 = vsel %vm1152_vm2, %v2413_v10, 0.0 }
 0x19b   : > { %v1068_v36 = vadd.f32 %v1067_v59, %v899_v23  ;;  %v971_v59 = vadd.f32 %v2676_v45, %v970_v18  ;;  %v1275_v19 = vadd.f32 %v1274_v60, %v1273_v2  ;;  %v1142_v47 = vpop.f32.mrf.mxu3  ;;  %v1386_v60 = vmul.f32 %v2366_v16, %v2366_v16 }
 0x19c   : > { %v1388_v16 = vmul.f32 %v2398_v57, %v2398_v57 }
 0x19d   : > { %v1069_v43 = vpop.f32.mrf.mxu1  ;;  %1183 = vst.msk [vmem:[%s2299_s10 + $0xf0] sm:$0xff] %vm1152_vm2, %v1068_v36  ;;  %v1382_v61 = vmul.f32 %v1068_v36, %v1068_v36  ;;  %v1276_v6 = vsel %vm1152_vm2, %v1068_v36, 0.0  ;;  %v2713_v56 = vadd.f32 %v1139_v27, %v971_v59  ;;  %v1387_v27 = vmul.f32 %v2381_v33, %v2381_v33 }
 0x19e   : > { %v1277_v23 = vadd.f32 %v1276_v6, %v1275_v19 }
 0x19f   : > { %v1475_v21 = vsel %vm1152_vm2, %v1382_v61, 0.0  ;;  %1212 = vst.msk [vmem:[%s2299_s10 + $0x1d8] sm:$0xff] %vm1152_vm2, %v2713_v56 }
 0x1a0   : > { %v900_v24 = vpop.f32.mrf.mxu0  ;;  %v1476_v39 = vadd.f32 %v1475_v21, %v1474_v22  ;;  %v975_v61 = vpop.f32.mrf.mxu2  ;;  %v1483_v21 = vsel %vm1152_vm2, %v1386_v60, 0.0 }
 0x1a1   : > { %v901_v8 = vadd.f32 %v2676_v45, %v900_v24  ;;  %v976_v2 = vadd.f32 %v2676_v45, %v975_v61 }
 0x1a3   : > { %v1070_v40 = vadd.f32 %v1069_v43, %v901_v8  ;;  %v1144_v24 = vpop.f32.mrf.mxu3  ;;  %v2746_v8 = vadd.f32 %v1142_v47, %v974_v1  ;;  %v1391_v47 = vmul.f32 %v2445_v53, %v2445_v53 }
 0x1a4   : > { %v2748_v5 = vadd.f32 %v1144_v24, %v976_v2 }
 0x1a5   : > { %v1072_v7 = vpop.f32.mrf.mxu1  ;;  %1184 = vst.msk [vmem:[%s2299_s10 + $0xf8] sm:$0xff] %vm1152_vm2, %v1070_v40  ;;  %v1278_v20 = vsel %vm1152_vm2, %v1070_v40, 0.0  ;;  %v1383_v28 = vmul.f32 %v1070_v40, %v1070_v40  ;;  %v1286_v40 = vsel %vm1152_vm2, %v2381_v33, 0.0 }
 0x1a6   : > { %v1073_v31 = vadd.f32 %v1072_v7, %v904_v4  ;;  %v1279_v34 = vadd.f32 %v1278_v20, %v1277_v23  ;;  %1213 = vst.msk [vmem:[%s2299_s10 + $0x1e0] sm:$0xff] %vm1152_vm2, %v2746_v8  ;;  %v1485_v7 = vsel %vm1152_vm2, %v1387_v27, 0.0  ;;  %v1288_v20 = vsel %vm1152_vm2, %v2398_v57, 0.0 }
 0x1a7   : > { %v1477_v36 = vsel %vm1152_vm2, %v1383_v28, 0.0  ;;  %1214 = vst.msk [vmem:[%s2299_s10 + $0x1e8] sm:$0xff] %vm1152_vm2, %v2748_v5  ;;  %v1389_v28 = vmul.f32 %v2413_v10, %v2413_v10  ;;  %v1292_v57 = vsel %vm1152_vm2, %v2430_v32, 0.0 }
 0x1a8   : > { %1185 = vst.msk [vmem:[%s2299_s10 + $0x100] sm:$0xff] %vm1152_vm2, %v1073_v31  ;;  %v1280_v37 = vsel %vm1152_vm2, %v1073_v31, 0.0  ;;  %v1384_v41 = vmul.f32 %v1073_v31, %v1073_v31  ;;  %v1478_v43 = vadd.f32 %v1477_v36, %v1476_v39  ;;  %v978_v39 = vpop.f32.mrf.mxu2  ;;  %v1390_v36 = vmul.f32 %v2430_v32, %v2430_v32 }
 0x1a9   : > { %v1281_v42 = vadd.f32 %v1280_v37, %v1279_v34  ;;  %v1487_v34 = vsel %vm1152_vm2, %v1388_v16, 0.0  ;;  %v1493_v32 = vsel %vm1152_vm2, %v1391_v47, 0.0  ;;  %v979_v24 = vadd.f32 %v2676_v45, %v978_v39 }
 0x1aa   : > { %v1479_v46 = vsel %vm1152_vm2, %v1384_v41, 0.0  ;;  %v1491_v10 = vsel %vm1152_vm2, %v1390_v36, 0.0  ;;  %v1397_v39 = vmul.f32 %v2537_v54, %v2537_v54  ;;  %v1306_v36 = vsel %vm1152_vm2, %v2537_v54, 0.0 }
 0x1ab   : > { %v1480_v0 = vadd.f32 %v1479_v46, %v1478_v43  ;;  %v1489_v43 = vsel %vm1152_vm2, %v1389_v28, 0.0  ;;  %v1392_v46 = vmul.f32 %v2462_v12, %v2462_v12  ;;  %v1310_v54 = vsel %vm1152_vm2, %v2562_v26, 0.0 }
 0x1ad   : > { %v1074_v55 = vpop.f32.mrf.mxu1 }
 0x1ae   : > { %v1075_v18 = vadd.f32 %v1074_v55, %v906_v52  ;;  %v1294_v55 = vsel %vm1152_vm2, %v2445_v53, 0.0  ;;  %v1394_v53 = vmul.f32 %v2494_v58, %v2494_v58 }
 0x1b0   : > { %1186 = vst.msk [vmem:[%s2299_s10 + $0x108] sm:$0xff] %vm1152_vm2, %v1075_v18  ;;  %v1282_v14 = vsel %vm1152_vm2, %v1075_v18, 0.0  ;;  %v1385_v59 = vmul.f32 %v1075_v18, %v1075_v18  ;;  %v1393_v18 = vmul.f32 %v2477_v30, %v2477_v30 }
 0x1b1   : > { %v1283_v3 = vadd.f32 %v1282_v14, %v1281_v42  ;;  %v1147_v42 = vpop.f32.mrf.mxu3  ;;  %v1296_v14 = vsel %vm1152_vm2, %v2462_v12, 0.0 }
 0x1b2   : > { %v1481_v6 = vsel %vm1152_vm2, %v1385_v59, 0.0  ;;  %v1495_v59 = vsel %vm1152_vm2, %v1392_v46, 0.0 }
 0x1b3   : > { %v1285_v19 = vadd.f32 %v1284_v51, %v1283_v3  ;;  %v1482_v4 = vadd.f32 %v1481_v6, %v1480_v0  ;;  %v980_v51 = vpop.f32.mrf.mxu2  ;;  %v1298_v3 = vsel %vm1152_vm2, %v2477_v30, 0.0  ;;  %v1497_v6 = vsel %vm1152_vm2, %v1393_v18, 0.0 }
 0x1b4   : > { %v981_v27 = vadd.f32 %v2676_v45, %v980_v51  ;;  %v1395_v30 = vmul.f32 %v2509_v13, %v2509_v13  ;;  %v1499_v45 = vsel %vm1152_vm2, %v1394_v53, 0.0 }
 0x1b5   : > { %v1287_v22 = vadd.f32 %v1286_v40, %v1285_v19  ;;  %v1484_v23 = vadd.f32 %v1483_v21, %v1482_v4  ;;  %v1300_v21 = vsel %vm1152_vm2, %v2494_v58, 0.0  ;;  %v2798_v40 = vadd.f32 %v1147_v42, %v979_v24 }
 0x1b7   : > { %v1289_v33 = vadd.f32 %v1288_v20, %v1287_v22  ;;  %v1486_v31 = vadd.f32 %v1485_v7, %v1484_v23  ;;  %v1302_v7 = vsel %vm1152_vm2, %v2509_v13, 0.0  ;;  %v1396_v20 = vmul.f32 %v2524_v35, %v2524_v35  ;;  %1215 = vst.msk [vmem:[%s2299_s10 + $0x1f0] sm:$0xff] %vm1152_vm2, %v2798_v40 }
 0x1b9   : > { %v1291_v37 = vadd.f32 %v1290_v50, %v1289_v33  ;;  %v1488_v41 = vadd.f32 %v1487_v34, %v1486_v31  ;;  %v1149_v4 = vpop.f32.mrf.mxu3  ;;  %v1501_v33 = vsel %vm1152_vm2, %v1395_v30, 0.0  ;;  %v1304_v31 = vsel %vm1152_vm2, %v2524_v35, 0.0 }
 0x1ba   : > { %v2800_v16 = vadd.f32 %v1149_v4, %v981_v27  ;;  %v1503_v50 = vsel %vm1152_vm2, %v1396_v20, 0.0  ;;  %v1308_v35 = vsel %vm1152_vm2, %v2551_v9, 0.0 }
 0x1bb   : > { %v1293_v0 = vadd.f32 %v1292_v57, %v1291_v37  ;;  %v1490_v52 = vadd.f32 %v1489_v43, %v1488_v41  ;;  %v1398_v37 = vmul.f32 %v2551_v9, %v2551_v9  ;;  %v1505_v43 = vsel %vm1152_vm2, %v1397_v39, 0.0 }
 0x1bc   : > { %1216 = vst.msk [vmem:[%s2299_s10 + $0x1f8] sm:$0xff] %vm1152_vm2, %v2800_v16  ;;  %v1399_v57 = vmul.f32 %v2562_v26, %v2562_v26  ;;  %v1312_v9 = vsel %vm1152_vm2, %v2573_v44, 0.0  ;;  %v1314_v26 = vsel %vm1152_vm2, %v2584_v63, 0.0 }
 0x1bd   : > { %v1295_v60 = vadd.f32 %v1294_v55, %v1293_v0  ;;  %v1492_v61 = vadd.f32 %v1491_v10, %v1490_v52  ;;  %v1507_v0 = vsel %vm1152_vm2, %v1398_v37, 0.0  ;;  %v1400_v52 = vmul.f32 %v2573_v44, %v2573_v44 }
 0x1be   : > { %v1509_v18 = vsel %vm1152_vm2, %v1399_v57, 0.0  ;;  %v1316_v44 = vsel %vm1152_vm2, %v2599_v17, 0.0  ;;  %v1409_v37 = vmul.f32 %v2679_v48, %v2679_v48 }
 0x1bf   : > { %v1297_v1 = vadd.f32 %v1296_v14, %v1295_v60  ;;  %v1494_v2 = vadd.f32 %v1493_v32, %v1492_v61  ;;  %v1401_v60 = vmul.f32 %v2584_v63, %v2584_v63  ;;  %v1511_v14 = vsel %vm1152_vm2, %v1400_v52, 0.0 }
 0x1c0   : > { %v1318_v63 = vsel %vm1152_vm2, %v2611_v25, 0.0 }
 0x1c1   : > { %v1299_v12 = vadd.f32 %v1298_v3, %v1297_v1  ;;  %v1496_v19 = vadd.f32 %v1495_v59, %v1494_v2  ;;  %v1402_v59 = vmul.f32 %v2599_v17, %v2599_v17  ;;  %v1513_v51 = vsel %vm1152_vm2, %v1401_v60, 0.0 }
 0x1c2   : > { %v1403_v3 = vmul.f32 %v2611_v25, %v2611_v25  ;;  %v1320_v17 = vsel %vm1152_vm2, %v2623_v38, 0.0  ;;  %v1322_v25 = vsel %vm1152_vm2, %v2632_v49, 0.0 }
 0x1c3   : > { %v1301_v22 = vadd.f32 %v1300_v21, %v1299_v12  ;;  %v1498_v23 = vadd.f32 %v1497_v6, %v1496_v19  ;;  %v1515_v27 = vsel %vm1152_vm2, %v1402_v59, 0.0  ;;  %v1404_v6 = vmul.f32 %v2623_v38, %v2623_v38 }
 0x1c4   : > { %v1517_v4 = vsel %vm1152_vm2, %v1403_v3, 0.0  ;;  %v1405_v21 = vmul.f32 %v2632_v49, %v2632_v49  ;;  %v1324_v38 = vsel %vm1152_vm2, %v2641_v62, 0.0  ;;  %v1326_v49 = vsel %vm1152_vm2, %v2650_v11, 0.0 }
 0x1c5   : > { %v1303_v58 = vadd.f32 %v1302_v7, %v1301_v22  ;;  %v1500_v28 = vadd.f32 %v1499_v45, %v1498_v23  ;;  %v1519_v23 = vsel %vm1152_vm2, %v1404_v6, 0.0  ;;  %v1406_v45 = vmul.f32 %v2641_v62, %v2641_v62 }
 0x1c6   : > { %v1328_v62 = vsel %vm1152_vm2, %v2659_v29, 0.0  ;;  %v1414_v59 = vmul.f32 %v2798_v40, %v2798_v40 }
 0x1c7   : > { %v1305_v13 = vadd.f32 %v1304_v31, %v1303_v58  ;;  %v1502_v34 = vadd.f32 %v1501_v33, %v1500_v28  ;;  %v1521_v58 = vsel %vm1152_vm2, %v1405_v21, 0.0  ;;  %v1407_v28 = vmul.f32 %v2650_v11, %v2650_v11 }
 0x1c8   : > { %v1523_v39 = vsel %vm1152_vm2, %v1406_v45, 0.0  ;;  %v1330_v11 = vsel %vm1152_vm2, %v2679_v48, 0.0  ;;  %v1334_v48 = vsel %vm1152_vm2, %v2713_v56, 0.0 }
 0x1c9   : > { %v1504_v41 = vadd.f32 %v1503_v50, %v1502_v34  ;;  %v1307_v42 = vadd.f32 %v1306_v36, %v1305_v13  ;;  %v1408_v13 = vmul.f32 %v2659_v29, %v2659_v29  ;;  %v1525_v36 = vsel %vm1152_vm2, %v1407_v28, 0.0 }
 0x1ca   : > { %v1332_v29 = vsel %vm1152_vm2, %v2711_v15, 0.0 }
 0x1cb   : > { %v1309_v47 = vadd.f32 %v1308_v35, %v1307_v42  ;;  %v1506_v46 = vadd.f32 %v1505_v43, %v1504_v41  ;;  %v1527_v43 = vsel %vm1152_vm2, %v1408_v13, 0.0  ;;  %v1410_v35 = vmul.f32 %v2711_v15, %v2711_v15 }
 0x1cc   : > { %v1336_v15 = vsel %vm1152_vm2, %v2746_v8, 0.0 }
 0x1cd   : > { %v1311_v10 = vadd.f32 %v1310_v54, %v1309_v47  ;;  %v1508_v55 = vadd.f32 %v1507_v0, %v1506_v46  ;;  %v1529_v46 = vsel %vm1152_vm2, %v1409_v37, 0.0  ;;  %v1411_v0 = vmul.f32 %v2713_v56, %v2713_v56 }
 0x1ce   : > { %v1338_v56 = vsel %vm1152_vm2, %v2748_v5, 0.0 }
 0x1cf   : > { %v1313_v61 = vadd.f32 %v1312_v9, %v1311_v10  ;;  %v1510_v32 = vadd.f32 %v1509_v18, %v1508_v55  ;;  %v1531_v10 = vsel %vm1152_vm2, %v1410_v35, 0.0  ;;  %v1412_v55 = vmul.f32 %v2746_v8, %v2746_v8 }
 0x1d0   : > { %v1533_v60 = vsel %vm1152_vm2, %v1411_v0, 0.0  ;;  %v1340_v8 = vsel %vm1152_vm2, %v2798_v40, 0.0 }
 0x1d1   : > { %v1315_v1 = vadd.f32 %v1314_v26, %v1313_v61  ;;  %v1512_v2 = vadd.f32 %v1511_v14, %v1510_v32  ;;  %v1413_v61 = vmul.f32 %v2748_v5, %v2748_v5  ;;  %v1535_v26 = vsel %vm1152_vm2, %v1412_v55, 0.0 }
 0x1d2   : > { %v1342_v5 = vsel %vm1152_vm2, %v2800_v16, 0.0 }
 0x1d3   : > { %v1317_v53 = vadd.f32 %v1316_v44, %v1315_v1  ;;  %v1514_v24 = vadd.f32 %v1513_v51, %v1512_v2  ;;  %v1537_v51 = vsel %vm1152_vm2, %v1413_v61, 0.0  ;;  %v1415_v44 = vmul.f32 %v2800_v16, %v2800_v16 }
 0x1d5   : > { %v1319_v12 = vadd.f32 %v1318_v63, %v1317_v53  ;;  %v1516_v19 = vadd.f32 %v1515_v27, %v1514_v24  ;;  %v1539_v24 = vsel %vm1152_vm2, %v1414_v59, 0.0  ;;  %v1541_v6 = vsel %vm1152_vm2, %v1415_v44, 0.0 }
 0x1d7   : > { %v1321_v30 = vadd.f32 %v1320_v17, %v1319_v12  ;;  %v1518_v22 = vadd.f32 %v1517_v4, %v1516_v19 }
 0x1d9   : > { %v1323_v7 = vadd.f32 %v1322_v25, %v1321_v30  ;;  %v1520_v20 = vadd.f32 %v1519_v23, %v1518_v22 }
 0x1db   : > { %v1325_v33 = vadd.f32 %v1324_v38, %v1323_v7  ;;  %v1522_v31 = vadd.f32 %v1521_v58, %v1520_v20 }
 0x1dd   : > { %v1327_v34 = vadd.f32 %v1326_v49, %v1325_v33  ;;  %v1524_v50 = vadd.f32 %v1523_v39, %v1522_v31 }
 0x1df   : > { %v1329_v41 = vadd.f32 %v1328_v62, %v1327_v34  ;;  %v1526_v42 = vadd.f32 %v1525_v36, %v1524_v50 }
 0x1e1   : > { %v1331_v57 = vadd.f32 %v1330_v11, %v1329_v41  ;;  %v1528_v47 = vadd.f32 %v1527_v43, %v1526_v42 }
 0x1e3   : > { %v1530_v54 = vadd.f32 %v1529_v46, %v1528_v47  ;;  %v1333_v52 = vadd.f32 %v1332_v29, %v1331_v57 }
 0x1e5   : > { %v1532_v18 = vadd.f32 %v1531_v10, %v1530_v54  ;;  %v1335_v9 = vadd.f32 %v1334_v48, %v1333_v52 }
 0x1e7   : > { %v1534_v32 = vadd.f32 %v1533_v60, %v1532_v18  ;;  %v1337_v14 = vadd.f32 %v1336_v15, %v1335_v9 }
 0x1e9   : > { %v1536_v1 = vadd.f32 %v1535_v26, %v1534_v32  ;;  %v1339_v2 = vadd.f32 %v1338_v56, %v1337_v14 }
 0x1eb   : > { %v1538_v3 = vadd.f32 %v1537_v51, %v1536_v1  ;;  %v1341_v53 = vadd.f32 %v1340_v8, %v1339_v2 }
 0x1ed   : > { %v1540_v27 = vadd.f32 %v1539_v24, %v1538_v3  ;;  %v1343_v63 = vadd.f32 %v1342_v5, %v1341_v53 }
 0x1ef   : > { %v1344_v12 = vrot.slane %v1343_v63, 4  ;;  %v1542_v19 = vadd.f32 %v1541_v6, %v1540_v27 }
 0x1f1   : > { %v1345_v4 = vadd.f32 %v1344_v12, %v1343_v63  ;;  %v1543_v40 = vrot.slane %v1542_v19, 4 }
 0x1f3   : > { %v1346_v17 = vrot.slane %v1345_v4, 2  ;;  %v1544_v21 = vadd.f32 %v1543_v40, %v1542_v19 }
 0x1f5   : > { %v1347_v30 = vadd.f32 %v1346_v17, %v1345_v4  ;;  %v1545_v22 = vrot.slane %v1544_v21, 2 }
 0x1f7   : > { %v1348_v23 = vrot.slane %v1347_v30, 1  ;;  %v1546_v25 = vadd.f32 %v1545_v22, %v1544_v21 }
 0x1f9   : > { %v1349_v16 = vadd.f32 %v1348_v23, %v1347_v30  ;;  %v1547_v45 = vrot.slane %v1546_v25, 1 }
 0x1fb   : > { %1351 = vst.msk [vmem:[%s244_s14] sm:$0x1] %vm1350_vm3, %v1349_v16  ;;  %v1548_v7 = vadd.f32 %v1547_v45, %v1546_v25 }
 0x1fd   : > { %1549 = vst.msk [vmem:[%s247_s17] sm:$0x1] %vm1350_vm3, %v1548_v7 }
 0x1fe PF: > { %s16_s18 = sadd.s32 1, %s2116_s18  }
 0x1ff   : > { %p13_p5 = scmp.ge.s32.totalorder %s16_s18, 18  }
 0x201   :  { %15 = sbr.rel (!%p13_p5) target bundleno = 1 (0x1), region = 86 }

// kernel: double_conv_forward.7
= control target key start
LH: loop header
LB: loop body
LE: loop exit
PB: predicated region body
PF: predicated region fallthrough
CT: control target
= control target key end

     0   :  { %s1567_s21 = smov 0   ;;  %s2060_s0 = inlined_call_operand.vmem [shape: f32[8192,8], index: 0, kind: input, shape index: {}]   ;;  %s2061_s1 = inlined_call_operand.vmem [shape: bf16[8192,4], index: 1, kind: input, shape index: {}]   ;;  %s2062_s2 = inlined_call_operand.vmem [shape: bf16[4,8], index: 2, kind: input, shape index: {}]   ;;  %s2063_s3 = inlined_call_operand.vmem [shape: f32[1,8], index: 3, kind: input, shape index: {}]   ;;  %s2064_s4 = inlined_call_operand.vmem [shape: f32[1,8], index: 4, kind: input, shape index: {}]   ;;  %s2065_s5 = inlined_call_operand.vmem [shape: f32[1,8], index: 5, kind: input, shape index: {}]   ;;  %s2066_s6 = inlined_call_operand.vmem [shape: f32[8192,8], index: 6, kind: output, shape index: {}]  }
   0x1 LB: > { %s1302_s22 = sadd.s32 4294967295, %s1530_s21   ;;  %p1306_p0 = scmp.ge.s32.totalorder %s1530_s21, 1  ;;  %s1530_s21 = sphi %s1567_s21, %s16_s21  }
   0x2   : > { %p224_p1 = scmp.lt.s32.totalorder %s1530_s21, 17 }
   0x4   : > { %p225_p2 = pnand %p1306_p0, %p224_p1 }
   0x5   : > { %s1307_s25 = sshll.u32 (!%p225_p2), %s1302_s22, 6 }
   0x6   : > { %228 = sbr.rel (%p225_p2) target bundleno = 277 (0x115), region = 44  ;;  %p260_p3 = scmp.lt.s32.totalorder (!%p225_p2), %s1307_s25, 1023 }
   0xb   : > { %v606_v0 = vld [vmem:[%s2062_s2] sm:$0x3]  ;;  %vm868_vm0 = vcmask 1041408   ;;  %s2068_s25 = smov (!%p260_p3, %s1307_s25), 1023  ;;  %vm771_vm1 = vcmask 31744   ;;  %vm1169_vm2 = vcmask 64512  }
   0xc   : > { %v870_v1 = vsel %vm868_vm0, %v606_v0, 0  ;;  %s1310_s26 = sshll.u32 %s2068_s25, 2  ;;  %s1308_s30 = sshll.u32 %s2068_s25, 3  ;;  %v1659_v34 = vld [vmem:[%s2063_s3] ss:$0 sm:$0xff] }
   0xd   : > { %879 = vmatpush.bf16.msra.mxu0 %v870_v1  ;;  %1507 = vmatpush.bf16.msra.mxu1 %v870_v1  ;;  %s1584_s29 = scalar_lea.vmem %s2061_s1, %s1310_s26  ;;  %s1652_s9 = scalar_lea.vmem %s2060_s0, %s1308_s30  ;;  %v1669_v38 = vld [vmem:[%s2064_s4] ss:$0 sm:$0xff] }
   0xe   : > { %1508 = vmatpush.bf16.msra.mxu2 %v870_v1  ;;  %1509 = vmatpush.bf16.msra.mxu3 %v870_v1  ;;  %v1475_v2 = vld [vmem:[%s1584_s29] sm:$0xff]  ;;  %v1476_v6 = vld [vmem:[%s1584_s29 + $0x8] sm:$0xff]  ;;  %v1477_v10 = vld [vmem:[%s1584_s29 + $0x10] sm:$0xff]  ;;  %s1700_s18 = scalar_lea.vmem %s2066_s6, %s1308_s30 }
   0xf   : > { %v1483_v3 = vld [vmem:[%s1584_s29 + $0x40] sm:$0xff]  ;;  %v1484_v7 = vld [vmem:[%s1584_s29 + $0x48] sm:$0xff]  ;;  %v1485_v11 = vld [vmem:[%s1584_s29 + $0x50] sm:$0xff] }
  0x10   : > { %v1491_v4 = vld [vmem:[%s1584_s29 + $0x80] sm:$0xff]  ;;  %1441 = vmatmul.msk.bf16.vlgmr.msra.gmra.mxu0 %vm771_vm1, %v1475_v2  ;;  %1449 = vmatmul.msk.bf16.vlgmr.msra.gmra.mxu1 %vm771_vm1, %v1483_v3  ;;  %v1492_v8 = vld [vmem:[%s1584_s29 + $0x88] sm:$0xff]  ;;  %v1493_v12 = vld [vmem:[%s1584_s29 + $0x90] sm:$0xff] }
  0x11   : > { %v1499_v5 = vld [vmem:[%s1584_s29 + $0xc0] sm:$0xff]  ;;  %1457 = vmatmul.msk.bf16.vlgmr.msra.gmra.mxu2 %vm771_vm1, %v1491_v4  ;;  %v1500_v9 = vld [vmem:[%s1584_s29 + $0xc8] sm:$0xff]  ;;  %v1501_v13 = vld [vmem:[%s1584_s29 + $0xd0] sm:$0xff] }
  0x12   : > { %1465 = vmatmul.msk.bf16.vlgmr.msra.gmra.mxu3 %vm771_vm1, %v1499_v5  ;;  %v1478_v14 = vld [vmem:[%s1584_s29 + $0x18] sm:$0xff]  ;;  %v1479_v18 = vld [vmem:[%s1584_s29 + $0x20] sm:$0xff]  ;;  %v1480_v22 = vld [vmem:[%s1584_s29 + $0x28] sm:$0xff] }
  0x13   : > { %v1486_v15 = vld [vmem:[%s1584_s29 + $0x58] sm:$0xff]  ;;  %v1487_v19 = vld [vmem:[%s1584_s29 + $0x60] sm:$0xff]  ;;  %v1488_v23 = vld [vmem:[%s1584_s29 + $0x68] sm:$0xff] }
  0x14   : > { %v1494_v16 = vld [vmem:[%s1584_s29 + $0x98] sm:$0xff]  ;;  %v1495_v20 = vld [vmem:[%s1584_s29 + $0xa0] sm:$0xff]  ;;  %v1496_v24 = vld [vmem:[%s1584_s29 + $0xa8] sm:$0xff] }
  0x15   : > { %v1502_v17 = vld [vmem:[%s1584_s29 + $0xd8] sm:$0xff]  ;;  %v1503_v21 = vld [vmem:[%s1584_s29 + $0xe0] sm:$0xff]  ;;  %v1504_v25 = vld [vmem:[%s1584_s29 + $0xe8] sm:$0xff] }
  0x16   : > { %v1481_v26 = vld [vmem:[%s1584_s29 + $0x30] sm:$0xff]  ;;  %v1482_v30 = vld [vmem:[%s1584_s29 + $0x38] sm:$0xff]  ;;  %v278_v35 = vld [vmem:[%s1652_s9] sm:$0xff] }
  0x17   : > { %v1489_v27 = vld [vmem:[%s1584_s29 + $0x70] sm:$0xff]  ;;  %v1490_v31 = vld [vmem:[%s1584_s29 + $0x78] sm:$0xff]  ;;  %v294_v36 = vld [vmem:[%s1652_s9 + $0x80] sm:$0xff]  ;;  %v346_v37 = vmul.f32 %v1659_v34, %v278_v35 }
  0x18   : > { %v1497_v28 = vld [vmem:[%s1584_s29 + $0xb0] sm:$0xff]  ;;  %v1498_v32 = vld [vmem:[%s1584_s29 + $0xb8] sm:$0xff]  ;;  %v362_v39 = vmul.f32 %v1659_v34, %v294_v36  ;;  %v310_v42 = vld [vmem:[%s1652_s9 + $0x100] sm:$0xff] }
  0x19   : > { %v1505_v29 = vld [vmem:[%s1584_s29 + $0xf0] sm:$0xff]  ;;  %v1506_v33 = vld [vmem:[%s1584_s29 + $0xf8] sm:$0xff]  ;;  %v414_v40 = vadd.f32 %v1669_v38, %v346_v37  ;;  %v326_v43 = vld [vmem:[%s1652_s9 + $0x180] sm:$0xff]  ;;  %v378_v47 = vmul.f32 %v1659_v34, %v310_v42 }
  0x1a   : > { %v430_v41 = vadd.f32 %v1669_v38, %v362_v39  ;;  %v279_v44 = vld [vmem:[%s1652_s9 + $0x8] sm:$0xff]  ;;  %v1681_v46 = vld [vmem:[%s2065_s5] ss:$0 sm:$0xff]  ;;  %v394_v48 = vmul.f32 %v1659_v34, %v326_v43  ;;  %v280_v1 = vld [vmem:[%s1652_s9 + $0x10] sm:$0xff] }
  0x1b   : > { %v295_v45 = vld [vmem:[%s1652_s9 + $0x88] sm:$0xff]  ;;  %v478_v49 = vmax.f32 %v414_v40, 0.0  ;;  %v347_v51 = vmul.f32 %v1659_v34, %v279_v44  ;;  %v446_v57 = vadd.f32 %v1669_v38, %v378_v47  ;;  %v296_v2 = vld [vmem:[%s1652_s9 + $0x90] sm:$0xff]  ;;  %v297_v35 = vld [vmem:[%s1652_s9 + $0x98] sm:$0xff] }
  0x1c   : > { %v494_v50 = vmax.f32 %v430_v41, 0.0  ;;  %v363_v52 = vmul.f32 %v1659_v34, %v295_v45  ;;  %v462_v58 = vadd.f32 %v1669_v38, %v394_v48  ;;  %v311_v63 = vld [vmem:[%s1652_s9 + $0x108] sm:$0xff] }
  0x1d   : > { %v415_v61 = vadd.f32 %v1669_v38, %v347_v51  ;;  %v327_v0 = vld [vmem:[%s1652_s9 + $0x188] sm:$0xff]  ;;  %v510_v5 = vmax.f32 %v446_v57, 0.0 }
  0x1e   : > { %v431_v62 = vadd.f32 %v1669_v38, %v363_v52 }
  0x20   : > { %1442 = vmatmul.msk.bf16.gmra.mxu0 %vm771_vm1, %v1476_v6  ;;  %1450 = vmatmul.msk.bf16.gmra.mxu1 %vm771_vm1, %v1484_v7  ;;  %v526_v6 = vmax.f32 %v462_v58, 0.0  ;;  %v379_v7 = vmul.f32 %v1659_v34, %v311_v63 }
  0x21   : > { %1458 = vmatmul.msk.bf16.gmra.mxu2 %vm771_vm1, %v1492_v8  ;;  %v395_v8 = vmul.f32 %v1659_v34, %v327_v0  ;;  %v313_v0 = vld [vmem:[%s1652_s9 + $0x118] sm:$0xff] }
  0x22   : > { %1466 = vmatmul.msk.bf16.gmra.mxu3 %vm771_vm1, %v1500_v9 }
  0x30   : > { %1443 = vmatmul.msk.bf16.gmra.mxu0 %vm771_vm1, %v1477_v10  ;;  %1451 = vmatmul.msk.bf16.gmra.mxu1 %vm771_vm1, %v1485_v11  ;;  %v479_v11 = vmax.f32 %v415_v61, 0.0 }
  0x31   : > { %1459 = vmatmul.msk.bf16.gmra.mxu2 %vm771_vm1, %v1493_v12  ;;  %v495_v12 = vmax.f32 %v431_v62, 0.0 }
  0x32   : > { %1467 = vmatmul.msk.bf16.gmra.mxu3 %vm771_vm1, %v1501_v13  ;;  %v348_v13 = vmul.f32 %v1659_v34, %v280_v1  ;;  %v329_v1 = vld [vmem:[%s1652_s9 + $0x198] sm:$0xff] }
  0x40   : > { %1444 = vmatmul.msk.bf16.gmra.mxu0 %vm771_vm1, %v1478_v14  ;;  %1452 = vmatmul.msk.bf16.gmra.mxu1 %vm771_vm1, %v1486_v15  ;;  %v364_v14 = vmul.f32 %v1659_v34, %v296_v2 }
  0x41   : > { %1460 = vmatmul.msk.bf16.gmra.mxu2 %vm771_vm1, %v1494_v16 }
  0x42   : > { %1468 = vmatmul.msk.bf16.gmra.mxu3 %vm771_vm1, %v1502_v17 }
  0x50   : > { %1445 = vmatmul.msk.bf16.gmra.mxu0 %vm771_vm1, %v1479_v18  ;;  %1453 = vmatmul.msk.bf16.gmra.mxu1 %vm771_vm1, %v1487_v19 }
  0x51   : > { %1461 = vmatmul.msk.bf16.gmra.mxu2 %vm771_vm1, %v1495_v20 }
  0x52   : > { %1469 = vmatmul.msk.bf16.gmra.mxu3 %vm771_vm1, %v1503_v21 }
  0x60   : > { %1446 = vmatmul.msk.bf16.gmra.mxu0 %vm771_vm1, %v1480_v22  ;;  %1454 = vmatmul.msk.bf16.gmra.mxu1 %vm771_vm1, %v1488_v23  ;;  %v447_v23 = vadd.f32 %v1669_v38, %v379_v7 }
  0x61   : > { %1462 = vmatmul.msk.bf16.gmra.mxu2 %vm771_vm1, %v1496_v24  ;;  %v463_v24 = vadd.f32 %v1669_v38, %v395_v8 }
  0x62   : > { %1470 = vmatmul.msk.bf16.gmra.mxu3 %vm771_vm1, %v1504_v25  ;;  %v511_v39 = vmax.f32 %v447_v23, 0.0 }
  0x63   : > { %v527_v40 = vmax.f32 %v463_v24, 0.0 }
  0x70   : > { %1447 = vmatmul.msk.bf16.gmra.mxu0 %vm771_vm1, %v1481_v26  ;;  %1455 = vmatmul.msk.bf16.gmra.mxu1 %vm771_vm1, %v1489_v27  ;;  %v416_v27 = vadd.f32 %v1669_v38, %v348_v13 }
  0x71   : > { %1463 = vmatmul.msk.bf16.gmra.mxu2 %vm771_vm1, %v1497_v28  ;;  %v432_v28 = vadd.f32 %v1669_v38, %v364_v14 }
  0x72   : > { %1471 = vmatmul.msk.bf16.gmra.mxu3 %vm771_vm1, %v1505_v29  ;;  %v312_v29 = vld [vmem:[%s1652_s9 + $0x110] sm:$0xff]  ;;  %v480_v45 = vmax.f32 %v416_v27, 0.0 }
  0x73   : > { %v380_v41 = vmul.f32 %v1659_v34, %v312_v29  ;;  %v496_v47 = vmax.f32 %v432_v28, 0.0 }
  0x75   : > { %v448_v58 = vadd.f32 %v1669_v38, %v380_v41 }
  0x77   : > { %v512_v8 = vmax.f32 %v448_v58, 0.0 }
  0x80   : > { %1448 = vmatmul.msk.bf16.gmra.mxu0 %vm771_vm1, %v1482_v30  ;;  %1456 = vmatmul.msk.bf16.gmra.mxu1 %vm771_vm1, %v1490_v31  ;;  %v328_v30 = vld [vmem:[%s1652_s9 + $0x190] sm:$0xff] }
  0x81   : > { %1464 = vmatmul.msk.bf16.gmra.mxu2 %vm771_vm1, %v1498_v32  ;;  %v396_v42 = vmul.f32 %v1659_v34, %v328_v30 }
  0x82   : > { %1472 = vmatmul.msk.bf16.gmra.mxu3 %vm771_vm1, %v1506_v33  ;;  %v281_v33 = vld [vmem:[%s1652_s9 + $0x18] sm:$0xff] }
  0x83   : > { %v349_v48 = vmul.f32 %v1659_v34, %v281_v33  ;;  %v330_v33 = vld [vmem:[%s1652_s9 + $0x1a0] sm:$0xff] }
  0x85   : > { %v417_v62 = vadd.f32 %v1669_v38, %v349_v48 }
  0x87   : > { %v481_v14 = vmax.f32 %v417_v62, 0.0 }
  0x8d   : > { %v881_v53 = vpop.f32.mrf.mxu0  ;;  %v921_v54 = vpop.f32.mrf.mxu1 }
  0x8e   : > { %v882_v55 = vadd.f32 %v1681_v46, %v881_v53  ;;  %v922_v56 = vadd.f32 %v1681_v46, %v921_v54 }
  0x90   : > { %v1041_v59 = vadd.f32 %v882_v55, %v478_v49  ;;  %v1057_v60 = vadd.f32 %v922_v56, %v494_v50  ;;  %v365_v49 = vmul.f32 %v1659_v34, %v297_v35 }
  0x92   : > { %v1105_v3 = vmax.f32 %v1041_v59, 0.0  ;;  %v1121_v4 = vmax.f32 %v1057_v60, 0.0  ;;  %v464_v59 = vadd.f32 %v1669_v38, %v396_v42  ;;  %v433_v63 = vadd.f32 %v1669_v38, %v365_v49 }
  0x94   : > { %1170 = vst.msk [vmem:[%s1700_s18] sm:$0xff] %vm1169_vm2, %v1105_v3  ;;  %v961_v9 = vpop.f32.mrf.mxu2 }
  0x95   : > { %v1001_v10 = vpop.f32.mrf.mxu3  ;;  %1186 = vst.msk [vmem:[%s1700_s18 + $0x80] sm:$0xff] %vm1169_vm2, %v1121_v4  ;;  %v962_v15 = vadd.f32 %v1681_v46, %v961_v9  ;;  %v883_v17 = vpop.f32.mrf.mxu0  ;;  %v282_v4 = vld [vmem:[%s1652_s9 + $0x20] sm:$0xff]  ;;  %v528_v9 = vmax.f32 %v464_v59, 0.0 }
  0x96   : > { %v1002_v16 = vadd.f32 %v1681_v46, %v1001_v10  ;;  %v923_v18 = vpop.f32.mrf.mxu1  ;;  %v884_v19 = vadd.f32 %v1681_v46, %v883_v17  ;;  %v381_v10 = vmul.f32 %v1659_v34, %v313_v0 }
  0x97   : > { %v924_v20 = vadd.f32 %v1681_v46, %v923_v18  ;;  %v1073_v21 = vadd.f32 %v962_v15, %v510_v5  ;;  %v298_v5 = vld [vmem:[%s1652_s9 + $0xa0] sm:$0xff]  ;;  %v497_v15 = vmax.f32 %v433_v63, 0.0 }
  0x98   : > { %v1089_v22 = vadd.f32 %v1002_v16, %v526_v6  ;;  %v1042_v25 = vadd.f32 %v884_v19, %v479_v11  ;;  %v397_v11 = vmul.f32 %v1659_v34, %v329_v1  ;;  %v350_v16 = vmul.f32 %v1659_v34, %v282_v4  ;;  %v331_v4 = vld [vmem:[%s1652_s9 + $0x1a8] sm:$0xff] }
  0x99   : > { %v1058_v26 = vadd.f32 %v924_v20, %v495_v12  ;;  %v1137_v31 = vmax.f32 %v1073_v21, 0.0  ;;  %v366_v17 = vmul.f32 %v1659_v34, %v298_v5 }
  0x9a   : > { %v1153_v32 = vmax.f32 %v1089_v22, 0.0  ;;  %v1106_v36 = vmax.f32 %v1042_v25, 0.0  ;;  %v465_v27 = vadd.f32 %v1669_v38, %v397_v11  ;;  %v418_v30 = vadd.f32 %v1669_v38, %v350_v16 }
  0x9b   : > { %v1122_v37 = vmax.f32 %v1058_v26, 0.0  ;;  %1202 = vst.msk [vmem:[%s1700_s18 + $0x100] sm:$0xff] %vm1169_vm2, %v1137_v31  ;;  %v449_v26 = vadd.f32 %v1669_v38, %v381_v10  ;;  %v434_v31 = vadd.f32 %v1669_v38, %v366_v17 }
  0x9c   : > { %1218 = vst.msk [vmem:[%s1700_s18 + $0x180] sm:$0xff] %vm1169_vm2, %v1153_v32  ;;  %v963_v43 = vpop.f32.mrf.mxu2  ;;  %v314_v32 = vld [vmem:[%s1652_s9 + $0x120] sm:$0xff]  ;;  %v482_v49 = vmax.f32 %v418_v30, 0.0 }
  0x9d   : > { %v1003_v44 = vpop.f32.mrf.mxu3  ;;  %1171 = vst.msk [vmem:[%s1700_s18 + $0x8] sm:$0xff] %vm1169_vm2, %v1106_v36  ;;  %v964_v50 = vadd.f32 %v1681_v46, %v963_v43  ;;  %v886_v52 = vpop.f32.mrf.mxu0  ;;  %v513_v42 = vmax.f32 %v449_v26, 0.0  ;;  %v529_v43 = vmax.f32 %v465_v27, 0.0 }
  0x9e   : > { %v1004_v51 = vadd.f32 %v1681_v46, %v1003_v44  ;;  %v926_v53 = vpop.f32.mrf.mxu1  ;;  %1187 = vst.msk [vmem:[%s1700_s18 + $0x88] sm:$0xff] %vm1169_vm2, %v1122_v37  ;;  %v887_v54 = vadd.f32 %v1681_v46, %v886_v52  ;;  %v283_v37 = vld [vmem:[%s1652_s9 + $0x28] sm:$0xff]  ;;  %v382_v44 = vmul.f32 %v1659_v34, %v314_v32 }
  0x9f   : > { %v927_v55 = vadd.f32 %v1681_v46, %v926_v53  ;;  %v1074_v56 = vadd.f32 %v964_v50, %v511_v39  ;;  %v299_v39 = vld [vmem:[%s1652_s9 + $0xa8] sm:$0xff]  ;;  %v498_v50 = vmax.f32 %v434_v31, 0.0 }
  0xa0   : > { %v1090_v57 = vadd.f32 %v1004_v51, %v527_v40  ;;  %v1043_v60 = vadd.f32 %v887_v54, %v480_v45  ;;  %v398_v45 = vmul.f32 %v1659_v34, %v330_v33  ;;  %v351_v51 = vmul.f32 %v1659_v34, %v283_v37  ;;  %v332_v37 = vld [vmem:[%s1652_s9 + $0x1b0] sm:$0xff] }
  0xa1   : > { %v1059_v61 = vadd.f32 %v927_v55, %v496_v47  ;;  %v1138_v2 = vmax.f32 %v1074_v56, 0.0  ;;  %v367_v52 = vmul.f32 %v1659_v34, %v299_v39 }
  0xa2   : > { %v1154_v3 = vmax.f32 %v1090_v57, 0.0  ;;  %v1107_v6 = vmax.f32 %v1043_v60, 0.0  ;;  %v466_v62 = vadd.f32 %v1669_v38, %v398_v45  ;;  %v419_v1 = vadd.f32 %v1669_v38, %v351_v51 }
  0xa3   : > { %v1123_v7 = vmax.f32 %v1059_v61, 0.0  ;;  %1203 = vst.msk [vmem:[%s1700_s18 + $0x108] sm:$0xff] %vm1169_vm2, %v1138_v2  ;;  %v450_v61 = vadd.f32 %v1669_v38, %v382_v44  ;;  %v435_v2 = vadd.f32 %v1669_v38, %v367_v52 }
  0xa4   : > { %1219 = vst.msk [vmem:[%s1700_s18 + $0x188] sm:$0xff] %vm1169_vm2, %v1154_v3  ;;  %v966_v12 = vpop.f32.mrf.mxu2  ;;  %v315_v3 = vld [vmem:[%s1652_s9 + $0x128] sm:$0xff]  ;;  %v483_v17 = vmax.f32 %v419_v1, 0.0 }
  0xa5   : > { %v1006_v13 = vpop.f32.mrf.mxu3  ;;  %1172 = vst.msk [vmem:[%s1700_s18 + $0x10] sm:$0xff] %vm1169_vm2, %v1107_v6  ;;  %v967_v18 = vadd.f32 %v1681_v46, %v966_v12  ;;  %v888_v20 = vpop.f32.mrf.mxu0  ;;  %v514_v11 = vmax.f32 %v450_v61, 0.0  ;;  %v530_v12 = vmax.f32 %v466_v62, 0.0 }
  0xa6   : > { %v1007_v19 = vadd.f32 %v1681_v46, %v1006_v13  ;;  %v928_v21 = vpop.f32.mrf.mxu1  ;;  %1188 = vst.msk [vmem:[%s1700_s18 + $0x90] sm:$0xff] %vm1169_vm2, %v1123_v7  ;;  %v889_v22 = vadd.f32 %v1681_v46, %v888_v20  ;;  %v284_v7 = vld [vmem:[%s1652_s9 + $0x30] sm:$0xff]  ;;  %v383_v13 = vmul.f32 %v1659_v34, %v315_v3 }
  0xa7   : > { %v929_v23 = vadd.f32 %v1681_v46, %v928_v21  ;;  %v1075_v24 = vadd.f32 %v967_v18, %v512_v8  ;;  %v300_v8 = vld [vmem:[%s1652_s9 + $0xb0] sm:$0xff]  ;;  %v499_v18 = vmax.f32 %v435_v2, 0.0 }
  0xa8   : > { %v1091_v25 = vadd.f32 %v1007_v19, %v528_v9  ;;  %v1044_v28 = vadd.f32 %v889_v22, %v481_v14  ;;  %v399_v14 = vmul.f32 %v1659_v34, %v331_v4  ;;  %v352_v19 = vmul.f32 %v1659_v34, %v284_v7  ;;  %v333_v7 = vld [vmem:[%s1652_s9 + $0x1b8] sm:$0xff] }
  0xa9   : > { %v1060_v29 = vadd.f32 %v929_v23, %v497_v15  ;;  %v1139_v35 = vmax.f32 %v1075_v24, 0.0  ;;  %v368_v20 = vmul.f32 %v1659_v34, %v300_v8 }
  0xaa   : > { %v1155_v36 = vmax.f32 %v1091_v25, 0.0  ;;  %v1108_v40 = vmax.f32 %v1044_v28, 0.0  ;;  %v467_v30 = vadd.f32 %v1669_v38, %v399_v14  ;;  %v420_v33 = vadd.f32 %v1669_v38, %v352_v19 }
  0xab   : > { %v1124_v41 = vmax.f32 %v1060_v29, 0.0  ;;  %1204 = vst.msk [vmem:[%s1700_s18 + $0x110] sm:$0xff] %vm1169_vm2, %v1139_v35  ;;  %v451_v29 = vadd.f32 %v1669_v38, %v383_v13  ;;  %v436_v35 = vadd.f32 %v1669_v38, %v368_v20 }
  0xac   : > { %1220 = vst.msk [vmem:[%s1700_s18 + $0x190] sm:$0xff] %vm1169_vm2, %v1155_v36  ;;  %v968_v47 = vpop.f32.mrf.mxu2  ;;  %v316_v36 = vld [vmem:[%s1652_s9 + $0x130] sm:$0xff]  ;;  %v484_v52 = vmax.f32 %v420_v33, 0.0 }
  0xad   : > { %v1008_v48 = vpop.f32.mrf.mxu3  ;;  %1173 = vst.msk [vmem:[%s1700_s18 + $0x18] sm:$0xff] %vm1169_vm2, %v1108_v40  ;;  %v969_v53 = vadd.f32 %v1681_v46, %v968_v47  ;;  %v891_v55 = vpop.f32.mrf.mxu0  ;;  %v515_v45 = vmax.f32 %v451_v29, 0.0  ;;  %v531_v47 = vmax.f32 %v467_v30, 0.0 }
  0xae   : > { %v1009_v54 = vadd.f32 %v1681_v46, %v1008_v48  ;;  %v931_v56 = vpop.f32.mrf.mxu1  ;;  %1189 = vst.msk [vmem:[%s1700_s18 + $0x98] sm:$0xff] %vm1169_vm2, %v1124_v41  ;;  %v892_v57 = vadd.f32 %v1681_v46, %v891_v55  ;;  %v285_v41 = vld [vmem:[%s1652_s9 + $0x38] sm:$0xff]  ;;  %v384_v48 = vmul.f32 %v1659_v34, %v316_v36 }
  0xaf   : > { %v932_v58 = vadd.f32 %v1681_v46, %v931_v56  ;;  %v1076_v59 = vadd.f32 %v969_v53, %v513_v42  ;;  %v301_v42 = vld [vmem:[%s1652_s9 + $0xb8] sm:$0xff]  ;;  %v500_v53 = vmax.f32 %v436_v35, 0.0 }
  0xb0   : > { %v1092_v60 = vadd.f32 %v1009_v54, %v529_v43  ;;  %v1045_v63 = vadd.f32 %v892_v57, %v482_v49  ;;  %v400_v49 = vmul.f32 %v1659_v34, %v332_v37  ;;  %v353_v54 = vmul.f32 %v1659_v34, %v285_v41  ;;  %v334_v41 = vld [vmem:[%s1652_s9 + $0x1c0] sm:$0xff] }
  0xb1   : > { %v1061_v0 = vadd.f32 %v932_v58, %v498_v50  ;;  %v1140_v5 = vmax.f32 %v1076_v59, 0.0  ;;  %v369_v55 = vmul.f32 %v1659_v34, %v301_v42 }
  0xb2   : > { %v1156_v6 = vmax.f32 %v1092_v60, 0.0  ;;  %v1109_v9 = vmax.f32 %v1045_v63, 0.0  ;;  %v468_v1 = vadd.f32 %v1669_v38, %v400_v49  ;;  %v421_v4 = vadd.f32 %v1669_v38, %v353_v54 }
  0xb3   : > { %v1125_v10 = vmax.f32 %v1061_v0, 0.0  ;;  %1205 = vst.msk [vmem:[%s1700_s18 + $0x118] sm:$0xff] %vm1169_vm2, %v1140_v5  ;;  %v452_v0 = vadd.f32 %v1669_v38, %v384_v48  ;;  %v437_v5 = vadd.f32 %v1669_v38, %v369_v55 }
  0xb4   : > { %1221 = vst.msk [vmem:[%s1700_s18 + $0x198] sm:$0xff] %vm1169_vm2, %v1156_v6  ;;  %v971_v15 = vpop.f32.mrf.mxu2  ;;  %v317_v6 = vld [vmem:[%s1652_s9 + $0x138] sm:$0xff]  ;;  %v485_v20 = vmax.f32 %v421_v4, 0.0 }
  0xb5   : > { %v1011_v16 = vpop.f32.mrf.mxu3  ;;  %1174 = vst.msk [vmem:[%s1700_s18 + $0x20] sm:$0xff] %vm1169_vm2, %v1109_v9  ;;  %v972_v21 = vadd.f32 %v1681_v46, %v971_v15  ;;  %v893_v23 = vpop.f32.mrf.mxu0  ;;  %v516_v14 = vmax.f32 %v452_v0, 0.0  ;;  %v532_v15 = vmax.f32 %v468_v1, 0.0 }
  0xb6   : > { %v1012_v22 = vadd.f32 %v1681_v46, %v1011_v16  ;;  %v933_v24 = vpop.f32.mrf.mxu1  ;;  %1190 = vst.msk [vmem:[%s1700_s18 + $0xa0] sm:$0xff] %vm1169_vm2, %v1125_v10  ;;  %v894_v25 = vadd.f32 %v1681_v46, %v893_v23  ;;  %v286_v10 = vld [vmem:[%s1652_s9 + $0x40] sm:$0xff]  ;;  %v385_v16 = vmul.f32 %v1659_v34, %v317_v6 }
  0xb7   : > { %v934_v26 = vadd.f32 %v1681_v46, %v933_v24  ;;  %v1077_v27 = vadd.f32 %v972_v21, %v514_v11  ;;  %v302_v11 = vld [vmem:[%s1652_s9 + $0xc0] sm:$0xff]  ;;  %v501_v21 = vmax.f32 %v437_v5, 0.0 }
  0xb8   : > { %v1093_v28 = vadd.f32 %v1012_v22, %v530_v12  ;;  %v1046_v31 = vadd.f32 %v894_v25, %v483_v17  ;;  %v401_v17 = vmul.f32 %v1659_v34, %v333_v7  ;;  %v354_v22 = vmul.f32 %v1659_v34, %v286_v10  ;;  %v335_v10 = vld [vmem:[%s1652_s9 + $0x1c8] sm:$0xff] }
  0xb9   : > { %v1062_v32 = vadd.f32 %v934_v26, %v499_v18  ;;  %v1141_v39 = vmax.f32 %v1077_v27, 0.0  ;;  %v370_v23 = vmul.f32 %v1659_v34, %v302_v11 }
  0xba   : > { %v1157_v40 = vmax.f32 %v1093_v28, 0.0  ;;  %v1110_v43 = vmax.f32 %v1046_v31, 0.0  ;;  %v469_v33 = vadd.f32 %v1669_v38, %v401_v17  ;;  %v422_v37 = vadd.f32 %v1669_v38, %v354_v22 }
  0xbb   : > { %v1126_v44 = vmax.f32 %v1062_v32, 0.0  ;;  %1206 = vst.msk [vmem:[%s1700_s18 + $0x120] sm:$0xff] %vm1169_vm2, %v1141_v39  ;;  %v453_v32 = vadd.f32 %v1669_v38, %v385_v16  ;;  %v438_v39 = vadd.f32 %v1669_v38, %v370_v23 }
  0xbc   : > { %1222 = vst.msk [vmem:[%s1700_s18 + $0x1a0] sm:$0xff] %vm1169_vm2, %v1157_v40  ;;  %v973_v50 = vpop.f32.mrf.mxu2  ;;  %v318_v40 = vld [vmem:[%s1652_s9 + $0x140] sm:$0xff]  ;;  %v486_v55 = vmax.f32 %v422_v37, 0.0 }
  0xbd   : > { %v1013_v51 = vpop.f32.mrf.mxu3  ;;  %1175 = vst.msk [vmem:[%s1700_s18 + $0x28] sm:$0xff] %vm1169_vm2, %v1110_v43  ;;  %v974_v56 = vadd.f32 %v1681_v46, %v973_v50  ;;  %v896_v58 = vpop.f32.mrf.mxu0  ;;  %v517_v49 = vmax.f32 %v453_v32, 0.0  ;;  %v533_v50 = vmax.f32 %v469_v33, 0.0 }
  0xbe   : > { %v1014_v57 = vadd.f32 %v1681_v46, %v1013_v51  ;;  %v936_v59 = vpop.f32.mrf.mxu1  ;;  %1191 = vst.msk [vmem:[%s1700_s18 + $0xa8] sm:$0xff] %vm1169_vm2, %v1126_v44  ;;  %v897_v60 = vadd.f32 %v1681_v46, %v896_v58  ;;  %v287_v44 = vld [vmem:[%s1652_s9 + $0x48] sm:$0xff]  ;;  %v386_v51 = vmul.f32 %v1659_v34, %v318_v40 }
  0xbf   : > { %v937_v61 = vadd.f32 %v1681_v46, %v936_v59  ;;  %v1078_v62 = vadd.f32 %v974_v56, %v515_v45  ;;  %v303_v45 = vld [vmem:[%s1652_s9 + $0xc8] sm:$0xff]  ;;  %v502_v56 = vmax.f32 %v438_v39, 0.0 }
  0xc0   : > { %v1094_v63 = vadd.f32 %v1014_v57, %v531_v47  ;;  %v1047_v2 = vadd.f32 %v897_v60, %v484_v52  ;;  %v402_v52 = vmul.f32 %v1659_v34, %v334_v41  ;;  %v355_v57 = vmul.f32 %v1659_v34, %v287_v44  ;;  %v336_v44 = vld [vmem:[%s1652_s9 + $0x1d0] sm:$0xff] }
  0xc1   : > { %v1063_v3 = vadd.f32 %v937_v61, %v500_v53  ;;  %v1142_v8 = vmax.f32 %v1078_v62, 0.0  ;;  %v371_v58 = vmul.f32 %v1659_v34, %v303_v45 }
  0xc2   : > { %v1158_v9 = vmax.f32 %v1094_v63, 0.0  ;;  %v1111_v12 = vmax.f32 %v1047_v2, 0.0  ;;  %v470_v4 = vadd.f32 %v1669_v38, %v402_v52  ;;  %v423_v7 = vadd.f32 %v1669_v38, %v355_v57 }
  0xc3   : > { %v1127_v13 = vmax.f32 %v1063_v3, 0.0  ;;  %1207 = vst.msk [vmem:[%s1700_s18 + $0x128] sm:$0xff] %vm1169_vm2, %v1142_v8  ;;  %v454_v3 = vadd.f32 %v1669_v38, %v386_v51  ;;  %v439_v8 = vadd.f32 %v1669_v38, %v371_v58 }
  0xc4   : > { %1223 = vst.msk [vmem:[%s1700_s18 + $0x1a8] sm:$0xff] %vm1169_vm2, %v1158_v9  ;;  %v976_v18 = vpop.f32.mrf.mxu2  ;;  %v319_v9 = vld [vmem:[%s1652_s9 + $0x148] sm:$0xff]  ;;  %v487_v23 = vmax.f32 %v423_v7, 0.0 }
  0xc5   : > { %v1016_v19 = vpop.f32.mrf.mxu3  ;;  %1176 = vst.msk [vmem:[%s1700_s18 + $0x30] sm:$0xff] %vm1169_vm2, %v1111_v12  ;;  %v977_v24 = vadd.f32 %v1681_v46, %v976_v18  ;;  %v898_v26 = vpop.f32.mrf.mxu0  ;;  %v518_v17 = vmax.f32 %v454_v3, 0.0  ;;  %v534_v18 = vmax.f32 %v470_v4, 0.0 }
  0xc6   : > { %v1017_v25 = vadd.f32 %v1681_v46, %v1016_v19  ;;  %v938_v27 = vpop.f32.mrf.mxu1  ;;  %1192 = vst.msk [vmem:[%s1700_s18 + $0xb0] sm:$0xff] %vm1169_vm2, %v1127_v13  ;;  %v899_v28 = vadd.f32 %v1681_v46, %v898_v26  ;;  %v288_v13 = vld [vmem:[%s1652_s9 + $0x50] sm:$0xff]  ;;  %v387_v19 = vmul.f32 %v1659_v34, %v319_v9 }
  0xc7   : > { %v939_v29 = vadd.f32 %v1681_v46, %v938_v27  ;;  %v1079_v30 = vadd.f32 %v977_v24, %v516_v14  ;;  %v304_v14 = vld [vmem:[%s1652_s9 + $0xd0] sm:$0xff]  ;;  %v503_v24 = vmax.f32 %v439_v8, 0.0 }
  0xc8   : > { %v1095_v31 = vadd.f32 %v1017_v25, %v532_v15  ;;  %v1048_v35 = vadd.f32 %v899_v28, %v485_v20  ;;  %v403_v20 = vmul.f32 %v1659_v34, %v335_v10  ;;  %v356_v25 = vmul.f32 %v1659_v34, %v288_v13  ;;  %v337_v13 = vld [vmem:[%s1652_s9 + $0x1d8] sm:$0xff] }
  0xc9   : > { %v1064_v36 = vadd.f32 %v939_v29, %v501_v21  ;;  %v1143_v42 = vmax.f32 %v1079_v30, 0.0  ;;  %v372_v26 = vmul.f32 %v1659_v34, %v304_v14 }
  0xca   : > { %v1159_v43 = vmax.f32 %v1095_v31, 0.0  ;;  %v1112_v47 = vmax.f32 %v1048_v35, 0.0  ;;  %v471_v37 = vadd.f32 %v1669_v38, %v403_v20  ;;  %v424_v41 = vadd.f32 %v1669_v38, %v356_v25 }
  0xcb   : > { %v1128_v48 = vmax.f32 %v1064_v36, 0.0  ;;  %1208 = vst.msk [vmem:[%s1700_s18 + $0x130] sm:$0xff] %vm1169_vm2, %v1143_v42  ;;  %v455_v36 = vadd.f32 %v1669_v38, %v387_v19  ;;  %v440_v42 = vadd.f32 %v1669_v38, %v372_v26 }
  0xcc   : > { %1224 = vst.msk [vmem:[%s1700_s18 + $0x1b0] sm:$0xff] %vm1169_vm2, %v1159_v43  ;;  %v978_v53 = vpop.f32.mrf.mxu2  ;;  %v320_v43 = vld [vmem:[%s1652_s9 + $0x150] sm:$0xff]  ;;  %v488_v58 = vmax.f32 %v424_v41, 0.0 }
  0xcd   : > { %v1018_v54 = vpop.f32.mrf.mxu3  ;;  %1177 = vst.msk [vmem:[%s1700_s18 + $0x38] sm:$0xff] %vm1169_vm2, %v1112_v47  ;;  %v979_v59 = vadd.f32 %v1681_v46, %v978_v53  ;;  %v901_v61 = vpop.f32.mrf.mxu0  ;;  %v519_v52 = vmax.f32 %v455_v36, 0.0  ;;  %v535_v53 = vmax.f32 %v471_v37, 0.0 }
  0xce   : > { %v1019_v60 = vadd.f32 %v1681_v46, %v1018_v54  ;;  %v941_v62 = vpop.f32.mrf.mxu1  ;;  %1193 = vst.msk [vmem:[%s1700_s18 + $0xb8] sm:$0xff] %vm1169_vm2, %v1128_v48  ;;  %v902_v63 = vadd.f32 %v1681_v46, %v901_v61  ;;  %v289_v48 = vld [vmem:[%s1652_s9 + $0x58] sm:$0xff]  ;;  %v388_v54 = vmul.f32 %v1659_v34, %v320_v43 }
  0xcf   : > { %v942_v0 = vadd.f32 %v1681_v46, %v941_v62  ;;  %v1080_v1 = vadd.f32 %v979_v59, %v517_v49  ;;  %v305_v49 = vld [vmem:[%s1652_s9 + $0xd8] sm:$0xff]  ;;  %v504_v59 = vmax.f32 %v440_v42, 0.0 }
  0xd0   : > { %v1096_v2 = vadd.f32 %v1019_v60, %v533_v50  ;;  %v1049_v5 = vadd.f32 %v902_v63, %v486_v55  ;;  %v404_v55 = vmul.f32 %v1659_v34, %v336_v44  ;;  %v357_v60 = vmul.f32 %v1659_v34, %v289_v48  ;;  %v338_v48 = vld [vmem:[%s1652_s9 + $0x1e0] sm:$0xff] }
  0xd1   : > { %v1065_v6 = vadd.f32 %v942_v0, %v502_v56  ;;  %v1144_v11 = vmax.f32 %v1080_v1, 0.0  ;;  %v373_v61 = vmul.f32 %v1659_v34, %v305_v49 }
  0xd2   : > { %v1160_v12 = vmax.f32 %v1096_v2, 0.0  ;;  %v1113_v15 = vmax.f32 %v1049_v5, 0.0  ;;  %v472_v7 = vadd.f32 %v1669_v38, %v404_v55  ;;  %v425_v10 = vadd.f32 %v1669_v38, %v357_v60 }
  0xd3   : > { %v1129_v16 = vmax.f32 %v1065_v6, 0.0  ;;  %1209 = vst.msk [vmem:[%s1700_s18 + $0x138] sm:$0xff] %vm1169_vm2, %v1144_v11  ;;  %v456_v6 = vadd.f32 %v1669_v38, %v388_v54  ;;  %v441_v11 = vadd.f32 %v1669_v38, %v373_v61 }
  0xd4   : > { %1225 = vst.msk [vmem:[%s1700_s18 + $0x1b8] sm:$0xff] %vm1169_vm2, %v1160_v12  ;;  %v981_v21 = vpop.f32.mrf.mxu2  ;;  %v321_v12 = vld [vmem:[%s1652_s9 + $0x158] sm:$0xff]  ;;  %v489_v26 = vmax.f32 %v425_v10, 0.0 }
  0xd5   : > { %v1021_v22 = vpop.f32.mrf.mxu3  ;;  %1178 = vst.msk [vmem:[%s1700_s18 + $0x40] sm:$0xff] %vm1169_vm2, %v1113_v15  ;;  %v982_v27 = vadd.f32 %v1681_v46, %v981_v21  ;;  %v903_v29 = vpop.f32.mrf.mxu0  ;;  %v520_v20 = vmax.f32 %v456_v6, 0.0  ;;  %v536_v21 = vmax.f32 %v472_v7, 0.0 }
  0xd6   : > { %v1022_v28 = vadd.f32 %v1681_v46, %v1021_v22  ;;  %v943_v30 = vpop.f32.mrf.mxu1  ;;  %1194 = vst.msk [vmem:[%s1700_s18 + $0xc0] sm:$0xff] %vm1169_vm2, %v1129_v16  ;;  %v904_v31 = vadd.f32 %v1681_v46, %v903_v29  ;;  %v290_v16 = vld [vmem:[%s1652_s9 + $0x60] sm:$0xff]  ;;  %v389_v22 = vmul.f32 %v1659_v34, %v321_v12 }
  0xd7   : > { %v944_v32 = vadd.f32 %v1681_v46, %v943_v30  ;;  %v1081_v33 = vadd.f32 %v982_v27, %v518_v17  ;;  %v306_v17 = vld [vmem:[%s1652_s9 + $0xe0] sm:$0xff]  ;;  %v505_v27 = vmax.f32 %v441_v11, 0.0 }
  0xd8   : > { %v1097_v35 = vadd.f32 %v1022_v28, %v534_v18  ;;  %v1050_v39 = vadd.f32 %v904_v31, %v487_v23  ;;  %v405_v23 = vmul.f32 %v1659_v34, %v337_v13  ;;  %v358_v28 = vmul.f32 %v1659_v34, %v290_v16  ;;  %v339_v16 = vld [vmem:[%s1652_s9 + $0x1e8] sm:$0xff] }
  0xd9   : > { %v1066_v40 = vadd.f32 %v944_v32, %v503_v24  ;;  %v1145_v45 = vmax.f32 %v1081_v33, 0.0  ;;  %v374_v29 = vmul.f32 %v1659_v34, %v306_v17 }
  0xda   : > { %v1161_v47 = vmax.f32 %v1097_v35, 0.0  ;;  %v1114_v50 = vmax.f32 %v1050_v39, 0.0  ;;  %v473_v41 = vadd.f32 %v1669_v38, %v405_v23  ;;  %v426_v44 = vadd.f32 %v1669_v38, %v358_v28 }
  0xdb   : > { %v1130_v51 = vmax.f32 %v1066_v40, 0.0  ;;  %1210 = vst.msk [vmem:[%s1700_s18 + $0x140] sm:$0xff] %vm1169_vm2, %v1145_v45  ;;  %v457_v40 = vadd.f32 %v1669_v38, %v389_v22  ;;  %v442_v45 = vadd.f32 %v1669_v38, %v374_v29 }
  0xdc   : > { %1226 = vst.msk [vmem:[%s1700_s18 + $0x1c0] sm:$0xff] %vm1169_vm2, %v1161_v47  ;;  %v983_v56 = vpop.f32.mrf.mxu2  ;;  %v322_v47 = vld [vmem:[%s1652_s9 + $0x160] sm:$0xff]  ;;  %v490_v61 = vmax.f32 %v426_v44, 0.0 }
  0xdd   : > { %v1023_v57 = vpop.f32.mrf.mxu3  ;;  %1179 = vst.msk [vmem:[%s1700_s18 + $0x48] sm:$0xff] %vm1169_vm2, %v1114_v50  ;;  %v984_v62 = vadd.f32 %v1681_v46, %v983_v56  ;;  %v906_v0 = vpop.f32.mrf.mxu0  ;;  %v521_v55 = vmax.f32 %v457_v40, 0.0  ;;  %v537_v56 = vmax.f32 %v473_v41, 0.0 }
  0xde   : > { %v1024_v63 = vadd.f32 %v1681_v46, %v1023_v57  ;;  %v946_v1 = vpop.f32.mrf.mxu1  ;;  %1195 = vst.msk [vmem:[%s1700_s18 + $0xc8] sm:$0xff] %vm1169_vm2, %v1130_v51  ;;  %v907_v2 = vadd.f32 %v1681_v46, %v906_v0  ;;  %v291_v51 = vld [vmem:[%s1652_s9 + $0x68] sm:$0xff]  ;;  %v390_v57 = vmul.f32 %v1659_v34, %v322_v47 }
  0xdf   : > { %v947_v3 = vadd.f32 %v1681_v46, %v946_v1  ;;  %v1082_v4 = vadd.f32 %v984_v62, %v519_v52  ;;  %v307_v52 = vld [vmem:[%s1652_s9 + $0xe8] sm:$0xff]  ;;  %v506_v62 = vmax.f32 %v442_v45, 0.0 }
  0xe0   : > { %v1098_v5 = vadd.f32 %v1024_v63, %v535_v53  ;;  %v1051_v8 = vadd.f32 %v907_v2, %v488_v58  ;;  %v406_v58 = vmul.f32 %v1659_v34, %v338_v48  ;;  %v359_v63 = vmul.f32 %v1659_v34, %v291_v51  ;;  %v340_v51 = vld [vmem:[%s1652_s9 + $0x1f0] sm:$0xff] }
  0xe1   : > { %v1067_v9 = vadd.f32 %v947_v3, %v504_v59  ;;  %v1146_v14 = vmax.f32 %v1082_v4, 0.0  ;;  %v375_v0 = vmul.f32 %v1659_v34, %v307_v52 }
  0xe2   : > { %v1162_v15 = vmax.f32 %v1098_v5, 0.0  ;;  %v1115_v18 = vmax.f32 %v1051_v8, 0.0  ;;  %v474_v10 = vadd.f32 %v1669_v38, %v406_v58  ;;  %v427_v13 = vadd.f32 %v1669_v38, %v359_v63 }
  0xe3   : > { %v1131_v19 = vmax.f32 %v1067_v9, 0.0  ;;  %1211 = vst.msk [vmem:[%s1700_s18 + $0x148] sm:$0xff] %vm1169_vm2, %v1146_v14  ;;  %v458_v9 = vadd.f32 %v1669_v38, %v390_v57  ;;  %v443_v14 = vadd.f32 %v1669_v38, %v375_v0 }
  0xe4   : > { %1227 = vst.msk [vmem:[%s1700_s18 + $0x1c8] sm:$0xff] %vm1169_vm2, %v1162_v15  ;;  %v986_v24 = vpop.f32.mrf.mxu2  ;;  %v323_v15 = vld [vmem:[%s1652_s9 + $0x168] sm:$0xff]  ;;  %v491_v29 = vmax.f32 %v427_v13, 0.0 }
  0xe5   : > { %v1026_v25 = vpop.f32.mrf.mxu3  ;;  %1180 = vst.msk [vmem:[%s1700_s18 + $0x50] sm:$0xff] %vm1169_vm2, %v1115_v18  ;;  %v987_v30 = vadd.f32 %v1681_v46, %v986_v24  ;;  %v908_v32 = vpop.f32.mrf.mxu0  ;;  %v522_v23 = vmax.f32 %v458_v9, 0.0  ;;  %v538_v24 = vmax.f32 %v474_v10, 0.0 }
  0xe6   : > { %v1027_v31 = vadd.f32 %v1681_v46, %v1026_v25  ;;  %v948_v33 = vpop.f32.mrf.mxu1  ;;  %1196 = vst.msk [vmem:[%s1700_s18 + $0xd0] sm:$0xff] %vm1169_vm2, %v1131_v19  ;;  %v909_v35 = vadd.f32 %v1681_v46, %v908_v32  ;;  %v292_v19 = vld [vmem:[%s1652_s9 + $0x70] sm:$0xff]  ;;  %v391_v25 = vmul.f32 %v1659_v34, %v323_v15 }
  0xe7   : > { %v949_v36 = vadd.f32 %v1681_v46, %v948_v33  ;;  %v1083_v37 = vadd.f32 %v987_v30, %v520_v20  ;;  %v308_v20 = vld [vmem:[%s1652_s9 + $0xf0] sm:$0xff]  ;;  %v507_v30 = vmax.f32 %v443_v14, 0.0 }
  0xe8   : > { %v1099_v39 = vadd.f32 %v1027_v31, %v536_v21  ;;  %v1052_v42 = vadd.f32 %v909_v35, %v489_v26  ;;  %v407_v26 = vmul.f32 %v1659_v34, %v339_v16  ;;  %v360_v31 = vmul.f32 %v1659_v34, %v292_v19  ;;  %v341_v19 = vld [vmem:[%s1652_s9 + $0x1f8] sm:$0xff] }
  0xe9   : > { %v1068_v43 = vadd.f32 %v949_v36, %v505_v27  ;;  %v1147_v49 = vmax.f32 %v1083_v37, 0.0  ;;  %v376_v32 = vmul.f32 %v1659_v34, %v308_v20 }
  0xea   : > { %v1163_v50 = vmax.f32 %v1099_v39, 0.0  ;;  %v1116_v53 = vmax.f32 %v1052_v42, 0.0  ;;  %v475_v44 = vadd.f32 %v1669_v38, %v407_v26  ;;  %v428_v48 = vadd.f32 %v1669_v38, %v360_v31  ;;  %v1523_v31 = vld [vmem:[%s2065_s5] ss:$0 sm:$0xff] }
  0xeb   : > { %v1132_v54 = vmax.f32 %v1068_v43, 0.0  ;;  %1212 = vst.msk [vmem:[%s1700_s18 + $0x150] sm:$0xff] %vm1169_vm2, %v1147_v49  ;;  %v459_v43 = vadd.f32 %v1669_v38, %v391_v25  ;;  %v444_v49 = vadd.f32 %v1669_v38, %v376_v32 }
  0xec   : > { %1228 = vst.msk [vmem:[%s1700_s18 + $0x1d0] sm:$0xff] %vm1169_vm2, %v1163_v50  ;;  %v988_v59 = vpop.f32.mrf.mxu2  ;;  %v324_v50 = vld [vmem:[%s1652_s9 + $0x170] sm:$0xff]  ;;  %v492_v63 = vmax.f32 %v428_v48, 0.0 }
  0xed   : > { %v1028_v60 = vpop.f32.mrf.mxu3  ;;  %1181 = vst.msk [vmem:[%s1700_s18 + $0x58] sm:$0xff] %vm1169_vm2, %v1116_v53  ;;  %v989_v1 = vadd.f32 %v1681_v46, %v988_v59  ;;  %v911_v3 = vpop.f32.mrf.mxu0  ;;  %v523_v58 = vmax.f32 %v459_v43, 0.0  ;;  %v539_v59 = vmax.f32 %v475_v44, 0.0  ;;  %v508_v0 = vmax.f32 %v444_v49, 0.0 }
  0xee   : > { %v1029_v2 = vadd.f32 %v1681_v46, %v1028_v60  ;;  %v951_v4 = vpop.f32.mrf.mxu1  ;;  %1197 = vst.msk [vmem:[%s1700_s18 + $0xd8] sm:$0xff] %vm1169_vm2, %v1132_v54  ;;  %v912_v5 = vadd.f32 %v1681_v46, %v911_v3  ;;  %v293_v54 = vld [vmem:[%s1652_s9 + $0x78] sm:$0xff]  ;;  %v392_v60 = vmul.f32 %v1659_v34, %v324_v50 }
  0xef   : > { %v952_v6 = vadd.f32 %v1681_v46, %v951_v4  ;;  %v1084_v7 = vadd.f32 %v989_v1, %v521_v55  ;;  %v309_v55 = vld [vmem:[%s1652_s9 + $0xf8] sm:$0xff]  ;;  %v1521_v1 = vld [vmem:[%s2063_s3] ss:$0 sm:$0xff] }
  0xf0   : > { %v1100_v8 = vadd.f32 %v1029_v2, %v537_v56  ;;  %v1053_v11 = vadd.f32 %v912_v5, %v490_v61  ;;  %v408_v61 = vmul.f32 %v1659_v34, %v340_v51  ;;  %v361_v2 = vmul.f32 %v1521_v1, %v293_v54 }
  0xf1   : > { %v1069_v12 = vadd.f32 %v952_v6, %v506_v62  ;;  %v1148_v17 = vmax.f32 %v1084_v7, 0.0  ;;  %v377_v3 = vmul.f32 %v1521_v1, %v309_v55  ;;  %v409_v26 = vmul.f32 %v1521_v1, %v341_v19 }
  0xf2   : > { %v1164_v18 = vmax.f32 %v1100_v8, 0.0  ;;  %v1117_v21 = vmax.f32 %v1053_v11, 0.0  ;;  %v1522_v11 = vld [vmem:[%s2064_s4] ss:$0 sm:$0xff] }
  0xf3   : > { %v1133_v22 = vmax.f32 %v1069_v12, 0.0  ;;  %1213 = vst.msk [vmem:[%s1700_s18 + $0x158] sm:$0xff] %vm1169_vm2, %v1148_v17  ;;  %v460_v12 = vadd.f32 %v1522_v11, %v392_v60  ;;  %v476_v13 = vadd.f32 %v1522_v11, %v408_v61  ;;  %v429_v16 = vadd.f32 %v1522_v11, %v361_v2 }
  0xf4   : > { %1229 = vst.msk [vmem:[%s1700_s18 + $0x1d8] sm:$0xff] %vm1169_vm2, %v1164_v18  ;;  %v991_v27 = vpop.f32.mrf.mxu2  ;;  %v445_v17 = vadd.f32 %v1522_v11, %v377_v3  ;;  %v325_v18 = vld [vmem:[%s1652_s9 + $0x178] sm:$0xff]  ;;  %v477_v43 = vadd.f32 %v1522_v11, %v409_v26 }
  0xf5   : > { %v1031_v28 = vpop.f32.mrf.mxu3  ;;  %1182 = vst.msk [vmem:[%s1700_s18 + $0x60] sm:$0xff] %vm1169_vm2, %v1117_v21  ;;  %v992_v33 = vadd.f32 %v1681_v46, %v991_v27  ;;  %v913_v36 = vpop.f32.mrf.mxu0  ;;  %v393_v25 = vmul.f32 %v1521_v1, %v325_v18 }
  0xf6   : > { %v1032_v35 = vadd.f32 %v1681_v46, %v1031_v28  ;;  %v953_v37 = vpop.f32.mrf.mxu1  ;;  %1198 = vst.msk [vmem:[%s1700_s18 + $0xe0] sm:$0xff] %vm1169_vm2, %v1133_v22  ;;  %v914_v39 = vadd.f32 %v1681_v46, %v913_v36 }
  0xf7   : > { %v954_v40 = vadd.f32 %v1681_v46, %v953_v37  ;;  %v1085_v41 = vadd.f32 %v992_v33, %v522_v23  ;;  %v524_v23 = vmax.f32 %v460_v12, 0.0 }
  0xf8   : > { %v1101_v42 = vadd.f32 %v1032_v35, %v538_v24  ;;  %v1054_v45 = vadd.f32 %v914_v39, %v491_v29  ;;  %v540_v24 = vmax.f32 %v476_v13, 0.0  ;;  %v493_v29 = vmax.f32 %v429_v16, 0.0 }
  0xf9   : > { %v1070_v47 = vadd.f32 %v954_v40, %v507_v30  ;;  %v1149_v52 = vmax.f32 %v1085_v41, 0.0  ;;  %v509_v30 = vmax.f32 %v445_v17, 0.0 }
  0xfa   : > { %v1165_v53 = vmax.f32 %v1101_v42, 0.0  ;;  %v1118_v56 = vmax.f32 %v1054_v45, 0.0  ;;  %v461_v42 = vadd.f32 %v1522_v11, %v393_v25 }
  0xfb   : > { %v1134_v57 = vmax.f32 %v1070_v47, 0.0  ;;  %1214 = vst.msk [vmem:[%s1700_s18 + $0x160] sm:$0xff] %vm1169_vm2, %v1149_v52  ;;  %v541_v52 = vmax.f32 %v477_v43, 0.0 }
  0xfc   : > { %1230 = vst.msk [vmem:[%s1700_s18 + $0x1e0] sm:$0xff] %vm1169_vm2, %v1165_v53  ;;  %v993_v38 = vpop.f32.mrf.mxu2  ;;  %v525_v51 = vmax.f32 %v461_v42, 0.0 }
  0xfd   : > { %v1033_v62 = vpop.f32.mrf.mxu3  ;;  %1183 = vst.msk [vmem:[%s1700_s18 + $0x68] sm:$0xff] %vm1169_vm2, %v1118_v56  ;;  %v994_v4 = vadd.f32 %v1681_v46, %v993_v38  ;;  %v916_v34 = vpop.f32.mrf.mxu0 }
  0xfe   : > { %v1034_v5 = vadd.f32 %v1681_v46, %v1033_v62  ;;  %v956_v6 = vpop.f32.mrf.mxu1  ;;  %1199 = vst.msk [vmem:[%s1700_s18 + $0xe8] sm:$0xff] %vm1169_vm2, %v1134_v57  ;;  %v917_v7 = vadd.f32 %v1681_v46, %v916_v34 }
  0xff   : > { %v957_v8 = vadd.f32 %v1681_v46, %v956_v6  ;;  %v1086_v9 = vadd.f32 %v994_v4, %v523_v58 }
 0x100   : > { %v1102_v10 = vadd.f32 %v1034_v5, %v539_v59  ;;  %v1055_v14 = vadd.f32 %v917_v7, %v492_v63 }
 0x101   : > { %v1071_v15 = vadd.f32 %v957_v8, %v508_v0  ;;  %v1150_v20 = vmax.f32 %v1086_v9, 0.0 }
 0x102   : > { %v1166_v21 = vmax.f32 %v1102_v10, 0.0  ;;  %v1119_v46 = vmax.f32 %v1055_v14, 0.0 }
 0x103   : > { %v1135_v22 = vmax.f32 %v1071_v15, 0.0  ;;  %1215 = vst.msk [vmem:[%s1700_s18 + $0x168] sm:$0xff] %vm1169_vm2, %v1150_v20 }
 0x104   : > { %1231 = vst.msk [vmem:[%s1700_s18 + $0x1e8] sm:$0xff] %vm1169_vm2, %v1166_v21  ;;  %v996_v27 = vpop.f32.mrf.mxu2 }
 0x105   : > { %v1036_v28 = vpop.f32.mrf.mxu3  ;;  %1184 = vst.msk [vmem:[%s1700_s18 + $0x70] sm:$0xff] %vm1169_vm2, %v1119_v46  ;;  %v997_v32 = vadd.f32 %v1523_v31, %v996_v27  ;;  %v918_v35 = vpop.f32.mrf.mxu0 }
 0x106   : > { %v1037_v33 = vadd.f32 %v1523_v31, %v1036_v28  ;;  %v958_v36 = vpop.f32.mrf.mxu1  ;;  %1200 = vst.msk [vmem:[%s1700_s18 + $0xf0] sm:$0xff] %vm1169_vm2, %v1135_v22  ;;  %v919_v37 = vadd.f32 %v1523_v31, %v918_v35 }
 0x107   : > { %v959_v39 = vadd.f32 %v1523_v31, %v958_v36  ;;  %v1087_v40 = vadd.f32 %v997_v32, %v524_v23 }
 0x108   : > { %v1103_v41 = vadd.f32 %v1037_v33, %v540_v24  ;;  %v1056_v44 = vadd.f32 %v919_v37, %v493_v29 }
 0x109   : > { %v1072_v45 = vadd.f32 %v959_v39, %v509_v30  ;;  %v1151_v47 = vmax.f32 %v1087_v40, 0.0 }
 0x10a   : > { %v1167_v48 = vmax.f32 %v1103_v41, 0.0  ;;  %v1120_v49 = vmax.f32 %v1056_v44, 0.0 }
 0x10b   : > { %v1136_v50 = vmax.f32 %v1072_v45, 0.0  ;;  %1216 = vst.msk [vmem:[%s1700_s18 + $0x170] sm:$0xff] %vm1169_vm2, %v1151_v47 }
 0x10c   : > { %1232 = vst.msk [vmem:[%s1700_s18 + $0x1f0] sm:$0xff] %vm1169_vm2, %v1167_v48  ;;  %v998_v53 = vpop.f32.mrf.mxu2 }
 0x10d   : > { %v1038_v54 = vpop.f32.mrf.mxu3  ;;  %1185 = vst.msk [vmem:[%s1700_s18 + $0x78] sm:$0xff] %vm1169_vm2, %v1120_v49  ;;  %v999_v55 = vadd.f32 %v1523_v31, %v998_v53 }
 0x10e   : > { %v1039_v56 = vadd.f32 %v1523_v31, %v1038_v54  ;;  %1201 = vst.msk [vmem:[%s1700_s18 + $0xf8] sm:$0xff] %vm1169_vm2, %v1136_v50 }
 0x10f   : > { %v1088_v57 = vadd.f32 %v999_v55, %v525_v51 }
 0x110   : > { %v1104_v58 = vadd.f32 %v1039_v56, %v541_v52 }
 0x111   : > { %v1152_v59 = vmax.f32 %v1088_v57, 0.0 }
 0x112   : > { %v1168_v60 = vmax.f32 %v1104_v58, 0.0 }
 0x113   : > { %1217 = vst.msk [vmem:[%s1700_s18 + $0x178] sm:$0xff] %vm1169_vm2, %v1152_v59 }
 0x114   : > { %1233 = vst.msk [vmem:[%s1700_s18 + $0x1f8] sm:$0xff] %vm1169_vm2, %v1168_v60 }
 0x115 PF: > { %s16_s21 = sadd.s32 1, %s1530_s21  }
 0x116   : > { %p13_p4 = scmp.ge.s32.totalorder %s16_s21, 18  }
 0x118   :  { %15 = sbr.rel (!%p13_p4) target bundleno = 1 (0x1), region = 77 }

</bundles_post_ra>
